<compile_context>
chip_gen: v7x
topology: tpu7x:2x2x1
jax: 0.10.0
libtpu: 0.0.40
codegen_flags: <defaults>
</compile_context>

<pallas_src>
import math

import jax
import jax.numpy as jnp
from jax.experimental import pallas as pl

# ----------------------------------------------------------------------------
# Model hyper-parameters (small, consistent with the module's __init__)
# ----------------------------------------------------------------------------
HIDDEN = 16                      # params.hidden_size
EMB_SIZE = 2 * HIDDEN            # word-emb + char-emb concat = 32
PROJ = 32                        # embd_params['proj_size']
ATT_PROJ = 32                    # att_params['proj_size']
FFN_HIDDEN = 64
WORD_VOCAB = 50
CHAR_VOCAB = 30
B, LC, LQ, NCHAR = 2, 16, 8, 4   # batch, ctx len, query len, chars per word

LANES = 128
NEG_INF = -1e30                  # python float -> inline literal in the kernel


# ----------------------------------------------------------------------------
# In-kernel helpers (pure functions traced inside the Pallas kernel)
# ----------------------------------------------------------------------------
def _ld(ref, off):
    """Static-window load from a packed slab ref."""
    return ref[off[0], off[1]]


def _mxu_dot(a, b):
    """MXU matmul with bf16 operands, f32 accumulation."""
    return jnp.dot(a.astype(jnp.bfloat16), b.astype(jnp.bfloat16),
                   preferred_element_type=jnp.float32)


def _mxu_einsum(eq, a, b):
    return jnp.einsum(eq, a.astype(jnp.bfloat16), b.astype(jnp.bfloat16),
                      preferred_element_type=jnp.float32)


def _layernorm(x, g, b, eps=1e-5):
    mu = jnp.mean(x, axis=-1, keepdims=True)
    var = jnp.mean((x - mu) ** 2, axis=-1, keepdims=True)
    return (x - mu) * jax.lax.rsqrt(var + eps) * g + b


def _softmax_lastdim(x):
    m = jnp.max(x, axis=-1, keepdims=True)
    e = jnp.exp(x - m)
    return e * pl.reciprocal(jnp.sum(e, axis=-1, keepdims=True), approx=True)


def _masked_softmax_lastdim(x, mask):
    return _softmax_lastdim(jnp.where(mask > 0, x, NEG_INF))


def _masked_log_softmax(x, mask):
    x = jnp.where(mask > 0, x, NEG_INF)
    m = jnp.max(x, axis=-1, keepdims=True)
    lse = jnp.log(jnp.sum(jnp.exp(x - m), axis=-1, keepdims=True)) + m
    return x - lse


def _transformer_block(x, W_ref, V_ref, offW, offV, p, attn_mask=None):
    """Post-LN single-head transformer block; weights loaded at point of use."""
    # TODO(synk): exact transformer.TransformerBlock/TransformerDecoder variant
    # unknown; using a standard post-LN single-head block.
    Bb, L, D = x.shape
    scale = 1.0 / math.sqrt(D)                 # python float, no tracer capture
    x2 = x.reshape(Bb * L, D)

    qkv = _mxu_dot(x2, _ld(W_ref, offW[p + "_wqkv"])) + _ld(V_ref, offV[p + "_bqkv"])
    qkv = qkv.reshape(Bb, L, 3 * D)
    q = qkv[..., 0:D]
    k = qkv[..., D:2 * D]
    v = qkv[..., 2 * D:3 * D]

    s = _mxu_einsum("bqd,bkd->bqk", q, k) * scale
    if attn_mask is not None:
        s = jnp.where(attn_mask[None], s, NEG_INF)
    pattn = _softmax_lastdim(s)
    a = _mxu_einsum("bqk,bkd->bqd", pattn, v)

    a2 = (_mxu_dot(a.reshape(Bb * L, D), _ld(W_ref, offW[p + "_wo"]))
          + _ld(V_ref, offV[p + "_bo"]))
    h = _layernorm(x2 + a2,
                   _ld(V_ref, offV[p + "_ln1_g"]), _ld(V_ref, offV[p + "_ln1_b"]))

    f = jnp.maximum(_mxu_dot(h, _ld(W_ref, offW[p + "_w1"]))
                    + _ld(V_ref, offV[p + "_b1"]), 0.0)
    f = _mxu_dot(f, _ld(W_ref, offW[p + "_w2"])) + _ld(V_ref, offV[p + "_b2"])
    h = _layernorm(h + f,
                   _ld(V_ref, offV[p + "_ln2_g"]), _ld(V_ref, offV[p + "_ln2_b"]))
    return h.reshape(Bb, L, D)


# ----------------------------------------------------------------------------
# The single fused forward kernel (factory closes over static offsets/dims)
# ----------------------------------------------------------------------------
def _make_kernel(offW, offV, Bb, Lc, Lq, E, D):
    L = Lc + Lq

    def kernel(emb_ref, mask_ref, W_ref, V_ref, out_ref):
        # ---- embedding projection + positional encoding (dropout = identity) ----
        emb = emb_ref[...]                                      # (B, Lc+Lq, E)
        x = _mxu_dot(emb.reshape(Bb * L, E), _ld(W_ref, offW["embd_proj_w"]))
        x = x + _ld(V_ref, offV["embd_proj_b"])
        x = x.reshape(Bb, L, D) + _ld(W_ref, offW["pe"])[None]  # pe = [pe[:Lc]; pe[:Lq]]

        # ---- shared encoder block on ctx||qry rows (block-diagonal attention) ----
        rr = jax.lax.broadcasted_iota(jnp.int32, (L, L), 0)
        cc = jax.lax.broadcasted_iota(jnp.int32, (L, L), 1)
        blk_mask = (rr < Lc) == (cc < Lc)       # ctx<->ctx and qry<->qry only
        h = _transformer_block(x, W_ref, V_ref, offW, offV, "enc", attn_mask=blk_mask)
        c_enc = h[:, 0:Lc]                                      # (B, Lc, D)
        q_enc = h[:, Lc:L]                                      # (B, Lq, D)

        # ---- masks (lane-packed slab) ----
        ctx_mask = mask_ref[:, 0:1, 0:Lc]                       # (B, 1, Lc)
        qry_mask = mask_ref[:, 1:2, 0:Lq]                       # (B, 1, Lq)
        ctx_mask_pad = mask_ref[:, 0:1, :]                      # (B, 1, 128)

        # ---- BiDAF attention (both softmaxes reduce along the lane axis) ----
        wc = _ld(V_ref, offV["bidaf_wc"])[:, None, :]           # (1,1,D)
        wq = _ld(V_ref, offV["bidaf_wq"])[:, None, :]
        wcq = _ld(V_ref, offV["bidaf_wcq"])[:, None, :]
        bias = _ld(V_ref, offV["bidaf_bias"])[:, :, None]       # (1,1,1)

        cw = c_enc * wcq
        s0 = jnp.sum(c_enc * wc, axis=-1)                       # (B, Lc)
        s1 = jnp.sum(q_enc * wq, axis=-1)                       # (B, Lq)
        s = (s0[:, :, None] + s1[:, None, :]
             + _mxu_einsum("bid,bjd->bij", cw, q_enc) + bias)   # (B, Lc, Lq)
        # transposed scores rebuilt directly (avoids a sublane softmax / transpose)
        sT = (s1[:, :, None] + s0[:, None, :]
              + _mxu_einsum("bqd,bcd->bqc", q_enc, cw) + bias)  # (B, Lq, Lc)

        p1 = _masked_softmax_lastdim(s, qry_mask)               # softmax over Lq
        p2t = _masked_softmax_lastdim(sT, ctx_mask)             # softmax over Lc

        a = _mxu_einsum("bij,bjd->bid", p1, q_enc)              # (B, Lc, D)
        bmat = _mxu_einsum("bij,bjk->bik", p1, p2t)             # (B, Lc, Lc)
        bvec = _mxu_einsum("bik,bkd->bid", bmat, c_enc)         # (B, Lc, D)

        # ---- attention projection: ONE K=4D (=128) MXU matmul ----
        g = jnp.concatenate([c_enc, a, c_enc * a, c_enc * bvec], axis=-1)
        att = (_mxu_dot(g.reshape(Bb * Lc, 4 * D), _ld(W_ref, offW["att_proj_w"]))
               + _ld(V_ref, offV["att_proj_b"]))
        att = att.reshape(Bb, Lc, D)

        # ---- modeling (decoder) block ----
        mod = _transformer_block(att, W_ref, V_ref, offW, offV, "mod")

        # ---- output heads + masked log-softmax, lane-dense (B,2,128) store ----
        # TODO(synk): transformer.TransformerOut source unavailable; using two
        # linear heads + masked log-softmax over the context (start/end pointers).
        ws = _ld(V_ref, offV["head_ws"])[:, None, :]            # (1,1,D)
        we = _ld(V_ref, offV["head_we"])[:, None, :]
        l1 = jnp.sum(mod * ws, axis=-1) + _ld(V_ref, offV["b_start"])   # (B, Lc)
        l2 = jnp.sum(mod * we, axis=-1) + _ld(V_ref, offV["b_end"])
        logits = jnp.stack([l1, l2], axis=1)                    # (B, 2, Lc)
        logits = jnp.concatenate(
            [logits, jnp.zeros((Bb, 2, LANES - Lc), jnp.float32)], axis=-1)
        out_ref[...] = _masked_log_softmax(logits, ctx_mask_pad).astype(out_ref.dtype)

    return kernel


# ----------------------------------------------------------------------------
# Host-side packing of parameters into two slabs (static offsets)
# ----------------------------------------------------------------------------
def _pack_slab(bands, width=LANES):
    """bands: list of row-bands; each band is a list of (name, 2-D array)
    placed side by side.  Returns (slab[(rows,width)], {name: (rslice, cslice)})."""
    offsets = {}
    parts = []
    r = 0
    for band in bands:
        band_rows = max(a.shape[0] for _, a in band)
        row = jnp.zeros((band_rows, width), jnp.float32)
        c = 0
        for name, a in band:
            h, w = a.shape
            row = row.at[0:h, c:c + w].set(a.astype(jnp.float32))
            offsets[name] = (slice(r, r + h), slice(c, c + w))
            c += w
        parts.append(row)
        r += band_rows
    pad = (-r) % 8
    if pad:
        parts.append(jnp.zeros((pad, width), jnp.float32))
    return jnp.concatenate(parts, axis=0), offsets


def _pack_params(params, Lc, Lq):
    enc, mod, out = params["enc"], params["mod"], params["out"]
    pe = params["pos_enc"]
    pe_comb = jnp.concatenate([pe[:Lc], pe[:Lq]], axis=0)        # (Lc+Lq, D)

    w_bands = [
        [("embd_proj_w", params["embd_proj_w"]), ("enc_w2", enc["w2"]),
         ("mod_w2", mod["w2"]), ("pe", pe_comb)],
        [("enc_wqkv", enc["wqkv"]), ("enc_wo", enc["wo"])],
        [("mod_wqkv", mod["wqkv"]), ("mod_wo", mod["wo"])],
        [("enc_w1", enc["w1"]), ("mod_w1", mod["w1"])],
        [("att_proj_w", params["att_proj_w"])],
    ]
    W_slab, offW = _pack_slab(w_bands)

    r = lambda v: v.reshape(1, -1)
    v_bands = [
        [("embd_proj_b", r(params["embd_proj_b"])), ("bidaf_wc", r(params["bidaf_wc"])),
         ("bidaf_wq", r(params["bidaf_wq"])), ("bidaf_wcq", r(params["bidaf_wcq"]))],
        [("enc_bqkv", r(enc["bqkv"])), ("enc_bo", r(enc["bo"]))],
        [("enc_ln1_g", r(enc["ln1_g"])), ("enc_ln1_b", r(enc["ln1_b"])),
         ("enc_b1", r(enc["b1"]))],
        [("enc_b2", r(enc["b2"])), ("enc_ln2_g", r(enc["ln2_g"])),
         ("enc_ln2_b", r(enc["ln2_b"])), ("att_proj_b", r(params["att_proj_b"]))],
        [("mod_bqkv", r(mod["bqkv"])), ("mod_bo", r(mod["bo"]))],
        [("mod_ln1_g", r(mod["ln1_g"])), ("mod_ln1_b", r(mod["ln1_b"])),
         ("mod_b1", r(mod["b1"]))],
        [("mod_b2", r(mod["b2"])), ("mod_ln2_g", r(mod["ln2_g"])),
         ("mod_ln2_b", r(mod["ln2_b"])), ("head_ws", r(out["w_start"]))],
        [("head_we", r(out["w_end"])), ("b_start", r(out["b_start"])),
         ("b_end", r(out["b_end"])), ("bidaf_bias", r(params["bidaf_bias"]))],
    ]
    V_slab, offV = _pack_slab(v_bands)
    return W_slab, offW, V_slab, offV


# ----------------------------------------------------------------------------
# Host-side wrapper (embedding gathers stay in plain JAX)
# ----------------------------------------------------------------------------
def embed(char_idxs, word_idxs, params):
    # TODO(synk): embedding.Embedding internals (char-CNN + highway) were not
    # provided; approximated as word-emb || mean(char-emb) -> 2*hidden.
    w_emb = jnp.take(params["word_emb"], word_idxs, axis=0)          # (B, L, H)
    c_emb = jnp.mean(jnp.take(params["char_emb"], char_idxs, axis=0), axis=2)
    return jnp.concatenate([w_emb, c_emb], axis=-1)                  # (B, L, 2H)


def forward(params, ctx_char_idxs, query_char_idxs, ctx_word_idxs, query_word_idxs):
    ctx_mask = (ctx_word_idxs != 0).astype(jnp.float32)              # (B, Lc)
    query_mask = (query_word_idxs != 0).astype(jnp.float32)          # (B, Lq)

    ctx_emb = embed(ctx_char_idxs, ctx_word_idxs, params)            # (B, Lc, 2H)
    query_emb = embed(query_char_idxs, query_word_idxs, params)      # (B, Lq, 2H)

    Bb, Lc = ctx_mask.shape
    Lq = query_mask.shape[1]
    E = ctx_emb.shape[-1]
    D = params["embd_proj_w"].shape[1]

    # Packed inputs: 4 slabs instead of 41 tiny arrays.
    emb_slab = jnp.concatenate([ctx_emb, query_emb], axis=1)         # (B, Lc+Lq, E)
    mask_slab = jnp.zeros((Bb, 2, LANES), jnp.float32)
    mask_slab = mask_slab.at[:, 0, :Lc].set(ctx_mask)
    mask_slab = mask_slab.at[:, 1, :Lq].set(query_mask)
    W_slab, offW, V_slab, offV = _pack_params(params, Lc, Lq)

    kernel = _make_kernel(offW, offV, Bb, Lc, Lq, E, D)
    out = pl.pallas_call(                                            # grid-less, VMEM-resident
        kernel,
        out_shape=jax.ShapeDtypeStruct((Bb, 2, LANES), jnp.float32),
    )(emb_slab, mask_slab, W_slab, V_slab)

    return out[:, 0, :Lc], out[:, 1, :Lc]


# ----------------------------------------------------------------------------
# Deterministic parameter init
# ----------------------------------------------------------------------------
def positional_encoding(L, D):
    pos = jnp.arange(L, dtype=jnp.float32)[:, None]
    i = jnp.arange(D // 2, dtype=jnp.float32)[None, :]
    angle = pos / jnp.power(10000.0, 2.0 * i / D)
    pe = jnp.zeros((L, D), jnp.float32)
    pe = pe.at[:, 0::2].set(jnp.sin(angle))
    pe = pe.at[:, 1::2].set(jnp.cos(angle))
    return pe


def _dense(key, fan_in, fan_out):
    w = jax.random.normal(key, (fan_in, fan_out), jnp.float32) / math.sqrt(float(fan_in))
    b = jnp.zeros((fan_out,), jnp.float32)
    return w, b


def _block_params(key, d, ffn):
    ks = jax.random.split(key, 4)
    p = {}
    p["wqkv"] = jax.random.normal(ks[0], (d, 3 * d), jnp.float32) / math.sqrt(float(d))
    p["bqkv"] = jnp.zeros((3 * d,), jnp.float32)
    p["wo"], p["bo"] = _dense(ks[1], d, d)
    p["w1"], p["b1"] = _dense(ks[2], d, ffn)
    p["w2"], p["b2"] = _dense(ks[3], ffn, d)
    p["ln1_g"] = jnp.ones((d,), jnp.float32)
    p["ln1_b"] = jnp.zeros((d,), jnp.float32)
    p["ln2_g"] = jnp.ones((d,), jnp.float32)
    p["ln2_b"] = jnp.zeros((d,), jnp.float32)
    return p


def init_params(key):
    ks = jax.random.split(key, 12)
    params = {}
    word_emb = jax.random.normal(ks[0], (WORD_VOCAB, HIDDEN), jnp.float32) * 0.1
    char_emb = jax.random.normal(ks[1], (CHAR_VOCAB, HIDDEN), jnp.float32) * 0.1
    params["word_emb"] = word_emb.at[0].set(0.0)       # padding idx
    params["char_emb"] = char_emb.at[0].set(0.0)
    params["embd_proj_w"], params["embd_proj_b"] = _dense(ks[2], EMB_SIZE, PROJ)
    params["pos_enc"] = positional_encoding(max(LC, LQ), PROJ)
    params["enc"] = _block_params(ks[3], PROJ, FFN_HIDDEN)
    params["bidaf_wc"] = jax.random.normal(ks[4], (PROJ,), jnp.float32) / math.sqrt(PROJ)
    params["bidaf_wq"] = jax.random.normal(ks[5], (PROJ,), jnp.float32) / math.sqrt(PROJ)
    params["bidaf_wcq"] = jax.random.normal(ks[6], (PROJ,), jnp.float32) / math.sqrt(PROJ)
    params["bidaf_bias"] = jnp.zeros((1,), jnp.float32)
    params["att_proj_w"], params["att_proj_b"] = _dense(ks[7], 4 * PROJ, ATT_PROJ)
    params["mod"] = _block_params(ks[8], ATT_PROJ, FFN_HIDDEN)
    ws, bs = _dense(ks[9], ATT_PROJ, 1)
    we, be = _dense(ks[10], ATT_PROJ, 1)
    params["out"] = {"w_start": ws[:, 0], "b_start": bs,
                     "w_end": we[:, 0], "b_end": be}
    return params


# ----------------------------------------------------------------------------
if __name__ == "__main__":
    key = jax.random.PRNGKey(0)
    k_in, k_par = jax.random.split(key)
    kw1, kw2, kc1, kc2 = jax.random.split(k_in, 4)

    ctx_word_idxs = jax.random.randint(kw1, (B, LC), 1, WORD_VOCAB, dtype=jnp.int32)
    ctx_word_idxs = ctx_word_idxs.at[1, -3:].set(0)          # some padding
    query_word_idxs = jax.random.randint(kw2, (B, LQ), 1, WORD_VOCAB, dtype=jnp.int32)
    query_word_idxs = query_word_idxs.at[1, -2:].set(0)
    ctx_char_idxs = jax.random.randint(kc1, (B, LC, NCHAR), 1, CHAR_VOCAB, dtype=jnp.int32)
    query_char_idxs = jax.random.randint(kc2, (B, LQ, NCHAR), 1, CHAR_VOCAB, dtype=jnp.int32)

    params = init_params(k_par)

    fwd = jax.jit(forward)
    log_p1, log_p2 = fwd(params, ctx_char_idxs, query_char_idxs,
                         ctx_word_idxs, query_word_idxs)
    jax.block_until_ready((log_p1, log_p2))

    assert log_p1.shape == (B, LC) and log_p2.shape == (B, LC)
    assert bool(jnp.all(jnp.isfinite(log_p1))) and bool(jnp.all(jnp.isfinite(log_p2)))
    print("KERNEL_OK")
</pallas_src>

<mosaic_0001>
module attributes {stable_mosaic.version = 11 : i64} {
  func.func @kernel(%arg0: memref<2x24x32xf32, #tpu.memory_space<vmem>>, %arg1: memref<2x2x128xf32, #tpu.memory_space<vmem>>, %arg2: memref<288x128xf32, #tpu.memory_space<vmem>>, %arg3: memref<8x128xf32, #tpu.memory_space<vmem>>, %arg4: memref<2x2x128xf32, #tpu.memory_space<vmem>>) attributes {dimension_semantics = [], scalar_prefetch = 0 : i64, scratch_operands = 0 : i64, tpu.core_type = #tpu.core_type<tc>} {
    %c0 = arith.constant 0 : index
    %c0_0 = arith.constant 0 : index
    %c0_1 = arith.constant 0 : index
    %0 = vector.load %arg0[%c0, %c0_0, %c0_1] : memref<2x24x32xf32, #tpu.memory_space<vmem>>, vector<2x24x32xf32>
    %1 = vector.shape_cast %0 : vector<2x24x32xf32> to vector<48x32xf32>
    %c0_2 = arith.constant 0 : index
    %c0_3 = arith.constant 0 : index
    %2 = vector.load %arg2[%c0_2, %c0_3] : memref<288x128xf32, #tpu.memory_space<vmem>>, vector<32x32xf32>
    %3 = arith.truncf %1 : vector<48x32xf32> to vector<48x32xbf16>
    %4 = arith.truncf %2 : vector<32x32xf32> to vector<32x32xbf16>
    %cst = arith.constant dense<0.000000e+00> : vector<48x32xf32>
    %5 = tpu.matmul %3, %4, %cst {dimension_numbers = #tpu.dot_dimension_numbers<[1], [0], [0], [1], [0, 0, 1, 1], [], []>} : vector<48x32xbf16>, vector<32x32xbf16>, vector<48x32xf32> -> vector<48x32xf32>
    %c0_4 = arith.constant 0 : index
    %c0_5 = arith.constant 0 : index
    %6 = vector.load %arg3[%c0_4, %c0_5] : memref<8x128xf32, #tpu.memory_space<vmem>>, vector<1x32xf32>
    %7 = vector.broadcast %6 : vector<1x32xf32> to vector<48x32xf32>
    %8 = arith.addf %5, %7 : vector<48x32xf32>
    %9 = vector.shape_cast %8 : vector<48x32xf32> to vector<2x24x32xf32>
    %c0_6 = arith.constant 0 : index
    %c96 = arith.constant 96 : index
    %10 = vector.load %arg2[%c0_6, %c96] : memref<288x128xf32, #tpu.memory_space<vmem>>, vector<24x32xf32>
    %11 = vector.shape_cast %10 : vector<24x32xf32> to vector<1x24x32xf32>
    %12 = vector.broadcast %11 : vector<1x24x32xf32> to vector<2x24x32xf32>
    %13 = arith.addf %9, %12 : vector<2x24x32xf32>
    %14 = tpu.iota {dimensions = array<i32: 0>} : vector<24x24xi32>
    %15 = tpu.iota {dimensions = array<i32: 1>} : vector<24x24xi32>
    %c16_i32 = arith.constant 16 : i32
    %16 = vector.broadcast %c16_i32 : i32 to vector<24x24xi32>
    %17 = arith.cmpi slt, %14, %16 : vector<24x24xi32>
    %c16_i32_7 = arith.constant 16 : i32
    %18 = vector.broadcast %c16_i32_7 : i32 to vector<24x24xi32>
    %19 = arith.cmpi slt, %15, %18 : vector<24x24xi32>
    %20 = arith.xori %17, %19 : vector<24x24xi1>
    %cst_8 = arith.constant dense<true> : vector<24x24xi1>
    %21 = arith.xori %20, %cst_8 : vector<24x24xi1>
    %22 = vector.shape_cast %13 : vector<2x24x32xf32> to vector<48x32xf32>
    %c64 = arith.constant 64 : index
    %c0_9 = arith.constant 0 : index
    %23 = vector.load %arg2[%c64, %c0_9] : memref<288x128xf32, #tpu.memory_space<vmem>>, vector<32x96xf32>
    %24 = arith.truncf %22 : vector<48x32xf32> to vector<48x32xbf16>
    %25 = arith.truncf %23 : vector<32x96xf32> to vector<32x96xbf16>
    %cst_10 = arith.constant dense<0.000000e+00> : vector<48x96xf32>
    %26 = tpu.matmul %24, %25, %cst_10 {dimension_numbers = #tpu.dot_dimension_numbers<[1], [0], [0], [1], [0, 0, 1, 1], [], []>} : vector<48x32xbf16>, vector<32x96xbf16>, vector<48x96xf32> -> vector<48x96xf32>
    %c1 = arith.constant 1 : index
    %c0_11 = arith.constant 0 : index
    %27 = vector.load %arg3[%c1, %c0_11] : memref<8x128xf32, #tpu.memory_space<vmem>>, vector<1x96xf32>
    %28 = vector.broadcast %27 : vector<1x96xf32> to vector<48x96xf32>
    %29 = arith.addf %26, %28 : vector<48x96xf32>
    %30 = vector.shape_cast %29 : vector<48x96xf32> to vector<2x24x96xf32>
    %31 = vector.extract_strided_slice %30 {offsets = [0, 0, 0], sizes = [2, 24, 32], strides = [1, 1, 1]} : vector<2x24x96xf32> to vector<2x24x32xf32>
    %32 = vector.extract_strided_slice %30 {offsets = [0, 0, 32], sizes = [2, 24, 32], strides = [1, 1, 1]} : vector<2x24x96xf32> to vector<2x24x32xf32>
    %33 = vector.extract_strided_slice %30 {offsets = [0, 0, 64], sizes = [2, 24, 32], strides = [1, 1, 1]} : vector<2x24x96xf32> to vector<2x24x32xf32>
    %34 = arith.truncf %31 : vector<2x24x32xf32> to vector<2x24x32xbf16>
    %35 = arith.truncf %32 : vector<2x24x32xf32> to vector<2x24x32xbf16>
    "tpu.trace_start"() <{level = 10 : i32, message = "bqd,bkd->bqk"}> : () -> ()
    %cst_12 = arith.constant dense<0.000000e+00> : vector<2x24x24xf32>
    %36 = tpu.matmul %34, %35, %cst_12 {dimension_numbers = #tpu.dot_dimension_numbers<[2], [2], [1], [1], [0, 0, 0, 1, 1, 1], [0], [0]>} : vector<2x24x32xbf16>, vector<2x24x32xbf16>, vector<2x24x24xf32> -> vector<2x24x24xf32>
    "tpu.trace_stop"() : () -> ()
    %cst_13 = arith.constant 0.176776692 : f32
    %37 = vector.broadcast %cst_13 : f32 to vector<2x24x24xf32>
    %38 = arith.mulf %36, %37 : vector<2x24x24xf32>
    %39 = vector.shape_cast %21 : vector<24x24xi1> to vector<1x24x24xi1>
    %cst_14 = arith.constant -1.000000e+30 : f32
    %40 = vector.shape_cast %39 : vector<1x24x24xi1> to vector<1x24x24xi1>
    %41 = vector.broadcast %40 : vector<1x24x24xi1> to vector<2x24x24xi1>
    %42 = vector.broadcast %cst_14 : f32 to vector<2x24x24xf32>
    %43 = arith.select %41, %38, %42 : vector<2x24x24xi1>, vector<2x24x24xf32>
    %cst_15 = arith.constant dense<0xFF800000> : vector<2x24xf32>
    %44 = vector.multi_reduction <maximumf>, %43, %cst_15 [2] : vector<2x24x24xf32> to vector<2x24xf32>
    %45 = vector.shape_cast %44 : vector<2x24xf32> to vector<2x24x1xf32>
    %46 = vector.broadcast %45 : vector<2x24x1xf32> to vector<2x24x24xf32>
    %47 = arith.subf %43, %46 : vector<2x24x24xf32>
    %48 = math.exp %47 : vector<2x24x24xf32>
    %cst_16 = arith.constant dense<0.000000e+00> : vector<2x24xf32>
    %49 = vector.multi_reduction <add>, %48, %cst_16 [2] : vector<2x24x24xf32> to vector<2x24xf32>
    %50 = vector.shape_cast %49 : vector<2x24xf32> to vector<2x24x1xf32>
    %51 = tpu.reciprocal %50 {approx = true} : vector<2x24x1xf32> -> vector<2x24x1xf32>
    %52 = vector.broadcast %51 : vector<2x24x1xf32> to vector<2x24x24xf32>
    %53 = arith.mulf %48, %52 : vector<2x24x24xf32>
    %54 = arith.truncf %53 : vector<2x24x24xf32> to vector<2x24x24xbf16>
    %55 = arith.truncf %33 : vector<2x24x32xf32> to vector<2x24x32xbf16>
    "tpu.trace_start"() <{level = 10 : i32, message = "bqk,bkd->bqd"}> : () -> ()
    %cst_17 = arith.constant dense<0.000000e+00> : vector<2x24x32xf32>
    %56 = tpu.matmul %54, %55, %cst_17 {dimension_numbers = #tpu.dot_dimension_numbers<[2], [1], [1], [2], [0, 0, 0, 1, 1, 2], [0], [0]>} : vector<2x24x24xbf16>, vector<2x24x32xbf16>, vector<2x24x32xf32> -> vector<2x24x32xf32>
    "tpu.trace_stop"() : () -> ()
    %57 = vector.shape_cast %56 : vector<2x24x32xf32> to vector<48x32xf32>
    %c64_18 = arith.constant 64 : index
    %c96_19 = arith.constant 96 : index
    %58 = vector.load %arg2[%c64_18, %c96_19] : memref<288x128xf32, #tpu.memory_space<vmem>>, vector<32x32xf32>
    %59 = arith.truncf %57 : vector<48x32xf32> to vector<48x32xbf16>
    %60 = arith.truncf %58 : vector<32x32xf32> to vector<32x32xbf16>
    %cst_20 = arith.constant dense<0.000000e+00> : vector<48x32xf32>
    %61 = tpu.matmul %59, %60, %cst_20 {dimension_numbers = #tpu.dot_dimension_numbers<[1], [0], [0], [1], [0, 0, 1, 1], [], []>} : vector<48x32xbf16>, vector<32x32xbf16>, vector<48x32xf32> -> vector<48x32xf32>
    %c1_21 = arith.constant 1 : index
    %c96_22 = arith.constant 96 : index
    %62 = vector.load %arg3[%c1_21, %c96_22] : memref<8x128xf32, #tpu.memory_space<vmem>>, vector<1x32xf32>
    %63 = vector.broadcast %62 : vector<1x32xf32> to vector<48x32xf32>
    %64 = arith.addf %61, %63 : vector<48x32xf32>
    %65 = arith.addf %22, %64 : vector<48x32xf32>
    %c2 = arith.constant 2 : index
    %c0_23 = arith.constant 0 : index
    %66 = vector.load %arg3[%c2, %c0_23] : memref<8x128xf32, #tpu.memory_space<vmem>>, vector<1x32xf32>
    %c2_24 = arith.constant 2 : index
    %c32 = arith.constant 32 : index
    %67 = vector.load %arg3[%c2_24, %c32] : memref<8x128xf32, #tpu.memory_space<vmem>>, vector<1x32xf32>
    %cst_25 = arith.constant dense<0.000000e+00> : vector<48xf32>
    %68 = vector.multi_reduction <add>, %65, %cst_25 [1] : vector<48x32xf32> to vector<48xf32>
    %69 = vector.shape_cast %68 : vector<48xf32> to vector<48x1xf32>
    %cst_26 = arith.constant 3.200000e+01 : f32
    %70 = vector.broadcast %cst_26 : f32 to vector<48x1xf32>
    %71 = arith.divf %69, %70 : vector<48x1xf32>
    %72 = vector.broadcast %71 : vector<48x1xf32> to vector<48x32xf32>
    %73 = arith.subf %65, %72 : vector<48x32xf32>
    %74 = arith.mulf %73, %73 : vector<48x32xf32>
    %cst_27 = arith.constant dense<0.000000e+00> : vector<48xf32>
    %75 = vector.multi_reduction <add>, %74, %cst_27 [1] : vector<48x32xf32> to vector<48xf32>
    %76 = vector.shape_cast %75 : vector<48xf32> to vector<48x1xf32>
    %cst_28 = arith.constant 3.200000e+01 : f32
    %77 = vector.broadcast %cst_28 : f32 to vector<48x1xf32>
    %78 = arith.divf %76, %77 : vector<48x1xf32>
    %79 = vector.broadcast %71 : vector<48x1xf32> to vector<48x32xf32>
    %80 = arith.subf %65, %79 : vector<48x32xf32>
    %cst_29 = arith.constant 9.99999974E-6 : f32
    %81 = vector.broadcast %cst_29 : f32 to vector<48x1xf32>
    %82 = arith.addf %78, %81 : vector<48x1xf32>
    %83 = math.rsqrt %82 : vector<48x1xf32>
    %84 = vector.broadcast %83 : vector<48x1xf32> to vector<48x32xf32>
    %85 = arith.mulf %80, %84 : vector<48x32xf32>
    %86 = vector.broadcast %66 : vector<1x32xf32> to vector<48x32xf32>
    %87 = arith.mulf %85, %86 : vector<48x32xf32>
    %88 = vector.broadcast %67 : vector<1x32xf32> to vector<48x32xf32>
    %89 = arith.addf %87, %88 : vector<48x32xf32>
    %c128 = arith.constant 128 : index
    %c0_30 = arith.constant 0 : index
    %90 = vector.load %arg2[%c128, %c0_30] : memref<288x128xf32, #tpu.memory_space<vmem>>, vector<32x64xf32>
    %91 = arith.truncf %89 : vector<48x32xf32> to vector<48x32xbf16>
    %92 = arith.truncf %90 : vector<32x64xf32> to vector<32x64xbf16>
    %cst_31 = arith.constant dense<0.000000e+00> : vector<48x64xf32>
    %93 = tpu.matmul %91, %92, %cst_31 {dimension_numbers = #tpu.dot_dimension_numbers<[1], [0], [0], [1], [0, 0, 1, 1], [], []>} : vector<48x32xbf16>, vector<32x64xbf16>, vector<48x64xf32> -> vector<48x64xf32>
    %c2_32 = arith.constant 2 : index
    %c64_33 = arith.constant 64 : index
    %94 = vector.load %arg3[%c2_32, %c64_33] : memref<8x128xf32, #tpu.memory_space<vmem>>, vector<1x64xf32>
    %95 = vector.broadcast %94 : vector<1x64xf32> to vector<48x64xf32>
    %96 = arith.addf %93, %95 : vector<48x64xf32>
    %cst_34 = arith.constant 0.000000e+00 : f32
    %97 = vector.broadcast %cst_34 : f32 to vector<48x64xf32>
    %98 = arith.maximumf %96, %97 : vector<48x64xf32>
    %c0_35 = arith.constant 0 : index
    %c32_36 = arith.constant 32 : index
    %99 = vector.load %arg2[%c0_35, %c32_36] : memref<288x128xf32, #tpu.memory_space<vmem>>, vector<64x32xf32>
    %100 = arith.truncf %98 : vector<48x64xf32> to vector<48x64xbf16>
    %101 = arith.truncf %99 : vector<64x32xf32> to vector<64x32xbf16>
    %cst_37 = arith.constant dense<0.000000e+00> : vector<48x32xf32>
    %102 = tpu.matmul %100, %101, %cst_37 {dimension_numbers = #tpu.dot_dimension_numbers<[1], [0], [0], [1], [0, 0, 1, 1], [], []>} : vector<48x64xbf16>, vector<64x32xbf16>, vector<48x32xf32> -> vector<48x32xf32>
    %c3 = arith.constant 3 : index
    %c0_38 = arith.constant 0 : index
    %103 = vector.load %arg3[%c3, %c0_38] : memref<8x128xf32, #tpu.memory_space<vmem>>, vector<1x32xf32>
    %104 = vector.broadcast %103 : vector<1x32xf32> to vector<48x32xf32>
    %105 = arith.addf %102, %104 : vector<48x32xf32>
    %106 = arith.addf %89, %105 : vector<48x32xf32>
    %c3_39 = arith.constant 3 : index
    %c32_40 = arith.constant 32 : index
    %107 = vector.load %arg3[%c3_39, %c32_40] : memref<8x128xf32, #tpu.memory_space<vmem>>, vector<1x32xf32>
    %c3_41 = arith.constant 3 : index
    %c64_42 = arith.constant 64 : index
    %108 = vector.load %arg3[%c3_41, %c64_42] : memref<8x128xf32, #tpu.memory_space<vmem>>, vector<1x32xf32>
    %cst_43 = arith.constant dense<0.000000e+00> : vector<48xf32>
    %109 = vector.multi_reduction <add>, %106, %cst_43 [1] : vector<48x32xf32> to vector<48xf32>
    %110 = vector.shape_cast %109 : vector<48xf32> to vector<48x1xf32>
    %cst_44 = arith.constant 3.200000e+01 : f32
    %111 = vector.broadcast %cst_44 : f32 to vector<48x1xf32>
    %112 = arith.divf %110, %111 : vector<48x1xf32>
    %113 = vector.broadcast %112 : vector<48x1xf32> to vector<48x32xf32>
    %114 = arith.subf %106, %113 : vector<48x32xf32>
    %115 = arith.mulf %114, %114 : vector<48x32xf32>
    %cst_45 = arith.constant dense<0.000000e+00> : vector<48xf32>
    %116 = vector.multi_reduction <add>, %115, %cst_45 [1] : vector<48x32xf32> to vector<48xf32>
    %117 = vector.shape_cast %116 : vector<48xf32> to vector<48x1xf32>
    %cst_46 = arith.constant 3.200000e+01 : f32
    %118 = vector.broadcast %cst_46 : f32 to vector<48x1xf32>
    %119 = arith.divf %117, %118 : vector<48x1xf32>
    %120 = vector.broadcast %112 : vector<48x1xf32> to vector<48x32xf32>
    %121 = arith.subf %106, %120 : vector<48x32xf32>
    %cst_47 = arith.constant 9.99999974E-6 : f32
    %122 = vector.broadcast %cst_47 : f32 to vector<48x1xf32>
    %123 = arith.addf %119, %122 : vector<48x1xf32>
    %124 = math.rsqrt %123 : vector<48x1xf32>
    %125 = vector.broadcast %124 : vector<48x1xf32> to vector<48x32xf32>
    %126 = arith.mulf %121, %125 : vector<48x32xf32>
    %127 = vector.broadcast %107 : vector<1x32xf32> to vector<48x32xf32>
    %128 = arith.mulf %126, %127 : vector<48x32xf32>
    %129 = vector.broadcast %108 : vector<1x32xf32> to vector<48x32xf32>
    %130 = arith.addf %128, %129 : vector<48x32xf32>
    %131 = vector.shape_cast %130 : vector<48x32xf32> to vector<2x24x32xf32>
    %132 = vector.extract_strided_slice %131 {offsets = [0, 0, 0], sizes = [2, 16, 32], strides = [1, 1, 1]} : vector<2x24x32xf32> to vector<2x16x32xf32>
    %133 = vector.extract_strided_slice %131 {offsets = [0, 16, 0], sizes = [2, 8, 32], strides = [1, 1, 1]} : vector<2x24x32xf32> to vector<2x8x32xf32>
    %c0_48 = arith.constant 0 : index
    %c0_49 = arith.constant 0 : index
    %c0_50 = arith.constant 0 : index
    %134 = vector.load %arg1[%c0_48, %c0_49, %c0_50] : memref<2x2x128xf32, #tpu.memory_space<vmem>>, vector<2x1x16xf32>
    %c0_51 = arith.constant 0 : index
    %c1_52 = arith.constant 1 : index
    %c0_53 = arith.constant 0 : index
    %135 = vector.load %arg1[%c0_51, %c1_52, %c0_53] : memref<2x2x128xf32, #tpu.memory_space<vmem>>, vector<2x1x8xf32>
    %c0_54 = arith.constant 0 : index
    %c0_55 = arith.constant 0 : index
    %c0_56 = arith.constant 0 : index
    %136 = vector.load %arg1[%c0_54, %c0_55, %c0_56] : memref<2x2x128xf32, #tpu.memory_space<vmem>>, vector<2x1x128xf32>
    %c0_57 = arith.constant 0 : index
    %c32_58 = arith.constant 32 : index
    %137 = vector.load %arg3[%c0_57, %c32_58] : memref<8x128xf32, #tpu.memory_space<vmem>>, vector<1x32xf32>
    %138 = vector.shape_cast %137 : vector<1x32xf32> to vector<1x1x32xf32>
    %c0_59 = arith.constant 0 : index
    %c64_60 = arith.constant 64 : index
    %139 = vector.load %arg3[%c0_59, %c64_60] : memref<8x128xf32, #tpu.memory_space<vmem>>, vector<1x32xf32>
    %140 = vector.shape_cast %139 : vector<1x32xf32> to vector<1x1x32xf32>
    %c0_61 = arith.constant 0 : index
    %c96_62 = arith.constant 96 : index
    %141 = vector.load %arg3[%c0_61, %c96_62] : memref<8x128xf32, #tpu.memory_space<vmem>>, vector<1x32xf32>
    %142 = vector.shape_cast %141 : vector<1x32xf32> to vector<1x1x32xf32>
    %c7 = arith.constant 7 : index
    %c34 = arith.constant 34 : index
    %143 = vector.load %arg3[%c7, %c34] : memref<8x128xf32, #tpu.memory_space<vmem>>, vector<1x1xf32>
    %144 = vector.shape_cast %143 : vector<1x1xf32> to vector<1x1x1xf32>
    %145 = vector.broadcast %142 : vector<1x1x32xf32> to vector<2x16x32xf32>
    %146 = arith.mulf %132, %145 : vector<2x16x32xf32>
    %147 = vector.broadcast %138 : vector<1x1x32xf32> to vector<2x16x32xf32>
    %148 = arith.mulf %132, %147 : vector<2x16x32xf32>
    %cst_63 = arith.constant dense<0.000000e+00> : vector<2x16xf32>
    %149 = vector.multi_reduction <add>, %148, %cst_63 [2] : vector<2x16x32xf32> to vector<2x16xf32>
    %150 = vector.broadcast %140 : vector<1x1x32xf32> to vector<2x8x32xf32>
    %151 = arith.mulf %133, %150 : vector<2x8x32xf32>
    %cst_64 = arith.constant dense<0.000000e+00> : vector<2x8xf32>
    %152 = vector.multi_reduction <add>, %151, %cst_64 [2] : vector<2x8x32xf32> to vector<2x8xf32>
    %153 = vector.shape_cast %149 : vector<2x16xf32> to vector<2x16x1xf32>
    %154 = vector.shape_cast %152 : vector<2x8xf32> to vector<2x1x8xf32>
    %155 = vector.broadcast %153 : vector<2x16x1xf32> to vector<2x16x8xf32>
    %156 = vector.broadcast %154 : vector<2x1x8xf32> to vector<2x16x8xf32>
    %157 = arith.addf %155, %156 : vector<2x16x8xf32>
    %158 = arith.truncf %146 : vector<2x16x32xf32> to vector<2x16x32xbf16>
    %159 = arith.truncf %133 : vector<2x8x32xf32> to vector<2x8x32xbf16>
    "tpu.trace_start"() <{level = 10 : i32, message = "bid,bjd->bij"}> : () -> ()
    %cst_65 = arith.constant dense<0.000000e+00> : vector<2x16x8xf32>
    %160 = tpu.matmul %158, %159, %cst_65 {dimension_numbers = #tpu.dot_dimension_numbers<[2], [2], [1], [1], [0, 0, 0, 1, 1, 1], [0], [0]>} : vector<2x16x32xbf16>, vector<2x8x32xbf16>, vector<2x16x8xf32> -> vector<2x16x8xf32>
    "tpu.trace_stop"() : () -> ()
    %161 = arith.addf %157, %160 : vector<2x16x8xf32>
    %162 = vector.broadcast %144 : vector<1x1x1xf32> to vector<2x16x8xf32>
    %163 = arith.addf %161, %162 : vector<2x16x8xf32>
    %164 = vector.shape_cast %152 : vector<2x8xf32> to vector<2x8x1xf32>
    %165 = vector.shape_cast %149 : vector<2x16xf32> to vector<2x1x16xf32>
    %166 = vector.broadcast %164 : vector<2x8x1xf32> to vector<2x8x16xf32>
    %167 = vector.broadcast %165 : vector<2x1x16xf32> to vector<2x8x16xf32>
    %168 = arith.addf %166, %167 : vector<2x8x16xf32>
    %169 = arith.truncf %133 : vector<2x8x32xf32> to vector<2x8x32xbf16>
    %170 = arith.truncf %146 : vector<2x16x32xf32> to vector<2x16x32xbf16>
    "tpu.trace_start"() <{level = 10 : i32, message = "bqd,bcd->bqc"}> : () -> ()
    %cst_66 = arith.constant dense<0.000000e+00> : vector<2x8x16xf32>
    %171 = tpu.matmul %169, %170, %cst_66 {dimension_numbers = #tpu.dot_dimension_numbers<[2], [2], [1], [1], [0, 0, 0, 1, 1, 1], [0], [0]>} : vector<2x8x32xbf16>, vector<2x16x32xbf16>, vector<2x8x16xf32> -> vector<2x8x16xf32>
    "tpu.trace_stop"() : () -> ()
    %172 = arith.addf %168, %171 : vector<2x8x16xf32>
    %173 = vector.broadcast %144 : vector<1x1x1xf32> to vector<2x8x16xf32>
    %174 = arith.addf %172, %173 : vector<2x8x16xf32>
    %cst_67 = arith.constant 0.000000e+00 : f32
    %175 = vector.broadcast %cst_67 : f32 to vector<2x1x8xf32>
    %176 = arith.cmpf ogt, %135, %175 : vector<2x1x8xf32>
    %cst_68 = arith.constant -1.000000e+30 : f32
    %177 = vector.shape_cast %176 : vector<2x1x8xi1> to vector<2x1x8xi1>
    %178 = vector.broadcast %177 : vector<2x1x8xi1> to vector<2x16x8xi1>
    %179 = vector.broadcast %cst_68 : f32 to vector<2x16x8xf32>
    %180 = arith.select %178, %163, %179 : vector<2x16x8xi1>, vector<2x16x8xf32>
    %cst_69 = arith.constant dense<0xFF800000> : vector<2x16xf32>
    %181 = vector.multi_reduction <maximumf>, %180, %cst_69 [2] : vector<2x16x8xf32> to vector<2x16xf32>
    %182 = vector.shape_cast %181 : vector<2x16xf32> to vector<2x16x1xf32>
    %183 = vector.broadcast %182 : vector<2x16x1xf32> to vector<2x16x8xf32>
    %184 = arith.subf %180, %183 : vector<2x16x8xf32>
    %185 = math.exp %184 : vector<2x16x8xf32>
    %cst_70 = arith.constant dense<0.000000e+00> : vector<2x16xf32>
    %186 = vector.multi_reduction <add>, %185, %cst_70 [2] : vector<2x16x8xf32> to vector<2x16xf32>
    %187 = vector.shape_cast %186 : vector<2x16xf32> to vector<2x16x1xf32>
    %188 = tpu.reciprocal %187 {approx = true} : vector<2x16x1xf32> -> vector<2x16x1xf32>
    %189 = vector.broadcast %188 : vector<2x16x1xf32> to vector<2x16x8xf32>
    %190 = arith.mulf %185, %189 : vector<2x16x8xf32>
    %cst_71 = arith.constant 0.000000e+00 : f32
    %191 = vector.broadcast %cst_71 : f32 to vector<2x1x16xf32>
    %192 = arith.cmpf ogt, %134, %191 : vector<2x1x16xf32>
    %cst_72 = arith.constant -1.000000e+30 : f32
    %193 = vector.shape_cast %192 : vector<2x1x16xi1> to vector<2x1x16xi1>
    %194 = vector.broadcast %193 : vector<2x1x16xi1> to vector<2x8x16xi1>
    %195 = vector.broadcast %cst_72 : f32 to vector<2x8x16xf32>
    %196 = arith.select %194, %174, %195 : vector<2x8x16xi1>, vector<2x8x16xf32>
    %cst_73 = arith.constant dense<0xFF800000> : vector<2x8xf32>
    %197 = vector.multi_reduction <maximumf>, %196, %cst_73 [2] : vector<2x8x16xf32> to vector<2x8xf32>
    %198 = vector.shape_cast %197 : vector<2x8xf32> to vector<2x8x1xf32>
    %199 = vector.broadcast %198 : vector<2x8x1xf32> to vector<2x8x16xf32>
    %200 = arith.subf %196, %199 : vector<2x8x16xf32>
    %201 = math.exp %200 : vector<2x8x16xf32>
    %cst_74 = arith.constant dense<0.000000e+00> : vector<2x8xf32>
    %202 = vector.multi_reduction <add>, %201, %cst_74 [2] : vector<2x8x16xf32> to vector<2x8xf32>
    %203 = vector.shape_cast %202 : vector<2x8xf32> to vector<2x8x1xf32>
    %204 = tpu.reciprocal %203 {approx = true} : vector<2x8x1xf32> -> vector<2x8x1xf32>
    %205 = vector.broadcast %204 : vector<2x8x1xf32> to vector<2x8x16xf32>
    %206 = arith.mulf %201, %205 : vector<2x8x16xf32>
    %207 = arith.truncf %190 : vector<2x16x8xf32> to vector<2x16x8xbf16>
    %208 = arith.truncf %133 : vector<2x8x32xf32> to vector<2x8x32xbf16>
    "tpu.trace_start"() <{level = 10 : i32, message = "bij,bjd->bid"}> : () -> ()
    %cst_75 = arith.constant dense<0.000000e+00> : vector<2x16x32xf32>
    %209 = tpu.matmul %207, %208, %cst_75 {dimension_numbers = #tpu.dot_dimension_numbers<[2], [1], [1], [2], [0, 0, 0, 1, 1, 2], [0], [0]>} : vector<2x16x8xbf16>, vector<2x8x32xbf16>, vector<2x16x32xf32> -> vector<2x16x32xf32>
    "tpu.trace_stop"() : () -> ()
    %210 = arith.truncf %190 : vector<2x16x8xf32> to vector<2x16x8xbf16>
    %211 = arith.truncf %206 : vector<2x8x16xf32> to vector<2x8x16xbf16>
    "tpu.trace_start"() <{level = 10 : i32, message = "bij,bjk->bik"}> : () -> ()
    %cst_76 = arith.constant dense<0.000000e+00> : vector<2x16x16xf32>
    %212 = tpu.matmul %210, %211, %cst_76 {dimension_numbers = #tpu.dot_dimension_numbers<[2], [1], [1], [2], [0, 0, 0, 1, 1, 2], [0], [0]>} : vector<2x16x8xbf16>, vector<2x8x16xbf16>, vector<2x16x16xf32> -> vector<2x16x16xf32>
    "tpu.trace_stop"() : () -> ()
    %213 = arith.truncf %212 : vector<2x16x16xf32> to vector<2x16x16xbf16>
    %214 = arith.truncf %132 : vector<2x16x32xf32> to vector<2x16x32xbf16>
    "tpu.trace_start"() <{level = 10 : i32, message = "bik,bkd->bid"}> : () -> ()
    %cst_77 = arith.constant dense<0.000000e+00> : vector<2x16x32xf32>
    %215 = tpu.matmul %213, %214, %cst_77 {dimension_numbers = #tpu.dot_dimension_numbers<[2], [1], [1], [2], [0, 0, 0, 1, 1, 2], [0], [0]>} : vector<2x16x16xbf16>, vector<2x16x32xbf16>, vector<2x16x32xf32> -> vector<2x16x32xf32>
    "tpu.trace_stop"() : () -> ()
    %216 = arith.mulf %132, %209 : vector<2x16x32xf32>
    %217 = arith.mulf %132, %215 : vector<2x16x32xf32>
    %218 = tpu.concatenate %132, %209, %216, %217 in 2 : vector<2x16x32xf32>, vector<2x16x32xf32>, vector<2x16x32xf32>, vector<2x16x32xf32> -> vector<2x16x128xf32>
    %219 = vector.shape_cast %218 : vector<2x16x128xf32> to vector<32x128xf32>
    %c160 = arith.constant 160 : index
    %c0_78 = arith.constant 0 : index
    %220 = vector.load %arg2[%c160, %c0_78] : memref<288x128xf32, #tpu.memory_space<vmem>>, vector<128x32xf32>
    %221 = arith.truncf %219 : vector<32x128xf32> to vector<32x128xbf16>
    %222 = arith.truncf %220 : vector<128x32xf32> to vector<128x32xbf16>
    %cst_79 = arith.constant dense<0.000000e+00> : vector<32x32xf32>
    %223 = tpu.matmul %221, %222, %cst_79 {dimension_numbers = #tpu.dot_dimension_numbers<[1], [0], [0], [1], [0, 0, 1, 1], [], []>} : vector<32x128xbf16>, vector<128x32xbf16>, vector<32x32xf32> -> vector<32x32xf32>
    %c3_80 = arith.constant 3 : index
    %c96_81 = arith.constant 96 : index
    %224 = vector.load %arg3[%c3_80, %c96_81] : memref<8x128xf32, #tpu.memory_space<vmem>>, vector<1x32xf32>
    %225 = vector.broadcast %224 : vector<1x32xf32> to vector<32x32xf32>
    %226 = arith.addf %223, %225 : vector<32x32xf32>
    %227 = vector.shape_cast %226 : vector<32x32xf32> to vector<2x16x32xf32>
    %228 = vector.shape_cast %227 : vector<2x16x32xf32> to vector<32x32xf32>
    %c96_82 = arith.constant 96 : index
    %c0_83 = arith.constant 0 : index
    %229 = vector.load %arg2[%c96_82, %c0_83] : memref<288x128xf32, #tpu.memory_space<vmem>>, vector<32x96xf32>
    %230 = arith.truncf %228 : vector<32x32xf32> to vector<32x32xbf16>
    %231 = arith.truncf %229 : vector<32x96xf32> to vector<32x96xbf16>
    %cst_84 = arith.constant dense<0.000000e+00> : vector<32x96xf32>
    %232 = tpu.matmul %230, %231, %cst_84 {dimension_numbers = #tpu.dot_dimension_numbers<[1], [0], [0], [1], [0, 0, 1, 1], [], []>} : vector<32x32xbf16>, vector<32x96xbf16>, vector<32x96xf32> -> vector<32x96xf32>
    %c4 = arith.constant 4 : index
    %c0_85 = arith.constant 0 : index
    %233 = vector.load %arg3[%c4, %c0_85] : memref<8x128xf32, #tpu.memory_space<vmem>>, vector<1x96xf32>
    %234 = vector.broadcast %233 : vector<1x96xf32> to vector<32x96xf32>
    %235 = arith.addf %232, %234 : vector<32x96xf32>
    %236 = vector.shape_cast %235 : vector<32x96xf32> to vector<2x16x96xf32>
    %237 = vector.extract_strided_slice %236 {offsets = [0, 0, 0], sizes = [2, 16, 32], strides = [1, 1, 1]} : vector<2x16x96xf32> to vector<2x16x32xf32>
    %238 = vector.extract_strided_slice %236 {offsets = [0, 0, 32], sizes = [2, 16, 32], strides = [1, 1, 1]} : vector<2x16x96xf32> to vector<2x16x32xf32>
    %239 = vector.extract_strided_slice %236 {offsets = [0, 0, 64], sizes = [2, 16, 32], strides = [1, 1, 1]} : vector<2x16x96xf32> to vector<2x16x32xf32>
    %240 = arith.truncf %237 : vector<2x16x32xf32> to vector<2x16x32xbf16>
    %241 = arith.truncf %238 : vector<2x16x32xf32> to vector<2x16x32xbf16>
    "tpu.trace_start"() <{level = 10 : i32, message = "bqd,bkd->bqk"}> : () -> ()
    %cst_86 = arith.constant dense<0.000000e+00> : vector<2x16x16xf32>
    %242 = tpu.matmul %240, %241, %cst_86 {dimension_numbers = #tpu.dot_dimension_numbers<[2], [2], [1], [1], [0, 0, 0, 1, 1, 1], [0], [0]>} : vector<2x16x32xbf16>, vector<2x16x32xbf16>, vector<2x16x16xf32> -> vector<2x16x16xf32>
    "tpu.trace_stop"() : () -> ()
    %cst_87 = arith.constant 0.176776692 : f32
    %243 = vector.broadcast %cst_87 : f32 to vector<2x16x16xf32>
    %244 = arith.mulf %242, %243 : vector<2x16x16xf32>
    %cst_88 = arith.constant dense<0xFF800000> : vector<2x16xf32>
    %245 = vector.multi_reduction <maximumf>, %244, %cst_88 [2] : vector<2x16x16xf32> to vector<2x16xf32>
    %246 = vector.shape_cast %245 : vector<2x16xf32> to vector<2x16x1xf32>
    %247 = vector.broadcast %246 : vector<2x16x1xf32> to vector<2x16x16xf32>
    %248 = arith.subf %244, %247 : vector<2x16x16xf32>
    %249 = math.exp %248 : vector<2x16x16xf32>
    %cst_89 = arith.constant dense<0.000000e+00> : vector<2x16xf32>
    %250 = vector.multi_reduction <add>, %249, %cst_89 [2] : vector<2x16x16xf32> to vector<2x16xf32>
    %251 = vector.shape_cast %250 : vector<2x16xf32> to vector<2x16x1xf32>
    %252 = tpu.reciprocal %251 {approx = true} : vector<2x16x1xf32> -> vector<2x16x1xf32>
    %253 = vector.broadcast %252 : vector<2x16x1xf32> to vector<2x16x16xf32>
    %254 = arith.mulf %249, %253 : vector<2x16x16xf32>
    %255 = arith.truncf %254 : vector<2x16x16xf32> to vector<2x16x16xbf16>
    %256 = arith.truncf %239 : vector<2x16x32xf32> to vector<2x16x32xbf16>
    "tpu.trace_start"() <{level = 10 : i32, message = "bqk,bkd->bqd"}> : () -> ()
    %cst_90 = arith.constant dense<0.000000e+00> : vector<2x16x32xf32>
    %257 = tpu.matmul %255, %256, %cst_90 {dimension_numbers = #tpu.dot_dimension_numbers<[2], [1], [1], [2], [0, 0, 0, 1, 1, 2], [0], [0]>} : vector<2x16x16xbf16>, vector<2x16x32xbf16>, vector<2x16x32xf32> -> vector<2x16x32xf32>
    "tpu.trace_stop"() : () -> ()
    %258 = vector.shape_cast %257 : vector<2x16x32xf32> to vector<32x32xf32>
    %c96_91 = arith.constant 96 : index
    %c96_92 = arith.constant 96 : index
    %259 = vector.load %arg2[%c96_91, %c96_92] : memref<288x128xf32, #tpu.memory_space<vmem>>, vector<32x32xf32>
    %260 = arith.truncf %258 : vector<32x32xf32> to vector<32x32xbf16>
    %261 = arith.truncf %259 : vector<32x32xf32> to vector<32x32xbf16>
    %cst_93 = arith.constant dense<0.000000e+00> : vector<32x32xf32>
    %262 = tpu.matmul %260, %261, %cst_93 {dimension_numbers = #tpu.dot_dimension_numbers<[1], [0], [0], [1], [0, 0, 1, 1], [], []>} : vector<32x32xbf16>, vector<32x32xbf16>, vector<32x32xf32> -> vector<32x32xf32>
    %c4_94 = arith.constant 4 : index
    %c96_95 = arith.constant 96 : index
    %263 = vector.load %arg3[%c4_94, %c96_95] : memref<8x128xf32, #tpu.memory_space<vmem>>, vector<1x32xf32>
    %264 = vector.broadcast %263 : vector<1x32xf32> to vector<32x32xf32>
    %265 = arith.addf %262, %264 : vector<32x32xf32>
    %266 = arith.addf %228, %265 : vector<32x32xf32>
    %c5 = arith.constant 5 : index
    %c0_96 = arith.constant 0 : index
    %267 = vector.load %arg3[%c5, %c0_96] : memref<8x128xf32, #tpu.memory_space<vmem>>, vector<1x32xf32>
    %c5_97 = arith.constant 5 : index
    %c32_98 = arith.constant 32 : index
    %268 = vector.load %arg3[%c5_97, %c32_98] : memref<8x128xf32, #tpu.memory_space<vmem>>, vector<1x32xf32>
    %cst_99 = arith.constant dense<0.000000e+00> : vector<32xf32>
    %269 = vector.multi_reduction <add>, %266, %cst_99 [1] : vector<32x32xf32> to vector<32xf32>
    %270 = vector.shape_cast %269 : vector<32xf32> to vector<32x1xf32>
    %cst_100 = arith.constant 3.200000e+01 : f32
    %271 = vector.broadcast %cst_100 : f32 to vector<32x1xf32>
    %272 = arith.divf %270, %271 : vector<32x1xf32>
    %273 = vector.broadcast %272 : vector<32x1xf32> to vector<32x32xf32>
    %274 = arith.subf %266, %273 : vector<32x32xf32>
    %275 = arith.mulf %274, %274 : vector<32x32xf32>
    %cst_101 = arith.constant dense<0.000000e+00> : vector<32xf32>
    %276 = vector.multi_reduction <add>, %275, %cst_101 [1] : vector<32x32xf32> to vector<32xf32>
    %277 = vector.shape_cast %276 : vector<32xf32> to vector<32x1xf32>
    %cst_102 = arith.constant 3.200000e+01 : f32
    %278 = vector.broadcast %cst_102 : f32 to vector<32x1xf32>
    %279 = arith.divf %277, %278 : vector<32x1xf32>
    %280 = vector.broadcast %272 : vector<32x1xf32> to vector<32x32xf32>
    %281 = arith.subf %266, %280 : vector<32x32xf32>
    %cst_103 = arith.constant 9.99999974E-6 : f32
    %282 = vector.broadcast %cst_103 : f32 to vector<32x1xf32>
    %283 = arith.addf %279, %282 : vector<32x1xf32>
    %284 = math.rsqrt %283 : vector<32x1xf32>
    %285 = vector.broadcast %284 : vector<32x1xf32> to vector<32x32xf32>
    %286 = arith.mulf %281, %285 : vector<32x32xf32>
    %287 = vector.broadcast %267 : vector<1x32xf32> to vector<32x32xf32>
    %288 = arith.mulf %286, %287 : vector<32x32xf32>
    %289 = vector.broadcast %268 : vector<1x32xf32> to vector<32x32xf32>
    %290 = arith.addf %288, %289 : vector<32x32xf32>
    %c128_104 = arith.constant 128 : index
    %c64_105 = arith.constant 64 : index
    %291 = vector.load %arg2[%c128_104, %c64_105] : memref<288x128xf32, #tpu.memory_space<vmem>>, vector<32x64xf32>
    %292 = arith.truncf %290 : vector<32x32xf32> to vector<32x32xbf16>
    %293 = arith.truncf %291 : vector<32x64xf32> to vector<32x64xbf16>
    %cst_106 = arith.constant dense<0.000000e+00> : vector<32x64xf32>
    %294 = tpu.matmul %292, %293, %cst_106 {dimension_numbers = #tpu.dot_dimension_numbers<[1], [0], [0], [1], [0, 0, 1, 1], [], []>} : vector<32x32xbf16>, vector<32x64xbf16>, vector<32x64xf32> -> vector<32x64xf32>
    %c5_107 = arith.constant 5 : index
    %c64_108 = arith.constant 64 : index
    %295 = vector.load %arg3[%c5_107, %c64_108] : memref<8x128xf32, #tpu.memory_space<vmem>>, vector<1x64xf32>
    %296 = vector.broadcast %295 : vector<1x64xf32> to vector<32x64xf32>
    %297 = arith.addf %294, %296 : vector<32x64xf32>
    %cst_109 = arith.constant 0.000000e+00 : f32
    %298 = vector.broadcast %cst_109 : f32 to vector<32x64xf32>
    %299 = arith.maximumf %297, %298 : vector<32x64xf32>
    %c0_110 = arith.constant 0 : index
    %c64_111 = arith.constant 64 : index
    %300 = vector.load %arg2[%c0_110, %c64_111] : memref<288x128xf32, #tpu.memory_space<vmem>>, vector<64x32xf32>
    %301 = arith.truncf %299 : vector<32x64xf32> to vector<32x64xbf16>
    %302 = arith.truncf %300 : vector<64x32xf32> to vector<64x32xbf16>
    %cst_112 = arith.constant dense<0.000000e+00> : vector<32x32xf32>
    %303 = tpu.matmul %301, %302, %cst_112 {dimension_numbers = #tpu.dot_dimension_numbers<[1], [0], [0], [1], [0, 0, 1, 1], [], []>} : vector<32x64xbf16>, vector<64x32xbf16>, vector<32x32xf32> -> vector<32x32xf32>
    %c6 = arith.constant 6 : index
    %c0_113 = arith.constant 0 : index
    %304 = vector.load %arg3[%c6, %c0_113] : memref<8x128xf32, #tpu.memory_space<vmem>>, vector<1x32xf32>
    %305 = vector.broadcast %304 : vector<1x32xf32> to vector<32x32xf32>
    %306 = arith.addf %303, %305 : vector<32x32xf32>
    %307 = arith.addf %290, %306 : vector<32x32xf32>
    %c6_114 = arith.constant 6 : index
    %c32_115 = arith.constant 32 : index
    %308 = vector.load %arg3[%c6_114, %c32_115] : memref<8x128xf32, #tpu.memory_space<vmem>>, vector<1x32xf32>
    %c6_116 = arith.constant 6 : index
    %c64_117 = arith.constant 64 : index
    %309 = vector.load %arg3[%c6_116, %c64_117] : memref<8x128xf32, #tpu.memory_space<vmem>>, vector<1x32xf32>
    %cst_118 = arith.constant dense<0.000000e+00> : vector<32xf32>
    %310 = vector.multi_reduction <add>, %307, %cst_118 [1] : vector<32x32xf32> to vector<32xf32>
    %311 = vector.shape_cast %310 : vector<32xf32> to vector<32x1xf32>
    %cst_119 = arith.constant 3.200000e+01 : f32
    %312 = vector.broadcast %cst_119 : f32 to vector<32x1xf32>
    %313 = arith.divf %311, %312 : vector<32x1xf32>
    %314 = vector.broadcast %313 : vector<32x1xf32> to vector<32x32xf32>
    %315 = arith.subf %307, %314 : vector<32x32xf32>
    %316 = arith.mulf %315, %315 : vector<32x32xf32>
    %cst_120 = arith.constant dense<0.000000e+00> : vector<32xf32>
    %317 = vector.multi_reduction <add>, %316, %cst_120 [1] : vector<32x32xf32> to vector<32xf32>
    %318 = vector.shape_cast %317 : vector<32xf32> to vector<32x1xf32>
    %cst_121 = arith.constant 3.200000e+01 : f32
    %319 = vector.broadcast %cst_121 : f32 to vector<32x1xf32>
    %320 = arith.divf %318, %319 : vector<32x1xf32>
    %321 = vector.broadcast %313 : vector<32x1xf32> to vector<32x32xf32>
    %322 = arith.subf %307, %321 : vector<32x32xf32>
    %cst_122 = arith.constant 9.99999974E-6 : f32
    %323 = vector.broadcast %cst_122 : f32 to vector<32x1xf32>
    %324 = arith.addf %320, %323 : vector<32x1xf32>
    %325 = math.rsqrt %324 : vector<32x1xf32>
    %326 = vector.broadcast %325 : vector<32x1xf32> to vector<32x32xf32>
    %327 = arith.mulf %322, %326 : vector<32x32xf32>
    %328 = vector.broadcast %308 : vector<1x32xf32> to vector<32x32xf32>
    %329 = arith.mulf %327, %328 : vector<32x32xf32>
    %330 = vector.broadcast %309 : vector<1x32xf32> to vector<32x32xf32>
    %331 = arith.addf %329, %330 : vector<32x32xf32>
    %332 = vector.shape_cast %331 : vector<32x32xf32> to vector<2x16x32xf32>
    %c6_123 = arith.constant 6 : index
    %c96_124 = arith.constant 96 : index
    %333 = vector.load %arg3[%c6_123, %c96_124] : memref<8x128xf32, #tpu.memory_space<vmem>>, vector<1x32xf32>
    %334 = vector.shape_cast %333 : vector<1x32xf32> to vector<1x1x32xf32>
    %c7_125 = arith.constant 7 : index
    %c0_126 = arith.constant 0 : index
    %335 = vector.load %arg3[%c7_125, %c0_126] : memref<8x128xf32, #tpu.memory_space<vmem>>, vector<1x32xf32>
    %336 = vector.shape_cast %335 : vector<1x32xf32> to vector<1x1x32xf32>
    %337 = vector.broadcast %334 : vector<1x1x32xf32> to vector<2x16x32xf32>
    %338 = arith.mulf %332, %337 : vector<2x16x32xf32>
    %cst_127 = arith.constant dense<0.000000e+00> : vector<2x16xf32>
    %339 = vector.multi_reduction <add>, %338, %cst_127 [2] : vector<2x16x32xf32> to vector<2x16xf32>
    %c7_128 = arith.constant 7 : index
    %c32_129 = arith.constant 32 : index
    %340 = vector.load %arg3[%c7_128, %c32_129] : memref<8x128xf32, #tpu.memory_space<vmem>>, vector<1x1xf32>
    %341 = vector.broadcast %340 : vector<1x1xf32> to vector<2x16xf32>
    %342 = arith.addf %339, %341 : vector<2x16xf32>
    %343 = vector.broadcast %336 : vector<1x1x32xf32> to vector<2x16x32xf32>
    %344 = arith.mulf %332, %343 : vector<2x16x32xf32>
    %cst_130 = arith.constant dense<0.000000e+00> : vector<2x16xf32>
    %345 = vector.multi_reduction <add>, %344, %cst_130 [2] : vector<2x16x32xf32> to vector<2x16xf32>
    %c7_131 = arith.constant 7 : index
    %c33 = arith.constant 33 : index
    %346 = vector.load %arg3[%c7_131, %c33] : memref<8x128xf32, #tpu.memory_space<vmem>>, vector<1x1xf32>
    %347 = vector.broadcast %346 : vector<1x1xf32> to vector<2x16xf32>
    %348 = arith.addf %345, %347 : vector<2x16xf32>
    %349 = vector.shape_cast %342 : vector<2x16xf32> to vector<2x1x16xf32>
    %350 = vector.shape_cast %348 : vector<2x16xf32> to vector<2x1x16xf32>
    %351 = tpu.concatenate %349, %350 in 1 : vector<2x1x16xf32>, vector<2x1x16xf32> -> vector<2x2x16xf32>
    %cst_132 = arith.constant 0.000000e+00 : f32
    %352 = vector.broadcast %cst_132 : f32 to vector<2x2x112xf32>
    %353 = tpu.concatenate %351, %352 in 2 : vector<2x2x16xf32>, vector<2x2x112xf32> -> vector<2x2x128xf32>
    %cst_133 = arith.constant 0.000000e+00 : f32
    %354 = vector.broadcast %cst_133 : f32 to vector<2x1x128xf32>
    %355 = arith.cmpf ogt, %136, %354 : vector<2x1x128xf32>
    %cst_134 = arith.constant -1.000000e+30 : f32
    %356 = vector.shape_cast %355 : vector<2x1x128xi1> to vector<2x1x128xi1>
    %357 = vector.broadcast %356 : vector<2x1x128xi1> to vector<2x2x128xi1>
    %358 = vector.broadcast %cst_134 : f32 to vector<2x2x128xf32>
    %359 = arith.select %357, %353, %358 : vector<2x2x128xi1>, vector<2x2x128xf32>
    %cst_135 = arith.constant dense<0xFF800000> : vector<2x2xf32>
    %360 = vector.multi_reduction <maximumf>, %359, %cst_135 [2] : vector<2x2x128xf32> to vector<2x2xf32>
    %361 = vector.shape_cast %360 : vector<2x2xf32> to vector<2x2x1xf32>
    %362 = vector.broadcast %361 : vector<2x2x1xf32> to vector<2x2x128xf32>
    %363 = arith.subf %359, %362 : vector<2x2x128xf32>
    %364 = math.exp %363 : vector<2x2x128xf32>
    %cst_136 = arith.constant dense<0.000000e+00> : vector<2x2xf32>
    %365 = vector.multi_reduction <add>, %364, %cst_136 [2] : vector<2x2x128xf32> to vector<2x2xf32>
    %366 = vector.shape_cast %365 : vector<2x2xf32> to vector<2x2x1xf32>
    %367 = math.log %366 : vector<2x2x1xf32>
    %368 = arith.addf %367, %361 : vector<2x2x1xf32>
    %369 = vector.broadcast %368 : vector<2x2x1xf32> to vector<2x2x128xf32>
    %370 = arith.subf %359, %369 : vector<2x2x128xf32>
    %c0_137 = arith.constant 0 : index
    %c0_138 = arith.constant 0 : index
    %c0_139 = arith.constant 0 : index
    %371 = vector.load %arg4[%c0_137, %c0_138, %c0_139] : memref<2x2x128xf32, #tpu.memory_space<vmem>>, vector<2x2x128xf32>
    tpu.vector_store %arg4[%c0_137, %c0_138, %c0_139], %370 {strides = array<i32>} : memref<2x2x128xf32, #tpu.memory_space<vmem>>, vector<2x2x128xf32>,
    return
  }
}

</mosaic_0001>

<bundles_post_ra>
// kernel: forward.1
= control target key start
LH: loop header
LB: loop body
LE: loop exit
PB: predicated region body
PF: predicated region fallthrough
CT: control target
= control target key end

     0   :  { %v3340_v0 = vmov 0.0   ;;  %vm3341_vm0 = vmmov 0   ;;  %s3342_s25 = smov 32   ;;  %vm38_vm1 = vcmask 261120   ;;  %s3343_s21 = smov 96   ;;  %vm3344_vm3 = vmmov 1   ;;  %s4275_s2 = inlined_call_operand.vmem [shape: f32[288,128], index: 2, kind: input, shape index: {}]   ;;  %s4276_s0 = inlined_call_operand.vmem [shape: f32[2,24,32], index: 0, kind: input, shape index: {}]   ;;  %s4277_s3 = inlined_call_operand.vmem [shape: f32[8,128], index: 3, kind: input, shape index: {}]   ;;  %s4278_s1 = inlined_call_operand.vmem [shape: f32[2,2,128], index: 1, kind: input, shape index: {}]   ;;  %s4279_s4 = inlined_call_operand.vmem [shape: f32[2,2,128], index: 4, kind: output, shape index: {}]  }
   0x1   :  { %2917 = vmatprep.subr.bf16.mxu0 %v3340_v0  ;;  %3173 = vmatprep.subr.bf16.mxu1 %v3340_v0  ;;  %v24_v1 = vld [vmem:[%s4275_s2] sm:$0xff]  ;;  %v25_v2 = vld [vmem:[%s4275_s2 + $0x8] sm:$0xff]  ;;  %v26_v3 = vld [vmem:[%s4275_s2 + $0x10] sm:$0xff]  ;;  %vm376_vm6 = vcmask 195584   ;;  %s3345_s22 = smov 64   ;;  %vm458_vm8 = vcmask 1043456  }
   0x2   :  { %v3385_v4 = vpack.c.bf16 %v25_v2, %v24_v1  ;;  %v27_v5 = vld [vmem:[%s4275_s2 + $0x18] sm:$0xff]  ;;  %2921 = vmatprep.mubr.msk.bf16.mxu0 %vm3341_vm0, %v3340_v0  ;;  %2929 = vmatprep.mubr.msk.bf16.mxu1 %vm3341_vm0, %v3340_v0  ;;  %v18_v6 = vld [vmem:[%s4276_s0] sm:$0xff]  ;;  %v19_v8 = vld [vmem:[%s4276_s0 + $0x8] sm:$0xff]  ;;  %vm890_vm9 = vcmask 523264   ;;  %s3346_s23 = smov 94   ;;  %vm1396_vm12 = vcmask 64512  }
   0x3   :  { %111 = vrot.lane.b32.xlu0 %v24_v1, %s3342_s25  ;;  %v3400_v7 = vpack.c.bf16 %v27_v5, %v26_v3  ;;  %v22_v9 = vld [vmem:[%s4276_s0 + $0x20] sm:$0xff]  ;;  %v23_v10 = vld [vmem:[%s4276_s0 + $0x28] sm:$0xff]  ;;  %115 = vrot.lane.b32.xlu1 %v26_v3, %s3342_s25  ;;  %v28_v11 = vpack.c.bf16 %v19_v8, %v18_v6  ;;  %s3348_s30 = smov 95  }
   0x4   :  { %2918 = vmatpush3.bf16.msra.mxu0 %v3385_v4  ;;  %3175 = vmatpush3.bf16.msra.mxu1 %v3385_v4  ;;  %v30_v12 = vpack.c.bf16 %v23_v10, %v22_v9  ;;  %v20_v13 = vld [vmem:[%s4276_s0 + $0x10] sm:$0xff]  ;;  %v21_v14 = vld [vmem:[%s4276_s0 + $0x18] sm:$0xff]  ;;  %v142_v16 = vld [vmem:[%s4275_s2 + $0x40] sm:$0xff] }
   0x5   :  { %2919 = vmatprep.subr.bf16.mxu0 %v3340_v0  ;;  %3174 = vmatprep.subr.bf16.mxu1 %v3340_v0  ;;  %v29_v15 = vpack.c.bf16 %v21_v14, %v20_v13  ;;  %v143_v17 = vld [vmem:[%s4275_s2 + $0x48] sm:$0xff]  ;;  %v144_v19 = vld [vmem:[%s4275_s2 + $0x50] sm:$0xff]  ;;  %v145_v20 = vld [vmem:[%s4275_s2 + $0x58] sm:$0xff] }
   0x6   :  { %v3437_v18 = vpack.c.bf16 %v143_v17, %v142_v16  ;;  %v3447_v21 = vpack.c.bf16 %v145_v20, %v144_v19  ;;  %v2762_v23 = vld [vmem:[%s4277_s3] ss:$0 sm:$0xff]  ;;  %v3481_v53 = vld [vmem:[%s4277_s3 + $0x1] ss:$0 sm:$0xff] }
   0x7   :  { %113 = vrot.lane.b32.xlu0 %v25_v2, %s3342_s25 }
   0x8   :  { %2920 = vmatpush3.bf16.msra.mxu0 %v3400_v7  ;;  %3176 = vmatpush3.bf16.msra.mxu1 %v3400_v7 }
   0x9   :  { %2933 = vmatprep.subr.bf16.mxu1 %v3340_v0 }
   0xb   :  { %2922 = vmatmul.mubr.msk.bf16.vlgmr.msra.gmra.mrb[0].mxu0 %vm38_vm1, %v28_v11  ;;  %2930 = vmatmul.mubr.msk.bf16.vlgmr.msra.gmra.mrb[0].mxu1 %vm38_vm1, %v30_v12 }
   0xc   :  { %2925 = vmatprep.mubr.msk.bf16.mxu0 %vm3341_vm0, %v3340_v0  ;;  %2937 = vmatprep.mubr.msk.bf16.mxu1 %vm3341_vm0, %v3340_v0 }
   0xd   :  { %2934 = vmatpush3.bf16.msra.mxu1 %v3437_v18 }
   0xe   :  { %2935 = vmatprep.subr.bf16.mxu1 %v3340_v0 }
  0x11   :  { %2936 = vmatpush3.bf16.msra.mxu1 %v3447_v21 }
  0x13   :  { %2926 = vmatmul.mubr.msk.bf16.gmra.mrb[4].mxu0 %vm38_vm1, %v29_v15 }
  0x75   :  { %v112_v22 = vpop.permute.xlu0 %111  ;;  %v116_v41 = vpop.permute.xlu1 %115 }
  0x79   :  { %v114_v24 = vpop.permute.xlu0 %113 }
  0xde   :  { %v82_v25 = vpop.f32.mrb[0].mxu0  ;;  %v98_v26 = vpop.f32.mrb[0].mxu1 }
  0xdf   :  { %v83_v27 = vadd.f32 %v2762_v23, %v82_v25  ;;  %v2923_v28 = vpop.f32.mrb[1].mxu0  ;;  %v2931_v29 = vpop.f32.mrb[1].mxu1  ;;  %v99_v47 = vadd.f32 %v2762_v23, %v98_v26  ;;  %v130_v25 = vlaneseq }
  0xe0   :  { %v85_v30 = vpop.f32.mrb[2].mxu0  ;;  %v101_v31 = vpop.f32.mrb[2].mxu1 }
  0xe1   :  { %v86_v32 = vadd.f32 %v2762_v23, %v85_v30  ;;  %v2924_v33 = vpop.f32.mrb[3].mxu0  ;;  %v2932_v34 = vpop.f32.mrb[3].mxu1  ;;  %v3453_v35 = vadd.f32 %v112_v22, %v83_v27  ;;  %v102_v48 = vadd.f32 %v2762_v23, %v101_v31  ;;  %v3473_v51 = vadd.f32 %v114_v24, %v99_v47 }
  0xe2   :  { %v131_v26 = vand.u32 127, %v130_v25  ;;  %v3521_v27 = vshrl.u32 %v130_v25, 7 }
  0xe3   :  { %v3455_v36 = vadd.f32 %v114_v24, %v86_v32  ;;  %v3471_v50 = vadd.f32 %v116_v41, %v102_v48 }
  0xe4   :  { %v1262_v28 = vadd.s32 4294967288, %v131_v26  ;;  %v3524_v29 = vsub.s32 %v131_v26, %v3521_v27  ;;  %vm135_vm2 = vcmp.lt.s32.totalorder %v131_v26, 16 }
  0xe5   :  { %v146_v37 = vpack.c.bf16 %v3455_v36, %v3453_v35  ;;  %v148_v52 = vpack.c.bf16 %v3471_v50, %v3473_v51  ;;  %vm136_vm4 = vmxor %vm3344_vm3, %vm135_vm2 }
  0xe6   :  { %v90_v38 = vpop.f32.mrb[4].mxu0  ;;  %v3527_v30 = vsub.s32 %v1262_v28, %v3521_v27  ;;  %vm3529_vm5 = vmxor %vm136_vm4, %vm3344_vm3 }
  0xe7   :  { %v91_v39 = vadd.f32 %v2762_v23, %v90_v38  ;;  %v2927_v40 = vpop.f32.mrb[5].mxu0  ;;  %2938 = vmatmul.mubr.msk.bf16.vlgmr.msra.gmra.mrb[4].mxu1 %vm38_vm1, %v146_v37  ;;  %vm3536_vm7 = vmxor %vm135_vm2, %vm3344_vm3  ;;  %vm1267_vm2 = vcmask 130112  }
  0xe8   :  { %v93_v42 = vpop.f32.mrb[6].mxu0  ;;  %2941 = vmatprep.mubr.msk.bf16.mxu1 %vm3341_vm0, %v3340_v0 }
  0xe9   :  { %v3462_v43 = vadd.f32 %v116_v41, %v91_v39  ;;  %v94_v44 = vadd.f32 %v2762_v23, %v93_v42  ;;  %v2928_v45 = vpop.f32.mrb[7].mxu0 }
  0xeb   :  { %v3464_v46 = vadd.f32 %v112_v22, %v94_v44 }
  0xed   :  { %v147_v49 = vpack.c.bf16 %v3464_v46, %v3462_v43 }
  0xef   :  { %2942 = vmatmul.mubr.msk.bf16.gmra.mrb[8].mxu1 %vm38_vm1, %v147_v49 }
  0xf0   :  { %2945 = vmatprep.mubr.msk.bf16.mxu1 %vm3341_vm0, %v3340_v0 }
  0xf7   :  { %2946 = vmatmul.mubr.msk.bf16.gmra.mrb[12].mxu1 %vm38_vm1, %v148_v52 }
 0x1ba   :  { %v199_v54 = vpop.f32.mrb[4].mxu1 }
 0x1bb   :  { %v2939_v55 = vpop.f32.mrb[5].mxu1  ;;  %v200_v57 = vadd.f32 %v3481_v53, %v199_v54 }
 0x1bc   :  { %v202_v56 = vpop.f32.mrb[6].mxu1 }
 0x1bd   :  { %v203_v58 = vadd.f32 %v3481_v53, %v202_v56  ;;  %v2940_v59 = vpop.f32.mrb[7].mxu1 }
 0x1bf   :  { %v3485_v60 = vpack.c.bf16 %v203_v58, %v200_v57 }
 0x1c1   :  { %228 = vrot.lane.b32.xlu1 %v3485_v60, %s3343_s21  ;;  %2953 = vmatprep.mubr.msk.bf16.mxu0 %vm38_vm1, %v3485_v60 }
 0x1c2   :  { %v207_v61 = vpop.f32.mrb[8].mxu1 }
 0x1c3   :  { %v208_v62 = vadd.f32 %v3481_v53, %v207_v61  ;;  %v2943_v63 = vpop.f32.mrb[9].mxu1 }
 0x1c4   :  { %v210_v1 = vpop.f32.mrb[10].mxu1 }
 0x1c5   :  { %v3492_v2 = vpack.c.bf16 %v208_v62, %v208_v62  ;;  %v2944_v3 = vpop.f32.mrb[11].mxu1  ;;  %v211_v6 = vadd.f32 %v3481_v53, %v210_v1 }
 0x1c7   :  { %230 = vrot.lane.b32.xlu0 %v3492_v2, %s3343_s21 }
 0x1ca   :  { %v215_v5 = vpop.f32.mrb[12].mxu1 }
 0x1cb   :  { %v216_v8 = vadd.f32 %v3481_v53, %v215_v5  ;;  %v2947_v9 = vpop.f32.mrb[13].mxu1 }
 0x1cc   :  { %v218_v10 = vpop.f32.mrb[14].mxu1 }
 0x1cd   :  { %v3498_v11 = vpack.c.bf16 %v216_v8, %v211_v6  ;;  %v219_v12 = vadd.f32 %v3481_v53, %v218_v10  ;;  %v2948_v13 = vpop.f32.mrb[15].mxu1 }
 0x1cf   :  { %v3501_v14 = vpack.c.bf16 %v219_v12, %v219_v12  ;;  %294 = vrot.lane.b32.xlu1 %v3498_v11, %s3343_s21  ;;  %2961 = vmatprep.mubr.msk.bf16.mxu1 %vm38_vm1, %v3498_v11 }
 0x1d1   :  { %296 = vrot.lane.b32.xlu0 %v3501_v14, %s3343_s21 }
 0x233   :  { %v229_v15 = vpop.permute.xlu1 %228 }
 0x234   :  { %3177 = vmatprep.subr.msk.bf16.mxu0 %vm38_vm1, %v229_v15  ;;  %v239_v16 = vsel %vm38_vm1, %v229_v15, 0 }
 0x235   :  { %2950 = vmatpush3.bf16.xpose.msra.mxu0 %v239_v16 }
 0x239   :  { %v231_v17 = vpop.permute.xlu0 %230 }
 0x23a   :  { %3178 = vmatprep.subr.msk.bf16.mxu0 %vm38_vm1, %v231_v17  ;;  %v242_v19 = vsel %vm38_vm1, %v231_v17, 0 }
 0x23d   :  { %2952 = vmatpush3.bf16.xpose.msra.mxu0 %v242_v19 }
 0x241   :  { %v295_v20 = vpop.permute.xlu1 %294 }
 0x242   :  { %3179 = vmatprep.subr.msk.bf16.mxu1 %vm38_vm1, %v295_v20  ;;  %v305_v22 = vsel %vm38_vm1, %v295_v20, 0 }
 0x243   :  { %2958 = vmatpush3.bf16.xpose.msra.mxu1 %v305_v22  ;;  %v297_v23 = vpop.permute.xlu0 %296 }
 0x244   :  { %2954 = vmatmul.mubr.msk.bf16.vlgmr.msra.gmra.mrb[8].mxu0 %vm38_vm1, %v3492_v2  ;;  %3180 = vmatprep.subr.msk.bf16.mxu1 %vm38_vm1, %v297_v23  ;;  %v308_v24 = vsel %vm38_vm1, %v297_v23, 0 }
 0x24b   :  { %2960 = vmatpush3.bf16.xpose.msra.mxu1 %v308_v24 }
 0x252   :  { %2962 = vmatmul.mubr.msk.bf16.vlgmr.msra.gmra.mrb[16].mxu1 %vm38_vm1, %v3501_v14 }
 0x317   :  { %v2955_v31 = vpop.f32.mrb[8].mxu0 }
 0x318   :  { %v278_v32 = vpop.f32.mrb[9].mxu0  ;;  %v360_v39 = vmul.f32 0.17677669, %v2955_v31 }
 0x319   :  { %v358_v34 = vmul.f32 0.17677669, %v278_v32  ;;  %v2956_v37 = vpop.f32.mrb[10].mxu0 }
 0x31a   :  { %v281_v38 = vpop.f32.mrb[11].mxu0  ;;  %v372_v48 = vsel %vm3536_vm7, %v360_v39, -1e+30 }
 0x31b   :  { %v359_v40 = vmul.f32 0.17677669, %v281_v38  ;;  %v370_v41 = vsel %vm3529_vm5, %v358_v34, -1e+30  ;;  %v383_v49 = vsel %vm376_vm6, %v372_v48, -inf }
 0x31c   :  { %v377_v42 = vsel %vm376_vm6, %v370_v41, -inf }
 0x31d   :  { %378 = vmax.xlane.f32.xlu1 %v377_v42  ;;  %v371_v45 = vsel %vm3529_vm5, %v359_v40, -1e+30 }
 0x31e   :  { %v380_v47 = vsel %vm376_vm6, %v371_v45, -inf }
 0x31f   :  { %381 = vmax.xlane.f32.xlu0 %v380_v47 }
 0x323   :  { %384 = vmax.xlane.f32.xlu0 %v383_v49 }
 0x325   :  { %v2963_v52 = vpop.f32.mrb[16].mxu1 }
 0x326   :  { %v344_v54 = vpop.f32.mrb[17].mxu1  ;;  %v363_v55 = vmul.f32 0.17677669, %v2963_v52 }
 0x327   :  { %v361_v56 = vmul.f32 0.17677669, %v344_v54  ;;  %v2964_v57 = vpop.f32.mrb[18].mxu1 }
 0x328   :  { %v347_v58 = vpop.f32.mrb[19].mxu1  ;;  %v375_v1 = vsel %vm3536_vm7, %v363_v55, -1e+30  ;;  %vm1820_vm7 = vcmask 785408  }
 0x329   :  { %v362_v59 = vmul.f32 0.17677669, %v347_v58  ;;  %v373_v61 = vsel %vm3529_vm5, %v361_v56, -1e+30  ;;  %v392_v5 = vsel %vm376_vm6, %v375_v1, -inf }
 0x32a   :  { %v386_v62 = vsel %vm376_vm6, %v373_v61, -inf }
 0x32b   :  { %387 = vmax.xlane.f32.xlu1 %v386_v62  ;;  %v374_v63 = vsel %vm3529_vm5, %v362_v59, -1e+30 }
 0x32c   :  { %v389_v3 = vsel %vm376_vm6, %v374_v63, -inf }
 0x32d   :  { %390 = vmax.xlane.f32.xlu0 %v389_v3 }
 0x32f   :  { %393 = vmax.xlane.f32.xlu1 %v392_v5 }
 0x340   :  { %449 = vrot.lane.b32.xlu1 %v3492_v2, %s3345_s22 }
 0x3aa   :  { %v379_v6 = vpop.xlane.xlu1 %378 }
 0x3ab   :  { %v395_v10 = vsub.f32 %v370_v41, %v379_v6 }
 0x3ac   :  { %v382_v8 = vpop.xlane.xlu0 %381 }
 0x3ad   :  { %v396_v9 = vsub.f32 %v371_v45, %v382_v8  ;;  %v401_v16 = vmul.f32 1.442695, %v395_v10 }
 0x3af   :  { %v403_v12 = vmul.f32 1.442695, %v396_v9 }
 0x3b0   :  { %v385_v13 = vpop.xlane.xlu0 %384 }
 0x3b1   :  { %3228 = vpow2.f32 %v403_v12  ;;  %v397_v15 = vsub.f32 %v372_v48, %v385_v13 }
 0x3b3   :  { %v405_v17 = vmul.f32 1.442695, %v397_v15 }
 0x3b5   :  { %3230 = vpow2.f32 %v405_v17 }
 0x3b6   :  { %3232 = vpow2.f32 %v401_v16 }
 0x3b8   :  { %v388_v19 = vpop.xlane.xlu1 %387 }
 0x3b9   :  { %v398_v22 = vsub.f32 %v373_v61, %v388_v19 }
 0x3ba   :  { %v391_v40 = vpop.xlane.xlu0 %390 }
 0x3bb   :  { %v3229_v20 = vpop.eup %3228  ;;  %v407_v26 = vmul.f32 1.442695, %v398_v22  ;;  %v399_v41 = vsub.f32 %v374_v63, %v391_v40 }
 0x3bc   :  { %v394_v23 = vpop.xlane.xlu1 %393  ;;  %v416_v24 = vsel %vm376_vm6, %v3229_v20, 0.0 }
 0x3bd   :  { %v400_v25 = vsub.f32 %v375_v1, %v394_v23  ;;  %417 = vadd.xlane.f32.xlu1 %v416_v24  ;;  %v409_v42 = vmul.f32 1.442695, %v399_v41 }
 0x3bf   :  { %v3231_v2 = vpop.eup %3230  ;;  %v411_v28 = vmul.f32 1.442695, %v400_v25 }
 0x3c0   :  { %v419_v31 = vsel %vm376_vm6, %v3231_v2, 0.0  ;;  %v3233_v32 = vpop.eup %3232 }
 0x3c1   :  { %3234 = vpow2.f32 %v411_v28  ;;  %420 = vadd.xlane.f32.xlu0 %v419_v31  ;;  %v413_v33 = vsel %vm376_vm6, %v3233_v32, 0.0 }
 0x3c2   :  { %3236 = vpow2.f32 %v407_v26 }
 0x3c3   :  { %3238 = vpow2.f32 %v409_v42 }
 0x3c5   :  { %414 = vadd.xlane.f32.xlu0 %v413_v33 }
 0x3cb   :  { %v3560_v34 = vpop.eup %3234 }
 0x3cc   :  { %v428_v37 = vsel %vm376_vm6, %v3560_v34, 0.0  ;;  %v3564_v38 = vpop.eup %3236 }
 0x3cd   :  { %429 = vadd.xlane.f32.xlu1 %v428_v37  ;;  %v422_v39 = vsel %vm376_vm6, %v3564_v38, 0.0  ;;  %v3239_v44 = vpop.eup %3238 }
 0x3ce   :  { %v425_v45 = vsel %vm376_vm6, %v3239_v44, 0.0 }
 0x3d1   :  { %423 = vadd.xlane.f32.xlu1 %v422_v39 }
 0x3db   :  { %447 = vrot.lane.b32.xlu0 %v3485_v60, %s3345_s22  ;;  %v450_v60 = vpop.permute.xlu1 %449 }
 0x3e2   :  { %510 = vrot.lane.b32.xlu1 %v3498_v11, %s3345_s22 }
 0x3e6   :  { %588 = vrot.lane.b32.xlu1 %v3437_v18, %s3342_s25 }
 0x3ea   :  { %595 = vrot.lane.b32.xlu1 %v3481_v53, %s3342_s25 }
 0x3fa   :  { %426 = vadd.xlane.f32.xlu0 %v425_v45 }
 0x410   :  { %512 = vrot.lane.b32.xlu0 %v3501_v14, %s3345_s22  ;;  %v460_v14 = vsel %vm458_vm8, %v450_v60, 0 }
 0x414   :  { %590 = vrot.lane.b32.xlu0 %v3447_v21, %s3342_s25 }
 0x44a   :  { %v418_v11 = vpop.xlane.xlu1 %417 }
 0x44e   :  { %v421_v47 = vpop.xlane.xlu0 %420 }
 0x44f   :  { %3240 = vrcp.f32 %v421_v47 }
 0x450   :  { %3242 = vrcp.f32 %v418_v11 }
 0x452   :  { %v415_v18 = vpop.xlane.xlu0 %414 }
 0x453   :  { %3244 = vrcp.f32 %v415_v18 }
 0x456   :  { %v448_v48 = vpop.permute.xlu0 %447 }
 0x457   :  { %2965 = vmatprep.subr.bf16.mxu0 %v448_v48 }
 0x458   :  { %2966 = vmatpush3.bf16.msra.mxu0 %v448_v48 }
 0x459   :  { %3181 = vmatprep.subr.msk.bf16.mxu0 %vm458_vm8, %v450_v60  ;;  %v3241_v53 = vpop.eup %3240 }
 0x45a   :  { %v430_v49 = vpop.xlane.xlu1 %429  ;;  %v3243_v52 = vpop.eup %3242  ;;  %v439_v54 = vmul.f32 %v3241_v53, %v3231_v2 }
 0x45b   :  { %v438_v57 = vmul.f32 %v3243_v52, %v3229_v20  ;;  %3246 = vrcp.f32 %v430_v49 }
 0x45c   :  { %2968 = vmatpush3.bf16.msra.mxu0 %v460_v14  ;;  %v444_v59 = vpack.c.bf16 %v439_v54, %v439_v54 }
 0x45d   :  { %v3245_v21 = vpop.eup %3244  ;;  %2981 = vmatprep.subr.bf16.mxu0 %v3340_v0 }
 0x45e   :  { %v424_v55 = vpop.xlane.xlu1 %423  ;;  %v437_v56 = vmul.f32 %v3245_v21, %v3233_v32 }
 0x45f   :  { %3248 = vrcp.f32 %v424_v55 }
 0x460   :  { %v443_v58 = vpack.c.bf16 %v438_v57, %v437_v56 }
 0x462   :  { %v511_v61 = vpop.permute.xlu1 %510  ;;  %2969 = vmatprep.mubr.msk.bf16.mxu0 %vm376_vm6, %v443_v58 }
 0x463   :  { %2970 = vmatmul.mubr.msk.bf16.vlgmr.msra.gmra.mrb[12].mxu0 %vm376_vm6, %v444_v59  ;;  %2973 = vmatprep.subr.bf16.mxu1 %v511_v61 }
 0x464   :  { %2974 = vmatpush3.bf16.msra.mxu1 %v511_v61  ;;  %2985 = vmatprep.mubr.msk.bf16.mxu0 %vm3341_vm0, %v3340_v0 }
 0x465   :  { %v3247_v5 = vpop.eup %3246 }
 0x466   :  { %v589_v62 = vpop.permute.xlu1 %588  ;;  %v442_v9 = vmul.f32 %v3247_v5, %v3560_v34 }
 0x467   :  { %2982 = vmatpush3.bf16.msra.mxu0 %v589_v62 }
 0x468   :  { %2983 = vmatprep.subr.bf16.mxu0 %v3340_v0  ;;  %v446_v15 = vpack.c.bf16 %v442_v9, %v442_v9 }
 0x469   :  { %v3249_v6 = vpop.eup %3248 }
 0x46a   :  { %v440_v10 = vmul.f32 %v3249_v6, %v3564_v38  ;;  %v596_v32 = vpop.permute.xlu1 %595 }
 0x487   :  { %v427_v63 = vpop.xlane.xlu0 %426 }
 0x488   :  { %3250 = vrcp.f32 %v427_v63 }
 0x48b   :  { %v513_v1 = vpop.permute.xlu0 %512 }
 0x48c   :  { %3182 = vmatprep.subr.msk.bf16.mxu1 %vm458_vm8, %v513_v1  ;;  %v522_v3 = vsel %vm458_vm8, %v513_v1, 0 }
 0x48d   :  { %2976 = vmatpush3.bf16.msra.mxu1 %v522_v3 }
 0x48e   :  { %2997 = vmatprep.subr.bf16.mxu1 %v3340_v0 }
 0x48f   :  { %v591_v16 = vpop.permute.xlu0 %590 }
 0x490   :  { %2984 = vmatpush3.bf16.msra.mxu0 %v591_v16 }
 0x491   :  { %3013 = vmatprep.subr.bf16.mxu0 %v3340_v0 }
 0x492   :  { %v3251_v8 = vpop.eup %3250 }
 0x493   :  { %v441_v12 = vmul.f32 %v3251_v8, %v3239_v44 }
 0x495   :  { %v445_v13 = vpack.c.bf16 %v441_v12, %v440_v10 }
 0x497   :  { %2977 = vmatprep.mubr.msk.bf16.mxu1 %vm376_vm6, %v445_v13 }
 0x498   :  { %2978 = vmatmul.mubr.msk.bf16.vlgmr.msra.gmra.mrb[20].mxu1 %vm376_vm6, %v446_v15  ;;  %vm1457_vm6 = vcmask 130048  }
 0x499   :  { %3001 = vmatprep.mubr.msk.bf16.mxu1 %vm3341_vm0, %v3340_v0 }
 0x536   :  { %v2971_v17 = vpop.f32.mrb[12].mxu0 }
 0x537   :  { %v496_v19 = vpop.f32.mrb[13].mxu0 }
 0x538   :  { %v2972_v20 = vpop.f32.mrb[14].mxu0 }
 0x539   :  { %v499_v22 = vpop.f32.mrb[15].mxu0 }
 0x53a   :  { %v576_v23 = vpack.c.bf16 %v499_v22, %v496_v19 }
 0x53c   :  { %2986 = vmatmul.mubr.msk.bf16.vlgmr.msra.gmra.mrb[16].mxu0 %vm38_vm1, %v576_v23 }
 0x53d   :  { %2989 = vmatprep.mubr.msk.bf16.mxu0 %vm3341_vm0, %v3340_v0 }
 0x56b   :  { %v2979_v24 = vpop.f32.mrb[20].mxu1 }
 0x56c   :  { %v558_v25 = vpop.f32.mrb[21].mxu1 }
 0x56d   :  { %v577_v2 = vpack.c.bf16 %v558_v25, %v2971_v17  ;;  %v2980_v26 = vpop.f32.mrb[22].mxu1 }
 0x56e   :  { %v561_v28 = vpop.f32.mrb[23].mxu1 }
 0x56f   :  { %v578_v31 = vpack.c.bf16 %v2979_v24, %v561_v28  ;;  %2990 = vmatmul.mubr.msk.bf16.gmra.mrb[20].mxu0 %vm38_vm1, %v577_v2 }
 0x570   :  { %2993 = vmatprep.mubr.msk.bf16.mxu0 %vm3341_vm0, %v3340_v0 }
 0x577   :  { %2994 = vmatmul.mubr.msk.bf16.gmra.mrb[24].mxu0 %vm38_vm1, %v578_v31 }
 0x578   :  { %3021 = vmatprep.mubr.msk.bf16.mxu0 %vm3341_vm0, %v3340_v0 }
 0x60f   :  { %v641_v33 = vpop.f32.mrb[16].mxu0 }
 0x610   :  { %v642_v34 = vadd.f32 %v641_v33, %v596_v32  ;;  %v2987_v37 = vpop.f32.mrb[17].mxu0 }
 0x611   :  { %v644_v38 = vpop.f32.mrb[18].mxu0  ;;  %v770_v37 = vld [vmem:[%s4275_s2 + $0x80] sm:$0xff] }
 0x612   :  { %v645_v39 = vadd.f32 %v644_v38, %v596_v32  ;;  %v2988_v40 = vpop.f32.mrb[19].mxu0  ;;  %v664_v41 = vadd.f32 %v642_v34, %v3453_v35  ;;  %v771_v38 = vld [vmem:[%s4275_s2 + $0x88] sm:$0xff] }
 0x613   :  { %v3659_v40 = vld [vmem:[%s4277_s3 + $0x2] ss:$0 sm:$0xff] }
 0x614   :  { %v671_v42 = vsel %vm38_vm1, %v664_v41, 0.0  ;;  %v665_v44 = vadd.f32 %v645_v39, %v3455_v36  ;;  %v777_v39 = vpack.c.bf16 %v771_v38, %v770_v37 }
 0x615   :  { %672 = vadd.xlane.f32.xlu0 %v671_v42  ;;  %v773_v42 = vld [vmem:[%s4275_s2 + $0x98] sm:$0xff] }
 0x616   :  { %v674_v45 = vsel %vm38_vm1, %v665_v44, 0.0  ;;  %2998 = vmatpush3.bf16.msra.mxu1 %v777_v39 }
 0x617   :  { %675 = vadd.xlane.f32.xlu1 %v674_v45  ;;  %2999 = vmatprep.subr.bf16.mxu1 %v3340_v0  ;;  %v858_v45 = vld [vmem:[%s4275_s2 + $0x20] sm:$0xff] }
 0x642   :  { %v649_v60 = vpop.f32.mrb[20].mxu0 }
 0x643   :  { %v650_v11 = vadd.f32 %v649_v60, %v596_v32  ;;  %v2991_v47 = vpop.f32.mrb[21].mxu0  ;;  %v859_v60 = vld [vmem:[%s4275_s2 + $0x28] sm:$0xff] }
 0x644   :  { %v652_v18 = vpop.f32.mrb[22].mxu0  ;;  %v867_v47 = vpack.c.bf16 %v859_v60, %v858_v45 }
 0x645   :  { %v653_v48 = vadd.f32 %v652_v18, %v596_v32  ;;  %v2992_v53 = vpop.f32.mrb[23].mxu0  ;;  %v666_v49 = vadd.f32 %v650_v11, %v3462_v43  ;;  %v860_v11 = vld [vmem:[%s4275_s2 + $0x30] sm:$0xff] }
 0x647   :  { %v677_v52 = vsel %vm38_vm1, %v666_v49, 0.0  ;;  %v667_v35 = vadd.f32 %v653_v48, %v3464_v46 }
 0x648   :  { %678 = vadd.xlane.f32.xlu0 %v677_v52 }
 0x649   :  { %v680_v54 = vsel %vm38_vm1, %v667_v35, 0.0 }
 0x64a   :  { %v657_v14 = vpop.f32.mrb[24].mxu0 }
 0x64b   :  { %v658_v21 = vadd.f32 %v657_v14, %v596_v32  ;;  %v2995_v36 = vpop.f32.mrb[25].mxu0 }
 0x64c   :  { %681 = vadd.xlane.f32.xlu0 %v680_v54  ;;  %v660_v55 = vpop.f32.mrb[26].mxu0 }
 0x64d   :  { %v661_v56 = vadd.f32 %v660_v55, %v596_v32  ;;  %v2996_v57 = vpop.f32.mrb[27].mxu0  ;;  %v668_v58 = vadd.f32 %v658_v21, %v3473_v51 }
 0x64f   :  { %v683_v59 = vsel %vm38_vm1, %v668_v58, 0.0  ;;  %v669_v43 = vadd.f32 %v661_v56, %v3471_v50 }
 0x650   :  { %684 = vadd.xlane.f32.xlu1 %v683_v59 }
 0x651   :  { %v686_v61 = vsel %vm38_vm1, %v669_v43, 0.0 }
 0x652   :  { %687 = vadd.xlane.f32.xlu0 %v686_v61 }
 0x6a2   :  { %v673_v46 = vpop.xlane.xlu0 %672 }
 0x6a3   :  { %v690_v62 = vmul.f32 0.03125, %v673_v46 }
 0x6a4   :  { %v676_v63 = vpop.xlane.xlu1 %675 }
 0x6a5   :  { %v3620_v1 = vsub.f32 %v664_v41, %v690_v62  ;;  %v691_v3 = vmul.f32 0.03125, %v676_v63  ;;  %v772_v41 = vld [vmem:[%s4275_s2 + $0x90] sm:$0xff] }
 0x6a7   :  { %v3622_v5 = vsub.f32 %v665_v44, %v691_v3  ;;  %v702_v6 = vmul.f32 %v3620_v1, %v3620_v1  ;;  %v778_v44 = vpack.c.bf16 %v773_v42, %v772_v41 }
 0x6a9   :  { %v708_v51 = vsel %vm38_vm1, %v702_v6, 0.0  ;;  %v703_v50 = vmul.f32 %v3622_v5, %v3622_v5  ;;  %3000 = vmatpush3.bf16.msra.mxu1 %v778_v44 }
 0x6aa   :  { %709 = vadd.xlane.f32.xlu1 %v708_v51  ;;  %3033 = vmatprep.subr.bf16.mxu1 %v3340_v0 }
 0x6ab   :  { %v711_v8 = vsel %vm38_vm1, %v703_v50, 0.0 }
 0x6ac   :  { %712 = vadd.xlane.f32.xlu0 %v711_v8 }
 0x6d5   :  { %v679_v9 = vpop.xlane.xlu0 %678 }
 0x6d6   :  { %v692_v10 = vmul.f32 0.03125, %v679_v9 }
 0x6d8   :  { %v3630_v12 = vsub.f32 %v666_v49, %v692_v10 }
 0x6d9   :  { %v682_v13 = vpop.xlane.xlu0 %681 }
 0x6da   :  { %v693_v15 = vmul.f32 0.03125, %v682_v13  ;;  %v704_v16 = vmul.f32 %v3630_v12, %v3630_v12 }
 0x6dc   :  { %v3634_v17 = vsub.f32 %v667_v35, %v693_v15  ;;  %v714_v19 = vsel %vm38_vm1, %v704_v16, 0.0 }
 0x6dd   :  { %715 = vadd.xlane.f32.xlu1 %v714_v19  ;;  %v685_v20 = vpop.xlane.xlu1 %684 }
 0x6de   :  { %v694_v22 = vmul.f32 0.03125, %v685_v20  ;;  %v705_v23 = vmul.f32 %v3634_v17, %v3634_v17 }
 0x6df   :  { %v688_v24 = vpop.xlane.xlu0 %687 }
 0x6e0   :  { %v3639_v25 = vsub.f32 %v668_v58, %v694_v22  ;;  %v695_v2 = vmul.f32 0.03125, %v688_v24  ;;  %v717_v26 = vsel %vm38_vm1, %v705_v23, 0.0 }
 0x6e1   :  { %718 = vadd.xlane.f32.xlu0 %v717_v26 }
 0x6e2   :  { %v3642_v28 = vsub.f32 %v669_v43, %v695_v2  ;;  %v706_v31 = vmul.f32 %v3639_v25, %v3639_v25 }
 0x6e4   :  { %v720_v32 = vsel %vm38_vm1, %v706_v31, 0.0  ;;  %v707_v33 = vmul.f32 %v3642_v28, %v3642_v28 }
 0x6e5   :  { %721 = vadd.xlane.f32.xlu1 %v720_v32 }
 0x6e6   :  { %v723_v34 = vsel %vm38_vm1, %v707_v33, 0.0 }
 0x6e7   :  { %724 = vadd.xlane.f32.xlu0 %v723_v34 }
 0x6f6   :  { %761 = vrot.lane.b32.xlu1 %v3659_v40, %s3343_s21 }
 0x6fa   :  { %880 = vrot.lane.b32.xlu1 %v3400_v7, %s3343_s21 }
 0x6fd   :  { %878 = vrot.lane.b32.xlu0 %v3385_v4, %s3343_s21  ;;  %v861_v4 = vld [vmem:[%s4275_s2 + $0x38] sm:$0xff] }
 0x6fe   :  { %882 = vrot.lane.b32.xlu1 %v867_v47, %s3343_s21  ;;  %v868_v7 = vpack.c.bf16 %v861_v4, %v860_v11 }
 0x701   :  { %779 = vrot.lane.b32.xlu0 %v3659_v40, %s3345_s22 }
 0x702   :  { %884 = vrot.lane.b32.xlu1 %v868_v7, %s3343_s21 }
 0x737   :  { %v710_v18 = vpop.xlane.xlu1 %709 }
 0x738   :  { %v726_v53 = vmul.f32 0.03125, %v710_v18 }
 0x739   :  { %v713_v48 = vpop.xlane.xlu0 %712 }
 0x73a   :  { %v727_v49 = vmul.f32 0.03125, %v713_v48  ;;  %v732_v52 = vadd.f32 1e-05, %v726_v53 }
 0x73c   :  { %v733_v35 = vadd.f32 1e-05, %v727_v49  ;;  %3252 = vrsqrt.f32 %v732_v52 }
 0x73e   :  { %3254 = vrsqrt.f32 %v733_v35 }
 0x746   :  { %v3253_v36 = vpop.eup %3252 }
 0x747   :  { %v744_v58 = vmul.f32 %v3253_v36, %v3620_v1 }
 0x748   :  { %v3255_v55 = vpop.eup %3254 }
 0x749   :  { %v745_v59 = vmul.f32 %v3255_v55, %v3622_v5  ;;  %v754_v63 = vmul.f32 %v3659_v40, %v744_v58 }
 0x74b   :  { %v755_v3 = vmul.f32 %v3659_v40, %v745_v59 }
 0x76a   :  { %v716_v14 = vpop.xlane.xlu1 %715 }
 0x76b   :  { %v728_v21 = vmul.f32 0.03125, %v716_v14 }
 0x76d   :  { %v734_v54 = vadd.f32 1e-05, %v728_v21 }
 0x76e   :  { %v719_v56 = vpop.xlane.xlu0 %718 }
 0x76f   :  { %3256 = vrsqrt.f32 %v734_v54  ;;  %v729_v57 = vmul.f32 0.03125, %v719_v56 }
 0x771   :  { %v735_v43 = vadd.f32 1e-05, %v729_v57 }
 0x772   :  { %v722_v61 = vpop.xlane.xlu1 %721 }
 0x773   :  { %3258 = vrsqrt.f32 %v735_v43  ;;  %v730_v46 = vmul.f32 0.03125, %v722_v61 }
 0x774   :  { %v725_v62 = vpop.xlane.xlu0 %724 }
 0x775   :  { %v736_v6 = vadd.f32 1e-05, %v730_v46  ;;  %v731_v51 = vmul.f32 0.03125, %v725_v62  ;;  %v3746_v62 = vld [vmem:[%s4277_s3 + $0x3] ss:$0 sm:$0xff] }
 0x776   :  { %v762_v50 = vpop.permute.xlu1 %761 }
 0x777   :  { %3260 = vrsqrt.f32 %v736_v6  ;;  %v737_v8 = vadd.f32 1e-05, %v731_v51  ;;  %v3695_v9 = vadd.f32 %v762_v50, %v754_v63  ;;  %v3697_v10 = vadd.f32 %v762_v50, %v755_v3 }
 0x778   :  { %v879_v1 = vpop.permute.xlu0 %878 }
 0x779   :  { %v3257_v5 = vpop.eup %3256  ;;  %3262 = vrsqrt.f32 %v737_v8  ;;  %v774_v13 = vpack.c.bf16 %v3697_v10, %v3695_v9  ;;  %3014 = vmatpush3.bf16.msra.mxu0 %v879_v1 }
 0x77a   :  { %v746_v15 = vmul.f32 %v3257_v5, %v3630_v12  ;;  %v881_v16 = vpop.permute.xlu1 %880  ;;  %3015 = vmatprep.subr.bf16.mxu0 %v3340_v0 }
 0x77b   :  { %3002 = vmatmul.mubr.msk.bf16.vlgmr.msra.gmra.mrb[24].mxu1 %vm38_vm1, %v774_v13 }
 0x77c   :  { %3005 = vmatprep.mubr.msk.bf16.mxu1 %vm3341_vm0, %v3340_v0  ;;  %v756_v22 = vmul.f32 %v3659_v40, %v746_v15 }
 0x77d   :  { %v3259_v19 = vpop.eup %3258  ;;  %3016 = vmatpush3.bf16.msra.mxu0 %v881_v16 }
 0x77e   :  { %v747_v20 = vmul.f32 %v3259_v19, %v3634_v17  ;;  %3017 = vmatprep.subr.bf16.mxu0 %v3340_v0  ;;  %v3710_v12 = vadd.f32 %v762_v50, %v756_v22 }
 0x780   :  { %v757_v23 = vmul.f32 %v3659_v40, %v747_v20 }
 0x781   :  { %v3261_v24 = vpop.eup %3260 }
 0x782   :  { %v3712_v2 = vadd.f32 %v762_v50, %v757_v23  ;;  %v748_v26 = vmul.f32 %v3261_v24, %v3639_v25 }
 0x783   :  { %v3263_v31 = vpop.eup %3262 }
 0x784   :  { %v775_v32 = vpack.c.bf16 %v3712_v2, %v3710_v12  ;;  %v749_v33 = vmul.f32 %v3263_v31, %v3642_v28  ;;  %v758_v17 = vmul.f32 %v3659_v40, %v748_v26  ;;  %v883_v28 = vpop.permute.xlu1 %882 }
 0x785   :  { %3018 = vmatpush3.bf16.msra.mxu0 %v883_v28 }
 0x786   :  { %3006 = vmatmul.mubr.msk.bf16.gmra.mrb[28].mxu1 %vm38_vm1, %v775_v32  ;;  %v759_v34 = vmul.f32 %v3659_v40, %v749_v33  ;;  %v3725_v38 = vadd.f32 %v762_v50, %v758_v17  ;;  %3019 = vmatprep.subr.bf16.mxu0 %v3340_v0  ;;  %v780_v40 = vpop.permute.xlu0 %779 }
 0x787   :  { %3009 = vmatprep.mubr.msk.bf16.mxu1 %vm3341_vm0, %v3340_v0 }
 0x788   :  { %v3723_v37 = vadd.f32 %v762_v50, %v759_v34  ;;  %v885_v39 = vpop.permute.xlu1 %884 }
 0x789   :  { %3020 = vmatpush3.bf16.msra.mxu0 %v885_v39 }
 0x78a   :  { %v776_v25 = vpack.c.bf16 %v3723_v37, %v3725_v38  ;;  %3051 = vmatprep.subr.bf16.mxu0 %v3340_v0 }
 0x78e   :  { %3010 = vmatmul.mubr.msk.bf16.gmra.mrb[32].mxu1 %vm38_vm1, %v776_v25 }
 0x78f   :  { %3035 = vmatprep.mubr.msk.bf16.mxu1 %vm3341_vm0, %v3340_v0 }
 0x84e   :  { %v825_v41 = vpop.f32.mrb[24].mxu1 }
 0x84f   :  { %v3003_v42 = vpop.f32.mrb[25].mxu1  ;;  %v826_v44 = vadd.f32 %v825_v41, %v780_v40 }
 0x850   :  { %v828_v45 = vpop.f32.mrb[26].mxu1 }
 0x851   :  { %v829_v60 = vadd.f32 %v828_v45, %v780_v40  ;;  %v3004_v11 = vpop.f32.mrb[27].mxu1  ;;  %v848_v47 = vmax.f32 %v826_v44, 0.0 }
 0x853   :  { %v849_v4 = vmax.f32 %v829_v60, 0.0 }
 0x855   :  { %v862_v7 = vpack.c.bf16 %v849_v4, %v848_v47 }
 0x857   :  { %3022 = vmatmul.mubr.msk.bf16.vlgmr.msra.gmra.mrb[28].mxu0 %vm890_vm9, %v862_v7 }
 0x858   :  { %3025 = vmatprep.mubr.msk.bf16.mxu0 %vm3341_vm0, %v3340_v0 }
 0x859   :  { %v833_v18 = vpop.f32.mrb[28].mxu1 }
 0x85a   :  { %v834_v48 = vadd.f32 %v833_v18, %v780_v40  ;;  %v3007_v53 = vpop.f32.mrb[29].mxu1 }
 0x85b   :  { %v836_v49 = vpop.f32.mrb[30].mxu1 }
 0x85c   :  { %v837_v52 = vadd.f32 %v836_v49, %v780_v40  ;;  %v3008_v35 = vpop.f32.mrb[31].mxu1  ;;  %v850_v14 = vmax.f32 %v834_v48, 0.0 }
 0x85e   :  { %v851_v21 = vmax.f32 %v837_v52, 0.0 }
 0x860   :  { %v863_v36 = vpack.c.bf16 %v851_v21, %v850_v14 }
 0x861   :  { %v841_v54 = vpop.f32.mrb[32].mxu1 }
 0x862   :  { %v842_v55 = vadd.f32 %v841_v54, %v780_v40  ;;  %v3011_v56 = vpop.f32.mrb[33].mxu1  ;;  %3026 = vmatmul.mubr.msk.bf16.gmra.mrb[32].mxu0 %vm890_vm9, %v863_v36 }
 0x863   :  { %v844_v57 = vpop.f32.mrb[34].mxu1  ;;  %3029 = vmatprep.mubr.msk.bf16.mxu0 %vm3341_vm0, %v3340_v0 }
 0x864   :  { %v845_v58 = vadd.f32 %v844_v57, %v780_v40  ;;  %v3012_v59 = vpop.f32.mrb[35].mxu1  ;;  %v852_v43 = vmax.f32 %v842_v55, 0.0 }
 0x865   :  { %v2790_v59 = vld [vmem:[%s4277_s3] ss:$0 sm:$0xff] }
 0x866   :  { %v853_v61 = vmax.f32 %v845_v58, 0.0 }
 0x868   :  { %v864_v46 = vpack.c.bf16 %v853_v61, %v852_v43 }
 0x86a   :  { %3030 = vmatmul.mubr.msk.bf16.gmra.mrb[36].mxu0 %vm890_vm9, %v864_v46 }
 0x86b   :  { %3053 = vmatprep.mubr.msk.bf16.mxu0 %vm3341_vm0, %v3340_v0 }
 0x92a   :  { %v934_v63 = vpop.f32.mrb[28].mxu0 }
 0x92b   :  { %v935_v3 = vadd.f32 %v3746_v62, %v934_v63  ;;  %v3023_v6 = vpop.f32.mrb[29].mxu0 }
 0x92c   :  { %v937_v51 = vpop.f32.mrb[30].mxu0  ;;  %v1065_v6 = vld [vmem:[%s4277_s3 + $0x7] sm:$0x1] }
 0x92d   :  { %v3024_v50 = vpop.f32.mrb[31].mxu0  ;;  %v957_v8 = vadd.f32 %v935_v3, %v3695_v9  ;;  %v938_v13 = vadd.f32 %v3746_v62, %v937_v51 }
 0x92f   :  { %v963_v1 = vsel %vm38_vm1, %v957_v8, 0.0  ;;  %v958_v9 = vadd.f32 %v938_v13, %v3697_v10 }
 0x930   :  { %964 = vadd.xlane.f32.xlu1 %v963_v1 }
 0x931   :  { %v966_v17 = vsel %vm38_vm1, %v958_v9, 0.0 }
 0x935   :  { %v942_v5 = vpop.f32.mrb[32].mxu0 }
 0x936   :  { %v943_v15 = vadd.f32 %v3746_v62, %v942_v5  ;;  %v3027_v16 = vpop.f32.mrb[33].mxu0 }
 0x937   :  { %v945_v19 = vpop.f32.mrb[34].mxu0 }
 0x938   :  { %v946_v20 = vadd.f32 %v3746_v62, %v945_v19  ;;  %v3028_v22 = vpop.f32.mrb[35].mxu0  ;;  %v959_v23 = vadd.f32 %v943_v15, %v3710_v12 }
 0x93a   :  { %v969_v24 = vsel %vm38_vm1, %v959_v23, 0.0  ;;  %v960_v26 = vadd.f32 %v946_v20, %v3712_v2 }
 0x93b   :  { %970 = vadd.xlane.f32.xlu0 %v969_v24 }
 0x93c   :  { %v972_v31 = vsel %vm38_vm1, %v960_v26, 0.0 }
 0x93d   :  { %973 = vadd.xlane.f32.xlu1 %v972_v31  ;;  %v950_v32 = vpop.f32.mrb[36].mxu0 }
 0x93e   :  { %v3031_v33 = vpop.f32.mrb[37].mxu0  ;;  %v951_v25 = vadd.f32 %v3746_v62, %v950_v32 }
 0x93f   :  { %967 = vadd.xlane.f32.xlu0 %v966_v17  ;;  %v953_v34 = vpop.f32.mrb[38].mxu0 }
 0x940   :  { %v954_v12 = vadd.f32 %v3746_v62, %v953_v34  ;;  %v3032_v28 = vpop.f32.mrb[39].mxu0  ;;  %v961_v10 = vadd.f32 %v951_v25, %v3725_v38 }
 0x942   :  { %v962_v39 = vadd.f32 %v954_v12, %v3723_v37  ;;  %v975_v40 = vsel %vm38_vm1, %v961_v10, 0.0 }
 0x944   :  { %v978_v2 = vsel %vm38_vm1, %v962_v39, 0.0 }
 0x945   :  { %979 = vadd.xlane.f32.xlu0 %v978_v2 }
 0x949   :  { %976 = vadd.xlane.f32.xlu0 %v975_v40 }
 0x9bd   :  { %v965_v41 = vpop.xlane.xlu1 %964 }
 0x9be   :  { %v981_v42 = vmul.f32 0.03125, %v965_v41 }
 0x9c0   :  { %v987_v44 = vsub.f32 %v957_v8, %v981_v42 }
 0x9c2   :  { %v993_v45 = vmul.f32 %v987_v44, %v987_v44 }
 0x9c4   :  { %v999_v60 = vsel %vm38_vm1, %v993_v45, 0.0 }
 0x9c5   :  { %1000 = vadd.xlane.f32.xlu0 %v999_v60 }
 0x9c8   :  { %v971_v11 = vpop.xlane.xlu0 %970 }
 0x9c9   :  { %v983_v47 = vmul.f32 0.03125, %v971_v11 }
 0x9ca   :  { %v974_v43 = vpop.xlane.xlu1 %973 }
 0x9cb   :  { %v989_v37 = vsub.f32 %v959_v23, %v983_v47  ;;  %v984_v61 = vmul.f32 0.03125, %v974_v43 }
 0x9cc   :  { %v968_v4 = vpop.xlane.xlu0 %967 }
 0x9cd   :  { %v982_v7 = vmul.f32 0.03125, %v968_v4  ;;  %v995_v49 = vmul.f32 %v989_v37, %v989_v37  ;;  %v3787_v46 = vsub.f32 %v960_v26, %v984_v61 }
 0x9cf   :  { %v988_v18 = vsub.f32 %v958_v9, %v982_v7  ;;  %v1005_v21 = vsel %vm38_vm1, %v995_v49, 0.0  ;;  %v996_v63 = vmul.f32 %v3787_v46, %v3787_v46 }
 0x9d1   :  { %v994_v48 = vmul.f32 %v988_v18, %v988_v18  ;;  %v1008_v3 = vsel %vm38_vm1, %v996_v63, 0.0 }
 0x9d2   :  { %v980_v53 = vpop.xlane.xlu0 %979 }
 0x9d3   :  { %v1002_v38 = vsel %vm38_vm1, %v994_v48, 0.0  ;;  %v986_v52 = vmul.f32 0.03125, %v980_v53 }
 0x9d4   :  { %1003 = vadd.xlane.f32.xlu1 %v1002_v38 }
 0x9d5   :  { %v3769_v36 = vsub.f32 %v962_v39, %v986_v52 }
 0x9d6   :  { %v977_v35 = vpop.xlane.xlu0 %976 }
 0x9d7   :  { %v985_v14 = vmul.f32 0.03125, %v977_v35  ;;  %v998_v57 = vmul.f32 %v3769_v36, %v3769_v36 }
 0x9d8   :  { %1006 = vadd.xlane.f32.xlu1 %v1005_v21 }
 0x9d9   :  { %v3771_v54 = vsub.f32 %v961_v10, %v985_v14  ;;  %v1014_v58 = vsel %vm38_vm1, %v998_v57, 0.0 }
 0x9db   :  { %v997_v55 = vmul.f32 %v3771_v54, %v3771_v54 }
 0x9dd   :  { %v1011_v56 = vsel %vm38_vm1, %v997_v55, 0.0 }
 0x9de   :  { %1012 = vadd.xlane.f32.xlu0 %v1011_v56 }
 0x9e2   :  { %1015 = vadd.xlane.f32.xlu0 %v1014_v58 }
 0x9e9   :  { %1042 = vrot.lane.b32.xlu1 %v3746_v62, %s3343_s21 }
 0x9f8   :  { %1051 = vrot.lane.b32.xlu0 %v3746_v62, %s3345_s22 }
 0x9fc   :  { %1078 = vrot.lane.b32.xlu0 %v2790_v59, %s3343_s21 }
 0xa0d   :  { %1009 = vadd.xlane.f32.xlu1 %v1008_v3 }
 0xa1e   :  { %1071 = vrot.lane.b32.xlu1 %v2790_v59, %s3342_s25 }
 0xa22   :  { %1097 = vrot.lane.b32.xlu1 %v2790_v59, %s3345_s22 }
 0xa26   :  { %1245 = vrot.lane.b32.xlu1 %v1065_v6, %s3346_s23 }
 0xa52   :  { %v1001_v51 = vpop.xlane.xlu0 %1000 }
 0xa53   :  { %v1017_v50 = vmul.f32 0.03125, %v1001_v51 }
 0xa55   :  { %v1023_v8 = vadd.f32 1e-05, %v1017_v50 }
 0xa57   :  { %3264 = vrsqrt.f32 %v1023_v8 }
 0xa61   :  { %v1004_v1 = vpop.xlane.xlu1 %1003  ;;  %v3265_v22 = vpop.eup %3264 }
 0xa62   :  { %v1018_v5 = vmul.f32 0.03125, %v1004_v1  ;;  %v1035_v31 = vmul.f32 %v3265_v22, %v987_v44 }
 0xa64   :  { %v1024_v13 = vadd.f32 1e-05, %v1018_v5 }
 0xa65   :  { %v1007_v15 = vpop.xlane.xlu1 %1006 }
 0xa66   :  { %3266 = vrsqrt.f32 %v1024_v13  ;;  %v1019_v16 = vmul.f32 0.03125, %v1007_v15 }
 0xa68   :  { %v1025_v19 = vadd.f32 1e-05, %v1019_v16 }
 0xa69   :  { %v3797_v9 = vpop.permute.xlu1 %1042 }
 0xa6a   :  { %3268 = vrsqrt.f32 %v1025_v19  ;;  %v1045_v34 = vmul.f32 %v3797_v9, %v1035_v31 }
 0xa6b   :  { %v1013_v20 = vpop.xlane.xlu0 %1012 }
 0xa6c   :  { %v1021_v4 = vmul.f32 0.03125, %v1013_v20 }
 0xa6e   :  { %v1027_v7 = vadd.f32 1e-05, %v1021_v4 }
 0xa6f   :  { %v1016_v23 = vpop.xlane.xlu0 %1015 }
 0xa70   :  { %v3267_v24 = vpop.eup %3266  ;;  %v1022_v60 = vmul.f32 0.03125, %v1016_v23 }
 0xa71   :  { %v1036_v26 = vmul.f32 %v3267_v24, %v988_v18 }
 0xa72   :  { %v1028_v47 = vadd.f32 1e-05, %v1022_v60 }
 0xa73   :  { %v1046_v32 = vmul.f32 %v3797_v9, %v1036_v26  ;;  %v1052_v33 = vpop.permute.xlu0 %1051 }
 0xa74   :  { %v3269_v17 = vpop.eup %3268  ;;  %v3801_v12 = vadd.f32 %v1052_v33, %v1045_v34  ;;  %3270 = vrsqrt.f32 %v1028_v47  ;;  %v3869_v34 = vsub.s32 0, %v3521_v27 }
 0xa75   :  { %v1037_v25 = vmul.f32 %v3269_v17, %v989_v37  ;;  %v3803_v28 = vadd.f32 %v1052_v33, %v1046_v32  ;;  %3272 = vrsqrt.f32 %v1027_v7 }
 0xa77   :  { %v1047_v39 = vmul.f32 %v3797_v9, %v1037_v25  ;;  %v1079_v2 = vpop.permute.xlu0 %1078 }
 0xa78   :  { %v1081_v10 = vmul.f32 %v1079_v2, %v3801_v12  ;;  %v1082_v42 = vmul.f32 %v1079_v2, %v3803_v28 }
 0xa79   :  { %v1056_v40 = vadd.f32 %v1052_v33, %v1047_v39  ;;  %v3347_v39 = vmov 0  }
 0xa7a   :  { %v1085_v41 = vsel %vm38_vm1, %v1081_v10, 0.0  ;;  %v1088_v11 = vsel %vm38_vm1, %v1082_v42, 0.0 }
 0xa7b   :  { %1086 = vadd.xlane.f32.xlu0 %v1085_v41  ;;  %v3809_v44 = vpack.c.bf16 %v1056_v40, %v1056_v40 }
 0xa7d   :  { %v1150_v45 = vsel %vm38_vm1, %v3809_v44, 0  ;;  %v1485_v26 = vsel %vm458_vm8, %v3809_v44, 0 }
 0xa7e   :  { %3034 = vmatpush3.bf16.xpose.msra.mxu1 %v1150_v45  ;;  %v3271_v37 = vpop.eup %3270 }
 0xa7f   :  { %1089 = vadd.xlane.f32.xlu0 %v1088_v11  ;;  %3039 = vmatprep.subr.bf16.mxu1 %v3340_v0  ;;  %v1040_v18 = vmul.f32 %v3271_v37, %v3769_v36  ;;  %v3273_v48 = vpop.eup %3272 }
 0xa80   :  { %v1039_v38 = vmul.f32 %v3273_v48, %v3771_v54  ;;  %v1063_v48 = vld [vmem:[%s4278_s1 + $0x3] sm:$0x1] }
 0xa81   :  { %v1050_v53 = vmul.f32 %v3797_v9, %v1040_v18  ;;  %vm1379_vm13 = vcmp.gt.f32.partialorder %v1063_v48, 0.0 }
 0xa82   :  { %v1049_v14 = vmul.f32 %v3797_v9, %v1039_v38 }
 0xa83   :  { %v1059_v35 = vadd.f32 %v1052_v33, %v1050_v53 }
 0xa84   :  { %v3821_v59 = vadd.f32 %v1052_v33, %v1049_v14 }
 0xa85   :  { %v1145_v58 = vpack.c.bf16 %v1059_v35, %v1059_v35 }
 0xa86   :  { %v1084_v51 = vmul.f32 %v1079_v2, %v3821_v59 }
 0xa87   :  { %v1197_v54 = vsel %vm38_vm1, %v1145_v58, 0 }
 0xa88   :  { %v1094_v1 = vsel %vm38_vm1, %v1084_v51, 0.0 }
 0xa9a   :  { %v1010_v49 = vpop.xlane.xlu1 %1009 }
 0xa9b   :  { %v1020_v52 = vmul.f32 0.03125, %v1010_v49 }
 0xa9d   :  { %v1026_v21 = vadd.f32 1e-05, %v1020_v52  ;;  %v1381_v52 = vsel %vm1379_vm13, 1, %v3347_v39 }
 0xa9e   :  { %v1072_v55 = vpop.permute.xlu1 %1071 }
 0xa9f   :  { %3274 = vrsqrt.f32 %v1026_v21  ;;  %v1074_v56 = vmul.f32 %v1072_v55, %v3801_v12  ;;  %v1075_v57 = vmul.f32 %v1072_v55, %v3803_v28  ;;  %v1077_v19 = vmul.f32 %v1072_v55, %v3821_v59  ;;  %v1060_v21 = vld [vmem:[%s4278_s1] sm:$0x1] }
 0xaa0   :  { %vm1441_vm14 = vcmp.gt.f32.partialorder %v1060_v21, 0.0 }
 0xaa1   :  { %v1142_v36 = vpack.c.bf16 %v1075_v57, %v1074_v56  ;;  %v1389_v57 = vrot.slane %v1381_v52, %v3869_v34 }
 0xaa2   :  { %v1098_v43 = vpop.permute.xlu1 %1097 }
 0xaa3   :  { %v1100_v61 = vmul.f32 %v1098_v43, %v1056_v40  ;;  %v1101_v63 = vmul.f32 %v1098_v43, %v1059_v35  ;;  %3036 = vmatmul.mubr.msk.bf16.vlgmr.msra.gmra.mrb[36].mxu1 %vm38_vm1, %v1142_v36  ;;  %v1147_v24 = vsel %vm38_vm1, %v1142_v36, 0  ;;  %vm3903_vm3 = vcmp.eq.s32.totalorder %v1389_v57, 1 }
 0xaa4   :  { %3040 = vmatpush3.bf16.xpose.msra.mxu1 %v1197_v54  ;;  %3041 = vmatprep.mubr.msk.bf16.mxu1 %vm3341_vm0, %v3340_v0 }
 0xaa5   :  { %v1105_v3 = vsel %vm38_vm1, %v1101_v63, 0.0  ;;  %v1102_v6 = vsel %vm38_vm1, %v1100_v61, 0.0  ;;  %3045 = vmatprep.subr.bf16.mxu1 %v3340_v0 }
 0xaa6   :  { %1106 = vadd.xlane.f32.xlu1 %v1105_v3  ;;  %1103 = vadd.xlane.f32.xlu0 %v1102_v6  ;;  %v1246_v50 = vpop.permute.xlu1 %1245 }
 0xaa7   :  { %3183 = vpush %v1246_v50 }
 0xaa9   :  { %v3275_v8 = vpop.eup %3274 }
 0xaaa   :  { %v1038_v5 = vmul.f32 %v3275_v8, %v3787_v46  ;;  %1095 = vadd.xlane.f32.xlu0 %v1094_v1 }
 0xaac   :  { %v1048_v13 = vmul.f32 %v3797_v9, %v1038_v5  ;;  %v1531_v9 = vsel %vm458_vm8, %v1145_v58, 0 }
 0xaae   :  { %v3834_v15 = vadd.f32 %v1052_v33, %v1048_v13  ;;  %v1062_v33 = vld [vmem:[%s4278_s1 + $0x1] sm:$0x1]  ;;  %v1443_v13 = vsel %vm1441_vm14, 1, %v3347_v39 }
 0xaaf   :  { %vm1378_vm10 = vcmp.gt.f32.partialorder %v1062_v33, 0.0 }
 0xab0   :  { %v1076_v16 = vmul.f32 %v1072_v55, %v3834_v15  ;;  %v1083_v20 = vmul.f32 %v1079_v2, %v3834_v15  ;;  %v1380_v2 = vsel %vm1378_vm10, 1, %v3347_v39  ;;  %v1061_v55 = vld [vmem:[%s4278_s1 + $0x2] sm:$0x1] }
 0xab1   :  { %v1385_v10 = vrot.slane %v1380_v2, %v3869_v34  ;;  %vm1442_vm15 = vcmp.gt.f32.partialorder %v1061_v55, 0.0 }
 0xab2   :  { %v1143_v22 = vpack.c.bf16 %v1077_v19, %v1076_v16  ;;  %v1091_v23 = vsel %vm38_vm1, %v1083_v20, 0.0  ;;  %v1444_v16 = vsel %vm1442_vm15, 1, %v3347_v39 }
 0xab3   :  { %1092 = vadd.xlane.f32.xlu1 %v1091_v23  ;;  %vm1390_vm11 = vcmp.eq.s32.totalorder %v1385_v10, 1 }
 0xab4   :  { %3042 = vmatmul.mubr.msk.bf16.vlgmr.msra.gmra.mrb[40].mxu1 %vm38_vm1, %v1143_v22  ;;  %v1194_v46 = vsel %vm38_vm1, %v1143_v22, 0 }
 0xab5   :  { %3046 = vmatpush3.bf16.xpose.msra.mxu1 %v1147_v24  ;;  %3052 = vmatpush3.bf16.xpose.msra.mxu0 %v1194_v46 }
 0xab6   :  { %3047 = vmatprep.mubr.msk.bf16.mxu1 %vm3341_vm0, %v3340_v0  ;;  %3057 = vmatprep.subr.bf16.mxu1 %v3340_v0 }
 0xab7   :  { %3063 = vmatprep.subr.bf16.mxu0 %v3340_v0 }
 0xabc   :  { %3048 = vmatmul.mubr.msk.bf16.vlgmr.msra.gmra.mrb[44].mxu1 %vm38_vm1, %v3809_v44  ;;  %3054 = vmatmul.mubr.msk.bf16.vlgmr.msra.gmra.mrb[40].mxu0 %vm38_vm1, %v1145_v58 }
 0xabd   :  { %3058 = vmatpush3.bf16.msra.mxu1 %v1485_v26  ;;  %3064 = vmatpush3.bf16.msra.mxu0 %v1531_v9  ;;  %v1448_v26 = vrot.slane %v1443_v13, %v3869_v34  ;;  %v1452_v9 = vrot.slane %v1444_v16, %v3869_v34 }
 0xabe   :  { %3059 = vmatprep.mubr.msk.bf16.mxu1 %vm3341_vm0, %v3340_v0  ;;  %3065 = vmatprep.mubr.msk.bf16.mxu0 %vm3341_vm0, %v3340_v0 }
 0xabf   :  { %3069 = vmatprep.subr.bf16.mxu1 %v3340_v0  ;;  %3075 = vmatprep.subr.bf16.mxu0 %v3340_v0  ;;  %vm3922_vm4 = vcmp.eq.s32.totalorder %v1448_v26, 1  ;;  %vm3926_vm5 = vcmp.eq.s32.totalorder %v1452_v9, 1 }
 0xad8   :  { %s3184_s27 = spop %3183 }
 0xad9   :  { %v3875_v42 = vstv %s3184_s27 }
 0xb08   :  { %v3859_v31 = vpop.xlane.xlu0 %1086 }
 0xb09   :  { %v1261_v19 = vrot.slane %v3859_v31, %v3524_v29 }
 0xb0c   :  { %v3861_v32 = vpop.xlane.xlu0 %1089 }
 0xb0d   :  { %v1266_v3 = vrot.slane %v3861_v32, %v3527_v30 }
 0xb0f   :  { %v1268_v24 = vsel %vm1267_vm2, %v1266_v3, %v1261_v19 }
 0xb33   :  { %v3866_v17 = vpop.xlane.xlu0 %1103  ;;  %v1107_v49 = vpop.xlane.xlu1 %1106 }
 0xb34   :  { %v1113_v25 = vrot.slane %v3866_v17, %v3524_v29  ;;  %v1117_v14 = vrot.slane %v1107_v49, %v3524_v29 }
 0xb36   :  { %v1138_v40 = vadd.f32 %v1113_v25, %v3859_v31  ;;  %v1139_v60 = vadd.f32 %v1113_v25, %v3861_v32  ;;  %v1292_v32 = vadd.f32 %v1268_v24, %v3866_v17 }
 0xb37   :  { %v1096_v56 = vpop.xlane.xlu0 %1095 }
 0xb38   :  { %v1141_v61 = vadd.f32 %v1117_v14, %v1096_v56  ;;  %v1276_v6 = vrot.slane %v1096_v56, %v3527_v30 }
 0xb40   :  { %v1093_v35 = vpop.xlane.xlu1 %1092 }
 0xb41   :  { %v1140_v58 = vadd.f32 %v1117_v14, %v1093_v35  ;;  %v1272_v36 = vrot.slane %v1093_v35, %v3524_v29 }
 0xb43   :  { %v1277_v20 = vsel %vm1267_vm2, %v1276_v6, %v1272_v36 }
 0xb44   :  { %v1293_v33 = vadd.f32 %v1277_v20, %v1107_v49 }
 0xb76   :  { %v1186_v41 = vpop.f32.mrb[36].mxu1 }
 0xb77   :  { %v1240_v44 = vadd.f32 %v1186_v41, %v1138_v40  ;;  %v3037_v45 = vpop.f32.mrb[37].mxu1 }
 0xb78   :  { %v1189_v11 = vpop.f32.mrb[38].mxu1 }
 0xb79   :  { %v1241_v27 = vadd.f32 %v1189_v11, %v1139_v60  ;;  %v3038_v47 = vpop.f32.mrb[39].mxu1  ;;  %v1250_v4 = vadd.f32 %v3875_v42, %v1240_v44 }
 0xb7b   :  { %v1251_v7 = vadd.f32 %v3875_v42, %v1241_v27  ;;  %v3880_v37 = vsel %vm1390_vm11, %v1250_v4, -1e+30 }
 0xb7c   :  { %v1397_v18 = vsel %vm1396_vm12, %v3880_v37, -inf }
 0xb7d   :  { %1398 = vmax.xlane.f32.xlu1 %v1397_v18  ;;  %v3887_v53 = vsel %vm1390_vm11, %v1251_v7, -1e+30 }
 0xb7e   :  { %v1400_v38 = vsel %vm1396_vm12, %v3887_v53, -inf }
 0xb7f   :  { %1401 = vmax.xlane.f32.xlu0 %v1400_v38 }
 0xb87   :  { %v1233_v43 = vpop.f32.mrb[40].mxu1 }
 0xb88   :  { %v1242_v63 = vadd.f32 %v1233_v43, %v1140_v58  ;;  %v3043_v54 = vpop.f32.mrb[41].mxu1 }
 0xb89   :  { %v1236_v51 = vpop.f32.mrb[42].mxu1 }
 0xb8a   :  { %v1252_v8 = vadd.f32 %v3875_v42, %v1242_v63  ;;  %v1243_v1 = vadd.f32 %v1236_v51, %v1141_v61  ;;  %v3044_v5 = vpop.f32.mrb[43].mxu1 }
 0xb8c   :  { %v1253_v22 = vadd.f32 %v3875_v42, %v1243_v1  ;;  %v1394_v23 = vsel %vm3903_vm3, %v1252_v8, -1e+30 }
 0xb8d   :  { %v1403_v46 = vsel %vm1396_vm12, %v1394_v23, -inf }
 0xb8e   :  { %1404 = vmax.xlane.f32.xlu1 %v1403_v46  ;;  %v1395_v31 = vsel %vm3903_vm3, %v1253_v22, -1e+30 }
 0xb8f   :  { %v1328_v25 = vpop.f32.mrb[44].mxu1  ;;  %v1368_v39 = vpop.f32.mrb[40].mxu0  ;;  %v1406_v2 = vsel %vm1396_vm12, %v1395_v31, -inf }
 0xb90   :  { %v1374_v10 = vadd.f32 %v1328_v25, %v1292_v32  ;;  %v1375_v40 = vadd.f32 %v1368_v39, %v1293_v33  ;;  %v3049_v41 = vpop.f32.mrb[45].mxu1  ;;  %1407 = vmax.xlane.f32.xlu0 %v1406_v2  ;;  %v3055_v44 = vpop.f32.mrb[41].mxu0 }
 0xb91   :  { %v1331_v45 = vpop.f32.mrb[46].mxu1  ;;  %v1371_v60 = vpop.f32.mrb[42].mxu0 }
 0xb92   :  { %v1376_v27 = vadd.f32 %v1374_v10, %v3875_v42  ;;  %v1377_v47 = vadd.f32 %v1375_v40, %v3875_v42  ;;  %v3050_v4 = vpop.f32.mrb[47].mxu1  ;;  %v3056_v7 = vpop.f32.mrb[43].mxu0 }
 0xb94   :  { %v1455_v18 = vsel %vm3922_vm4, %v1376_v27, -1e+30  ;;  %v1456_v48 = vsel %vm3926_vm5, %v1377_v47, -1e+30 }
 0xb95   :  { %v1458_v38 = vsel %vm1457_vm6, %v1455_v18, -inf  ;;  %v1461_v49 = vsel %vm1457_vm6, %v1456_v48, -inf }
 0xb96   :  { %1459 = vmax.xlane.f32.xlu1 %v1458_v38  ;;  %1462 = vmax.xlane.f32.xlu0 %v1461_v49 }
 0xc0a   :  { %v1399_v52 = vpop.xlane.xlu1 %1398 }
 0xc0b   :  { %v1409_v35 = vsub.f32 %v3880_v37, %v1399_v52 }
 0xc0c   :  { %v1402_v14 = vpop.xlane.xlu0 %1401 }
 0xc0d   :  { %v1413_v42 = vmul.f32 1.442695, %v1409_v35  ;;  %v1410_v21 = vsub.f32 %v3887_v53, %v1402_v14  ;;  %v1666_v35 = vpack.c.bf16 %v3803_v28, %v3801_v12  ;;  %v1667_v14 = vpack.c.bf16 %v3821_v59, %v3834_v15 }
 0xc0f   :  { %3276 = vpow2.f32 %v1413_v42  ;;  %v1415_v55 = vmul.f32 1.442695, %v1410_v21 }
 0xc11   :  { %3278 = vpow2.f32 %v1415_v55 }
 0xc19   :  { %v3277_v56 = vpop.eup %3276 }
 0xc1a   :  { %v1421_v57 = vsel %vm1396_vm12, %v3277_v56, 0.0 }
 0xc1b   :  { %v3279_v58 = vpop.eup %3278  ;;  %1422 = vadd.xlane.f32.xlu1 %v1421_v57  ;;  %v1405_v36 = vpop.xlane.xlu1 %1404 }
 0xc1c   :  { %v1411_v43 = vsub.f32 %v1394_v23, %v1405_v36  ;;  %v1424_v61 = vsel %vm1396_vm12, %v3279_v58, 0.0 }
 0xc1d   :  { %v1408_v63 = vpop.xlane.xlu0 %1407  ;;  %1425 = vadd.xlane.f32.xlu0 %v1424_v61 }
 0xc1e   :  { %v1417_v54 = vmul.f32 1.442695, %v1411_v43  ;;  %v1412_v37 = vsub.f32 %v1395_v31, %v1408_v63 }
 0xc20   :  { %3280 = vpow2.f32 %v1417_v54  ;;  %v1419_v3 = vmul.f32 1.442695, %v1412_v37 }
 0xc22   :  { %3282 = vpow2.f32 %v1419_v3 }
 0xc23   :  { %v1460_v53 = vpop.xlane.xlu1 %1459  ;;  %v1463_v6 = vpop.xlane.xlu0 %1462 }
 0xc24   :  { %v1464_v51 = vsub.f32 %v1455_v18, %v1460_v53  ;;  %v1465_v50 = vsub.f32 %v1456_v48, %v1463_v6 }
 0xc26   :  { %v1466_v8 = vmul.f32 1.442695, %v1464_v51  ;;  %v1468_v1 = vmul.f32 1.442695, %v1465_v50 }
 0xc28   :  { %3284 = vpow2.f32 %v1466_v8 }
 0xc29   :  { %3286 = vpow2.f32 %v1468_v1 }
 0xc2a   :  { %v3281_v5 = vpop.eup %3280 }
 0xc2b   :  { %v1427_v13 = vsel %vm1396_vm12, %v3281_v5, 0.0 }
 0xc2c   :  { %v3283_v16 = vpop.eup %3282  ;;  %1428 = vadd.xlane.f32.xlu1 %v1427_v13 }
 0xc2d   :  { %v1430_v19 = vsel %vm1396_vm12, %v3283_v16, 0.0 }
 0xc2e   :  { %1431 = vadd.xlane.f32.xlu0 %v1430_v19 }
 0xc32   :  { %v3285_v20 = vpop.eup %3284 }
 0xc33   :  { %v3287_v22 = vpop.eup %3286  ;;  %v1470_v23 = vsel %vm1457_vm6, %v3285_v20, 0.0 }
 0xc34   :  { %1471 = vadd.xlane.f32.xlu1 %v1470_v23  ;;  %v1473_v24 = vsel %vm1457_vm6, %v3287_v22, 0.0 }
 0xc35   :  { %1474 = vadd.xlane.f32.xlu0 %v1473_v24  ;;  %v1825_v24 = vld [vmem:[%s4275_s2 + $0xa0] sm:$0xff] }
 0xca8   :  { %v1423_v46 = vpop.xlane.xlu1 %1422 }
 0xca9   :  { %3288 = vrcp.f32 %v1423_v46  ;;  %v1826_v46 = vld [vmem:[%s4275_s2 + $0xa8] sm:$0xff] }
 0xcaa   :  { %v1426_v26 = vpop.xlane.xlu0 %1425 }
 0xcab   :  { %3290 = vrcp.f32 %v1426_v26  ;;  %v1827_v26 = vld [vmem:[%s4275_s2 + $0xb0] sm:$0xff] }
 0xcb3   :  { %v3289_v9 = vpop.eup %3288 }
 0xcb4   :  { %v1437_v33 = vmul.f32 %v3289_v9, %v3277_v56  ;;  %v1843_v9 = vpack.c.bf16 %v1826_v46, %v1825_v24 }
 0xcb5   :  { %v3291_v32 = vpop.eup %3290 }
 0xcb6   :  { %v1438_v31 = vmul.f32 %v3291_v32, %v3279_v58  ;;  %v1828_v32 = vld [vmem:[%s4275_s2 + $0xb8] sm:$0xff] }
 0xcb8   :  { %v1480_v25 = vpack.c.bf16 %v1438_v31, %v1437_v33  ;;  %v1844_v33 = vpack.c.bf16 %v1828_v32, %v1827_v26  ;;  %v1829_v31 = vld [vmem:[%s4275_s2 + $0xc0] sm:$0xff] }
 0xcb9   :  { %v1429_v39 = vpop.xlane.xlu1 %1428 }
 0xcba   :  { %3292 = vrcp.f32 %v1429_v39  ;;  %3060 = vmatmul.mubr.msk.bf16.vlgmr.msra.gmra.mrb[48].mxu1 %vm1396_vm12, %v1480_v25 }
 0xcbb   :  { %v1432_v2 = vpop.xlane.xlu0 %1431  ;;  %3071 = vmatprep.mubr.msk.bf16.mxu1 %vm3341_vm0, %v3340_v0 }
 0xcbc   :  { %3294 = vrcp.f32 %v1432_v2  ;;  %v1831_v2 = vld [vmem:[%s4275_s2 + $0xd0] sm:$0xff] }
 0xcc1   :  { %v1472_v10 = vpop.xlane.xlu1 %1471 }
 0xcc2   :  { %3296 = vrcp.f32 %v1472_v10  ;;  %v1475_v40 = vpop.xlane.xlu0 %1474  ;;  %v1832_v10 = vld [vmem:[%s4275_s2 + $0xd8] sm:$0xff] }
 0xcc3   :  { %3298 = vrcp.f32 %v1475_v40  ;;  %v1846_v40 = vpack.c.bf16 %v1832_v10, %v1831_v2 }
 0xcc4   :  { %v3293_v41 = vpop.eup %3292 }
 0xcc5   :  { %v1439_v45 = vmul.f32 %v3293_v41, %v3281_v5  ;;  %v1833_v41 = vld [vmem:[%s4275_s2 + $0xe0] sm:$0xff] }
 0xcc6   :  { %v3295_v44 = vpop.eup %3294 }
 0xcc7   :  { %v1440_v60 = vmul.f32 %v3295_v44, %v3283_v16  ;;  %v1834_v44 = vld [vmem:[%s4275_s2 + $0xe8] sm:$0xff] }
 0xcc9   :  { %v1481_v27 = vpack.c.bf16 %v1440_v60, %v1439_v45  ;;  %v1847_v45 = vpack.c.bf16 %v1834_v44, %v1833_v41  ;;  %v1835_v60 = vld [vmem:[%s4275_s2 + $0xf0] sm:$0xff]  ;;  %v1910_v44 = vld [vmem:[%s4275_s2 + $0x68] sm:$0xff] }
 0xccb   :  { %3066 = vmatmul.mubr.msk.bf16.vlgmr.msra.gmra.mrb[44].mxu0 %vm1396_vm12, %v1481_v27 }
 0xccc   :  { %v3297_v47 = vpop.eup %3296  ;;  %3077 = vmatprep.mubr.msk.bf16.mxu0 %vm3341_vm0, %v3340_v0 }
 0xccd   :  { %v3299_v4 = vpop.eup %3298  ;;  %v1478_v7 = vmul.f32 %v3297_v47, %v3285_v20 }
 0xcce   :  { %v1479_v18 = vmul.f32 %v3299_v4, %v3287_v22  ;;  %v1837_v4 = vld [vmem:[%s4275_s2 + $0x100] sm:$0xff] }
 0xccf   :  { %v1574_v48 = vpack.c.bf16 %v1478_v7, %v1478_v7  ;;  %v1838_v7 = vld [vmem:[%s4275_s2 + $0x108] sm:$0xff] }
 0xcd0   :  { %v1575_v38 = vpack.c.bf16 %v1479_v18, %v1479_v18  ;;  %v1849_v18 = vpack.c.bf16 %v1838_v7, %v1837_v4 }
 0xcd1   :  { %v1577_v49 = vsel %vm458_vm8, %v1574_v48, 0  ;;  %v1839_v48 = vld [vmem:[%s4275_s2 + $0x110] sm:$0xff] }
 0xcd2   :  { %3070 = vmatpush3.bf16.msra.mxu1 %v1577_v49  ;;  %v1621_v52 = vsel %vm458_vm8, %v1575_v38, 0  ;;  %v1840_v38 = vld [vmem:[%s4275_s2 + $0x118] sm:$0xff] }
 0xcd3   :  { %3076 = vmatpush3.bf16.msra.mxu0 %v1621_v52  ;;  %3081 = vmatprep.subr.bf16.mxu1 %v3340_v0  ;;  %v1850_v49 = vpack.c.bf16 %v1840_v38, %v1839_v48 }
 0xcd4   :  { %3087 = vmatprep.subr.bf16.mxu0 %v3340_v0 }
 0xcd5   :  { %3072 = vmatmul.mubr.msk.bf16.vlgmr.msra.gmra.mrb[52].mxu1 %vm1396_vm12, %v1480_v25  ;;  %v1830_v25 = vld [vmem:[%s4275_s2 + $0xc8] sm:$0xff] }
 0xcd6   :  { %3078 = vmatmul.mubr.msk.bf16.vlgmr.msra.gmra.mrb[48].mxu0 %vm1396_vm12, %v1481_v27  ;;  %3082 = vmatpush3.bf16.msra.mxu1 %v1666_v35  ;;  %v1845_v39 = vpack.c.bf16 %v1830_v25, %v1829_v31  ;;  %v1836_v27 = vld [vmem:[%s4275_s2 + $0xf8] sm:$0xff] }
 0xcd7   :  { %3088 = vmatpush3.bf16.msra.mxu0 %v1667_v14  ;;  %3083 = vmatprep.mubr.msk.bf16.mxu1 %vm3341_vm0, %v3340_v0  ;;  %v1848_v47 = vpack.c.bf16 %v1836_v27, %v1835_v60  ;;  %v1911_v60 = vld [vmem:[%s4275_s2 + $0x70] sm:$0xff]  ;;  %v1912_v27 = vld [vmem:[%s4275_s2 + $0x78] sm:$0xff] }
 0xcd8   :  { %3089 = vmatprep.mubr.msk.bf16.mxu0 %vm3341_vm0, %v3340_v0  ;;  %3093 = vmatprep.subr.bf16.mxu1 %v1843_v9 }
 0xd8d   :  { %v1521_v42 = vpop.f32.mrb[48].mxu1 }
 0xd8e   :  { %v3061_v21 = vpop.f32.mrb[49].mxu1  ;;  %v1756_v56 = vmul.f32 %v1521_v42, %v3801_v12 }
 0xd8f   :  { %v1524_v55 = vpop.f32.mrb[50].mxu1 }
 0xd90   :  { %v3198_v57 = vpack.i.bf16 %v1524_v55, %v1521_v42  ;;  %v1757_v58 = vmul.f32 %v1524_v55, %v3803_v28  ;;  %v3062_v36 = vpop.f32.mrb[51].mxu1 }
 0xd92   :  { %v3203_v43 = vpack.i.bf16 %v1757_v58, %v1756_v56  ;;  %3199 = vrot.lane.b32.xlu1 %v3198_v57, %s3342_s25 }
 0xd96   :  { %3204 = vrot.lane.b32.xlu1 %v3203_v43, %s3345_s22 }
 0xd9e   :  { %v1567_v61 = vpop.f32.mrb[44].mxu0 }
 0xd9f   :  { %v3067_v63 = vpop.f32.mrb[45].mxu0  ;;  %v1758_v37 = vmul.f32 %v1567_v61, %v3834_v15 }
 0xda0   :  { %v1570_v54 = vpop.f32.mrb[46].mxu0 }
 0xda1   :  { %v3208_v3 = vpack.i.bf16 %v1570_v54, %v1567_v61  ;;  %v1759_v53 = vmul.f32 %v1570_v54, %v3821_v59  ;;  %v3068_v6 = vpop.f32.mrb[47].mxu0 }
 0xda3   :  { %v3213_v51 = vpack.i.bf16 %v1759_v53, %v1758_v37  ;;  %3209 = vrot.lane.b32.xlu0 %v3208_v3, %s3342_s25 }
 0xda5   :  { %3214 = vrot.lane.b32.xlu1 %v3213_v51, %s3345_s22 }
 0xda8   :  { %v1613_v50 = vpop.f32.mrb[52].mxu1 }
 0xda9   :  { %v1657_v8 = vpop.f32.mrb[48].mxu0  ;;  %v3073_v1 = vpop.f32.mrb[53].mxu1 }
 0xdaa   :  { %v3079_v5 = vpop.f32.mrb[49].mxu0  ;;  %v1616_v13 = vpop.f32.mrb[54].mxu1 }
 0xdab   :  { %v1664_v16 = vpack.c.bf16 %v1616_v13, %v1613_v50  ;;  %v1660_v19 = vpop.f32.mrb[50].mxu0  ;;  %v3074_v20 = vpop.f32.mrb[55].mxu1 }
 0xdac   :  { %v1665_v22 = vpack.c.bf16 %v1660_v19, %v1657_v8  ;;  %v3080_v23 = vpop.f32.mrb[51].mxu0 }
 0xdad   :  { %3084 = vmatmul.mubr.msk.bf16.vlgmr.msra.gmra.mrb[56].mxu1 %vm1457_vm6, %v1664_v16 }
 0xdae   :  { %3090 = vmatmul.mubr.msk.bf16.vlgmr.msra.gmra.mrb[52].mxu0 %vm1457_vm6, %v1665_v22  ;;  %3094 = vmatpush3.bf16.msra.mxu1 %v1843_v9 }
 0xdaf   :  { %3095 = vmatprep.subr.bf16.mxu1 %v1844_v33 }
 0xdb2   :  { %3096 = vmatpush3.bf16.msra.mxu1 %v1844_v33 }
 0xdb3   :  { %3097 = vmatprep.subr.bf16.mxu1 %v1845_v39 }
 0xdb6   :  { %3098 = vmatpush3.bf16.msra.mxu1 %v1845_v39 }
 0xdb7   :  { %3099 = vmatprep.subr.bf16.mxu1 %v1846_v40 }
 0xdba   :  { %3100 = vmatpush3.bf16.msra.mxu1 %v1846_v40 }
 0xdbb   :  { %3101 = vmatprep.subr.bf16.mxu1 %v1847_v45 }
 0xdbe   :  { %3102 = vmatpush3.bf16.msra.mxu1 %v1847_v45 }
 0xdbf   :  { %3103 = vmatprep.subr.bf16.mxu1 %v1848_v47 }
 0xdc2   :  { %3104 = vmatpush3.bf16.msra.mxu1 %v1848_v47  ;;  %v4063_v47 = vpack.c.bf16 %v1912_v27, %v1911_v60 }
 0xdc3   :  { %3105 = vmatprep.subr.bf16.mxu1 %v1849_v18 }
 0xdc6   :  { %3106 = vmatpush3.bf16.msra.mxu1 %v1849_v18 }
 0xdc7   :  { %3107 = vmatprep.subr.bf16.mxu1 %v1850_v49 }
 0xdca   :  { %3108 = vmatpush3.bf16.msra.mxu1 %v1850_v49 }
 0xdcb   :  { %3139 = vmatprep.subr.bf16.mxu1 %v3340_v0 }
 0xe04   :  { %v3200_v37 = vpop.permute.xlu1 %3199 }
 0xe05   :  { %v3202_v8 = vunpack.i.h.bf16 %v3200_v37  ;;  %v3201_v1 = vunpack.i.l.bf16 %v3200_v37 }
 0xe07   :  { %v1812_v24 = vsel %vm38_vm1, %v3801_v12, %v3201_v1 }
 0xe08   :  { %v3205_v3 = vpop.permute.xlu1 %3204 }
 0xe09   :  { %v3207_v5 = vunpack.i.h.bf16 %v3205_v3  ;;  %v3206_v13 = vunpack.i.l.bf16 %v3205_v3 }
 0xe0b   :  { %v1816_v33 = vsel %vm890_vm9, %v1812_v24, %v3206_v13 }
 0xe15   :  { %v3210_v53 = vpop.permute.xlu0 %3209 }
 0xe16   :  { %v3212_v6 = vunpack.i.h.bf16 %v3210_v53  ;;  %v3211_v51 = vunpack.i.l.bf16 %v3210_v53 }
 0xe17   :  { %v3215_v50 = vpop.permute.xlu1 %3214 }
 0xe18   :  { %v3217_v16 = vunpack.i.h.bf16 %v3215_v50  ;;  %v3216_v19 = vunpack.i.l.bf16 %v3215_v50  ;;  %v1815_v20 = vsel %vm38_vm1, %v3821_v59, %v3212_v6  ;;  %v1814_v22 = vsel %vm38_vm1, %v3834_v15, %v3211_v51 }
 0xe1a   :  { %v1819_v25 = vsel %vm890_vm9, %v1815_v20, %v3217_v16 }
 0xe80   :  { %v1705_v52 = vpop.f32.mrb[56].mxu1 }
 0xe81   :  { %v1749_v35 = vpop.f32.mrb[52].mxu0  ;;  %v3085_v14 = vpop.f32.mrb[57].mxu1  ;;  %v1760_v55 = vmul.f32 %v1705_v52, %v3801_v12  ;;  %v1909_v12 = vld [vmem:[%s4275_s2 + $0x60] sm:$0xff] }
 0xe82   :  { %v3091_v42 = vpop.f32.mrb[53].mxu0  ;;  %v1708_v21 = vpop.f32.mrb[58].mxu1  ;;  %v1762_v36 = vmul.f32 %v1749_v35, %v3834_v15  ;;  %v1818_v15 = vsel %vm890_vm9, %v1814_v22, %v3216_v19  ;;  %v4053_v45 = vpack.c.bf16 %v1910_v44, %v1909_v12 }
 0xe83   :  { %v1761_v56 = vmul.f32 %v1708_v21, %v3803_v28  ;;  %v1752_v57 = vpop.f32.mrb[54].mxu0  ;;  %v3086_v58 = vpop.f32.mrb[59].mxu1 }
 0xe84   :  { %v1763_v43 = vmul.f32 %v1752_v57, %v3821_v59  ;;  %v3092_v61 = vpop.f32.mrb[55].mxu0  ;;  %3113 = vmatprep.subr.bf16.mxu0 %v4053_v45 }
 0xe85   :  { %v3218_v63 = vpack.i.bf16 %v1761_v56, %v1760_v55  ;;  %3114 = vmatpush3.bf16.msra.mxu0 %v4053_v45  ;;  %v4087_v56 = vld [vmem:[%s4277_s3 + $0x4] ss:$0 sm:$0xff] }
 0xe86   :  { %v3223_v54 = vpack.i.bf16 %v1763_v43, %v1762_v36  ;;  %3115 = vmatprep.subr.bf16.mxu0 %v4063_v47 }
 0xe87   :  { %3219 = vrot.lane.b32.xlu0 %v3218_v63, %s3343_s21 }
 0xe88   :  { %3224 = vrot.lane.b32.xlu1 %v3223_v54, %s3343_s21 }
 0xe89   :  { %3116 = vmatpush3.bf16.msra.mxu0 %v4063_v47 }
 0xe8a   :  { %3121 = vmatprep.subr.bf16.mxu0 %v3340_v0 }
 0xe8b   :  { %1857 = vrot.lane.b32.xlu0 %v3746_v62, %s3342_s25  ;;  %v1813_v62 = vsel %vm38_vm1, %v3803_v28, %v3202_v8 }
 0xe8c   :  { %v1817_v32 = vsel %vm890_vm9, %v1813_v62, %v3207_v5 }
 0xef9   :  { %v3220_v23 = vpop.permute.xlu0 %3219 }
 0xefa   :  { %v3222_v46 = vunpack.i.h.bf16 %v3220_v23  ;;  %v3221_v26 = vunpack.i.l.bf16 %v3220_v23  ;;  %v3225_v9 = vpop.permute.xlu1 %3224 }
 0xefb   :  { %v3227_v31 = vunpack.i.h.bf16 %v3225_v9  ;;  %v3226_v59 = vunpack.i.l.bf16 %v3225_v9 }
 0xefc   :  { %v1821_v39 = vsel %vm1820_vm7, %v1816_v33, %v3221_v26  ;;  %v1822_v2 = vsel %vm1820_vm7, %v1817_v32, %v3222_v46 }
 0xefd   :  { %v1824_v10 = vsel %vm1820_vm7, %v1819_v25, %v3227_v31  ;;  %v1823_v28 = vsel %vm1820_vm7, %v1818_v15, %v3226_v59  ;;  %v1841_v40 = vpack.c.bf16 %v1822_v2, %v1821_v39  ;;  %v1858_v7 = vpop.permute.xlu0 %1857 }
 0xefe   :  { %v1842_v41 = vpack.c.bf16 %v1824_v10, %v1823_v28 }
 0xeff   :  { %3109 = vmatprep.mubr.bf16.mxu1 %v1841_v40 }
 0xf00   :  { %3110 = vmatmul.mubr.bf16.vlgmr.msra.gmra.mrb[60].mxu1 %v1842_v41 }
 0xf01   :  { %3141 = vmatprep.mubr.msk.bf16.mxu1 %vm3341_vm0, %v3340_v0 }
 0xfd3   :  { %v3111_v4 = vpop.f32.mrb[60].mxu1 }
 0xfd4   :  { %v1894_v18 = vpop.f32.mrb[61].mxu1  ;;  %v4074_v14 = vadd.f32 %v3111_v4, %v1858_v7 }
 0xfd5   :  { %v3112_v48 = vpop.f32.mrb[62].mxu1  ;;  %v4070_v52 = vadd.f32 %v1894_v18, %v1858_v7 }
 0xfd6   :  { %v4068_v38 = vadd.f32 %v3112_v48, %v1858_v7  ;;  %v1897_v49 = vpop.f32.mrb[63].mxu1 }
 0xfd7   :  { %v4072_v35 = vadd.f32 %v1897_v49, %v1858_v7 }
 0xfd8   :  { %v1914_v21 = vpack.c.bf16 %v4068_v38, %v4074_v14 }
 0xfd9   :  { %v1913_v42 = vpack.c.bf16 %v4072_v35, %v4070_v52 }
 0xfdb   :  { %3117 = vmatprep.mubr.msk.bf16.mxu0 %vm38_vm1, %v1913_v42 }
 0xfdc   :  { %3118 = vmatmul.mubr.msk.bf16.vlgmr.msra.gmra.mrb[56].mxu0 %vm38_vm1, %v1914_v21 }
 0xfdd   :  { %3123 = vmatprep.mubr.msk.bf16.mxu0 %vm3341_vm0, %v3340_v0 }
0x10af   :  { %v3119_v55 = vpop.f32.mrb[56].mxu0 }
0x10b0   :  { %v1962_v57 = vpop.f32.mrb[57].mxu0  ;;  %v1971_v36 = vadd.f32 %v3119_v55, %v4087_v56 }
0x10b1   :  { %v3120_v58 = vpop.f32.mrb[58].mxu0  ;;  %v1963_v63 = vadd.f32 %v4087_v56, %v1962_v57 }
0x10b2   :  { %v1974_v43 = vadd.f32 %v3120_v58, %v4087_v56  ;;  %v1965_v61 = vpop.f32.mrb[59].mxu0 }
0x10b3   :  { %v1966_v54 = vadd.f32 %v4087_v56, %v1965_v61 }
0x10b4   :  { %v4093_v37 = vpack.c.bf16 %v1974_v43, %v1971_v36 }
0x10b5   :  { %v4095_v3 = vpack.c.bf16 %v1966_v54, %v1963_v63 }
0x10b6   :  { %2030 = vrot.lane.b32.xlu0 %v4093_v37, %s3343_s21 }
0x10b7   :  { %1980 = vrot.lane.b32.xlu1 %v4095_v3, %s3343_s21 }
0x1128   :  { %v2031_v51 = vpop.permute.xlu0 %2030 }
0x1129   :  { %v1981_v53 = vpop.permute.xlu1 %1980  ;;  %v2036_v50 = vsel %vm38_vm1, %v2031_v51, 0 }
0x112a   :  { %v1986_v6 = vsel %vm38_vm1, %v1981_v53, 0 }
0x112b   :  { %3122 = vmatpush3.bf16.xpose.msra.mxu0 %v1986_v6 }
0x112c   :  { %3127 = vmatprep.subr.bf16.mxu0 %v3340_v0 }
0x1132   :  { %3124 = vmatmul.mubr.msk.bf16.vlgmr.msra.gmra.mrb[60].mxu0 %vm38_vm1, %v4095_v3 }
0x1133   :  { %3128 = vmatpush3.bf16.xpose.msra.mxu0 %v2036_v50  ;;  %3129 = vmatprep.mubr.msk.bf16.mxu0 %vm3341_vm0, %v3340_v0 }
0x1134   :  { %3133 = vmatprep.subr.bf16.mxu0 %v3340_v0 }
0x113a   :  { %3130 = vmatmul.mubr.msk.bf16.vlgmr.msra.gmra.mrb[64].mxu0 %vm38_vm1, %v4093_v37 }
0x113b   :  { %3135 = vmatprep.mubr.msk.bf16.mxu0 %vm3341_vm0, %v3340_v0  ;;  %vm2722_vm0 = vcmask 1040384  }
0x1205   :  { %v2022_v8 = vpop.f32.mrb[60].mxu0 }
0x1206   :  { %v2079_v1 = vmul.f32 0.17677669, %v2022_v8  ;;  %v3125_v5 = vpop.f32.mrb[61].mxu0 }
0x1207   :  { %v2025_v13 = vpop.f32.mrb[62].mxu0 }
0x1208   :  { %v2080_v16 = vmul.f32 0.17677669, %v2025_v13  ;;  %v3126_v19 = vpop.f32.mrb[63].mxu0  ;;  %v2083_v20 = vsel %vm1457_vm6, %v2079_v1, -inf }
0x1209   :  { %2084 = vmax.xlane.f32.xlu1 %v2083_v20 }
0x120a   :  { %v2086_v22 = vsel %vm1457_vm6, %v2080_v16, -inf }
0x120b   :  { %2087 = vmax.xlane.f32.xlu0 %v2086_v22 }
0x120d   :  { %v2072_v23 = vpop.f32.mrb[64].mxu0 }
0x120e   :  { %v2081_v62 = vmul.f32 0.17677669, %v2072_v23  ;;  %v3131_v24 = vpop.f32.mrb[65].mxu0 }
0x120f   :  { %v2075_v46 = vpop.f32.mrb[66].mxu0 }
0x1210   :  { %v2082_v26 = vmul.f32 0.17677669, %v2075_v46  ;;  %v3132_v9 = vpop.f32.mrb[67].mxu0  ;;  %v2089_v0 = vsel %vm1457_vm6, %v2081_v62, -inf }
0x1211   :  { %2090 = vmax.xlane.f32.xlu0 %v2089_v0 }
0x1212   :  { %v2092_v32 = vsel %vm1457_vm6, %v2082_v26, -inf }
0x1213   :  { %2093 = vmax.xlane.f32.xlu1 %v2092_v32 }
0x1296   :  { %v2085_v33 = vpop.xlane.xlu1 %2084 }
0x1297   :  { %v2095_v31 = vsub.f32 %v2079_v1, %v2085_v33 }
0x1298   :  { %v2088_v59 = vpop.xlane.xlu0 %2087 }
0x1299   :  { %v2099_v25 = vmul.f32 1.442695, %v2095_v31  ;;  %v2096_v15 = vsub.f32 %v2080_v16, %v2088_v59 }
0x129b   :  { %3300 = vpow2.f32 %v2099_v25  ;;  %v2101_v39 = vmul.f32 1.442695, %v2096_v15 }
0x129d   :  { %3302 = vpow2.f32 %v2101_v39 }
0x129e   :  { %v2091_v2 = vpop.xlane.xlu0 %2090 }
0x129f   :  { %v2097_v10 = vsub.f32 %v2081_v62, %v2091_v2 }
0x12a0   :  { %v2094_v28 = vpop.xlane.xlu1 %2093 }
0x12a1   :  { %v2103_v40 = vmul.f32 1.442695, %v2097_v10  ;;  %v2098_v41 = vsub.f32 %v2082_v26, %v2094_v28 }
0x12a3   :  { %3304 = vpow2.f32 %v2103_v40  ;;  %v2105_v12 = vmul.f32 1.442695, %v2098_v41 }
0x12a5   :  { %v3301_v44 = vpop.eup %3300  ;;  %3306 = vpow2.f32 %v2105_v12 }
0x12a6   :  { %v2107_v60 = vsel %vm1457_vm6, %v3301_v44, 0.0 }
0x12a7   :  { %v3303_v27 = vpop.eup %3302  ;;  %2108 = vadd.xlane.f32.xlu0 %v2107_v60 }
0x12a8   :  { %v2110_v4 = vsel %vm1457_vm6, %v3303_v27, 0.0 }
0x12a9   :  { %2111 = vadd.xlane.f32.xlu1 %v2110_v4 }
0x12ad   :  { %v3305_v7 = vpop.eup %3304 }
0x12ae   :  { %v2113_v18 = vsel %vm1457_vm6, %v3305_v7, 0.0 }
0x12af   :  { %v3307_v48 = vpop.eup %3306  ;;  %2114 = vadd.xlane.f32.xlu0 %v2113_v18 }
0x12b0   :  { %v2116_v49 = vsel %vm1457_vm6, %v3307_v48, 0.0 }
0x12b1   :  { %2117 = vadd.xlane.f32.xlu1 %v2116_v49 }
0x12c2   :  { %2176 = vrot.lane.b32.xlu1 %v4093_v37, %s3345_s22 }
0x12c5   :  { %2129 = vrot.lane.b32.xlu0 %v4095_v3, %s3345_s22 }
0x12c6   :  { %2238 = vrot.lane.b32.xlu1 %v4053_v45, %s3342_s25 }
0x12c9   :  { %2240 = vrot.lane.b32.xlu0 %v4063_v47, %s3342_s25 }
0x12ca   :  { %2245 = vrot.lane.b32.xlu1 %v4087_v56, %s3342_s25 }
0x1334   :  { %v2109_v42 = vpop.xlane.xlu0 %2108 }
0x1335   :  { %3308 = vrcp.f32 %v2109_v42 }
0x1336   :  { %v2112_v21 = vpop.xlane.xlu1 %2111 }
0x1337   :  { %3310 = vrcp.f32 %v2112_v21 }
0x133c   :  { %v2115_v55 = vpop.xlane.xlu0 %2114 }
0x133d   :  { %3312 = vrcp.f32 %v2115_v55 }
0x133e   :  { %v2118_v57 = vpop.xlane.xlu1 %2117 }
0x133f   :  { %v3309_v58 = vpop.eup %3308  ;;  %3314 = vrcp.f32 %v2118_v57 }
0x1340   :  { %v2130_v36 = vpop.permute.xlu0 %2129  ;;  %v2123_v61 = vmul.f32 %v3309_v58, %v3301_v44 }
0x1341   :  { %v3311_v43 = vpop.eup %3310  ;;  %3134 = vmatpush3.bf16.msra.mxu0 %v2130_v36 }
0x1342   :  { %v2124_v45 = vmul.f32 %v3311_v43, %v3303_v27  ;;  %v2177_v63 = vpop.permute.xlu1 %2176  ;;  %v2376_v43 = vld [vmem:[%s4275_s2 + $0x80] sm:$0xff] }
0x1343   :  { %3140 = vmatpush3.bf16.msra.mxu1 %v2177_v63  ;;  %v2378_v63 = vld [vmem:[%s4275_s2 + $0x90] sm:$0xff] }
0x1344   :  { %v2127_v47 = vpack.c.bf16 %v2124_v45, %v2123_v61  ;;  %v2241_v51 = vpop.permute.xlu0 %2240  ;;  %v2377_v61 = vld [vmem:[%s4275_s2 + $0x88] sm:$0xff] }
0x1345   :  { %v2382_v45 = vpack.c.bf16 %v2377_v61, %v2376_v43 }
0x1346   :  { %3136 = vmatmul.mubr.msk.bf16.vlgmr.msra.gmra.mrb[68].mxu0 %vm1457_vm6, %v2127_v47  ;;  %v2239_v6 = vpop.permute.xlu1 %2238  ;;  %v2379_v47 = vld [vmem:[%s4275_s2 + $0x98] sm:$0xff] }
0x1347   :  { %v3313_v56 = vpop.eup %3312  ;;  %3145 = vmatprep.subr.bf16.mxu0 %v2239_v6 }
0x1348   :  { %v2125_v37 = vmul.f32 %v3313_v56, %v3305_v7  ;;  %3146 = vmatpush3.bf16.msra.mxu0 %v2239_v6  ;;  %v2383_v56 = vpack.c.bf16 %v2379_v47, %v2378_v63 }
0x1349   :  { %v3315_v54 = vpop.eup %3314  ;;  %3147 = vmatprep.subr.bf16.mxu0 %v2241_v51 }
0x134a   :  { %v2126_v3 = vmul.f32 %v3315_v54, %v3307_v48  ;;  %v2246_v62 = vpop.permute.xlu1 %2245  ;;  %v2812_v54 = vld [vmem:[%s4277_s3 + $0x5] ss:$0 sm:$0xff] }
0x134c   :  { %v2128_v53 = vpack.c.bf16 %v2126_v3, %v2125_v37  ;;  %3148 = vmatpush3.bf16.msra.mxu0 %v2241_v51  ;;  %v2454_v37 = vld [vmem:[%s4275_s2] sm:$0xff]  ;;  %v2455_v3 = vld [vmem:[%s4275_s2 + $0x8] sm:$0xff]  ;;  %v2457_v51 = vld [vmem:[%s4275_s2 + $0x18] sm:$0xff] }
0x134d   :  { %v2464_v6 = vpack.c.bf16 %v2455_v3, %v2454_v37 }
0x134e   :  { %3142 = vmatmul.mubr.msk.bf16.vlgmr.msra.gmra.mrb[64].mxu1 %vm1457_vm6, %v2128_v53  ;;  %v2456_v53 = vld [vmem:[%s4275_s2 + $0x10] sm:$0xff] }
0x1419   :  { %v2169_v50 = vpop.f32.mrb[68].mxu0 }
0x141a   :  { %v3137_v8 = vpop.f32.mrb[69].mxu0 }
0x141b   :  { %v2172_v1 = vpop.f32.mrb[70].mxu0  ;;  %v2459_v8 = vld [vmem:[%s4275_s2 + $0x28] sm:$0xff] }
0x141c   :  { %v2227_v5 = vpack.c.bf16 %v2172_v1, %v2169_v50  ;;  %v3138_v13 = vpop.f32.mrb[71].mxu0  ;;  %v2458_v50 = vld [vmem:[%s4275_s2 + $0x20] sm:$0xff]  ;;  %v2465_v1 = vpack.c.bf16 %v2457_v51, %v2456_v53 }
0x141d   :  { %v2460_v13 = vld [vmem:[%s4275_s2 + $0x30] sm:$0xff] }
0x141e   :  { %3149 = vmatprep.mubr.msk.bf16.mxu0 %vm38_vm1, %v2227_v5  ;;  %v2466_v5 = vpack.c.bf16 %v2459_v8, %v2458_v50  ;;  %v2815_v50 = vld [vmem:[%s4277_s3 + $0x6] ss:$0 sm:$0xff] }
0x1421   :  { %v2216_v16 = vpop.f32.mrb[64].mxu1 }
0x1422   :  { %v3143_v19 = vpop.f32.mrb[65].mxu1 }
0x1423   :  { %v2219_v20 = vpop.f32.mrb[66].mxu1 }
0x1424   :  { %v2228_v22 = vpack.c.bf16 %v2219_v20, %v2216_v16  ;;  %v3144_v23 = vpop.f32.mrb[67].mxu1  ;;  %v2461_v16 = vld [vmem:[%s4275_s2 + $0x38] sm:$0xff] }
0x1425   :  { %v2467_v19 = vpack.c.bf16 %v2461_v16, %v2460_v13 }
0x1426   :  { %3150 = vmatmul.mubr.msk.bf16.vlgmr.msra.gmra.mrb[72].mxu0 %vm38_vm1, %v2228_v22 }
0x14f9   :  { %v3151_v24 = vpop.f32.mrb[72].mxu0 }
0x14fa   :  { %v2288_v46 = vpop.f32.mrb[73].mxu0  ;;  %v2297_v26 = vadd.f32 %v3151_v24, %v2246_v62 }
0x14fb   :  { %v2289_v9 = vadd.f32 %v2288_v46, %v2246_v62  ;;  %v3152_v0 = vpop.f32.mrb[74].mxu0 }
0x14fc   :  { %v2291_v32 = vpop.f32.mrb[75].mxu0  ;;  %v2305_v59 = vadd.f32 %v2297_v26, %v4074_v14  ;;  %v2300_v25 = vadd.f32 %v3152_v0, %v2246_v62 }
0x14fd   :  { %v2303_v33 = vadd.f32 %v2289_v9, %v4070_v52  ;;  %v2292_v31 = vadd.f32 %v2291_v32, %v2246_v62 }
0x14fe   :  { %v2306_v10 = vadd.f32 %v2300_v25, %v4068_v38  ;;  %v2314_v28 = vsel %vm38_vm1, %v2305_v59, 0.0 }
0x14ff   :  { %v2304_v15 = vadd.f32 %v2292_v31, %v4072_v35  ;;  %v2308_v39 = vsel %vm38_vm1, %v2303_v33, 0.0 }
0x1500   :  { %2309 = vadd.xlane.f32.xlu0 %v2308_v39  ;;  %v2317_v40 = vsel %vm38_vm1, %v2306_v10, 0.0 }
0x1501   :  { %v2311_v2 = vsel %vm38_vm1, %v2304_v15, 0.0 }
0x1502   :  { %2312 = vadd.xlane.f32.xlu1 %v2311_v2 }
0x1504   :  { %2315 = vadd.xlane.f32.xlu0 %v2314_v28 }
0x1508   :  { %2318 = vadd.xlane.f32.xlu0 %v2317_v40 }
0x158d   :  { %v2310_v52 = vpop.xlane.xlu0 %2309 }
0x158e   :  { %v2320_v14 = vmul.f32 0.03125, %v2310_v52 }
0x158f   :  { %v2313_v41 = vpop.xlane.xlu1 %2312 }
0x1590   :  { %v2321_v12 = vmul.f32 0.03125, %v2313_v41  ;;  %v4145_v27 = vsub.f32 %v2303_v33, %v2320_v14 }
0x1591   :  { %v2316_v44 = vpop.xlane.xlu0 %2315 }
0x1592   :  { %v4143_v35 = vsub.f32 %v2304_v15, %v2321_v12  ;;  %v2322_v60 = vmul.f32 0.03125, %v2316_v44  ;;  %v2328_v55 = vmul.f32 %v4145_v27, %v4145_v27 }
0x1594   :  { %v4147_v4 = vsub.f32 %v2305_v59, %v2322_v60  ;;  %v2329_v38 = vmul.f32 %v4143_v35, %v4143_v35  ;;  %v2332_v58 = vsel %vm38_vm1, %v2328_v55, 0.0 }
0x1595   :  { %v2319_v7 = vpop.xlane.xlu0 %2318 }
0x1596   :  { %v2323_v18 = vmul.f32 0.03125, %v2319_v7  ;;  %v2335_v48 = vsel %vm38_vm1, %v2329_v38, 0.0  ;;  %v2330_v49 = vmul.f32 %v4147_v4, %v4147_v4 }
0x1597   :  { %2336 = vadd.xlane.f32.xlu0 %v2335_v48 }
0x1598   :  { %v4154_v42 = vsub.f32 %v2306_v10, %v2323_v18  ;;  %v2338_v21 = vsel %vm38_vm1, %v2330_v49, 0.0 }
0x1599   :  { %2339 = vadd.xlane.f32.xlu1 %v2338_v21 }
0x159a   :  { %v2331_v57 = vmul.f32 %v4154_v42, %v4154_v42 }
0x159c   :  { %v2341_v36 = vsel %vm38_vm1, %v2331_v57, 0.0 }
0x159d   :  { %2333 = vadd.xlane.f32.xlu1 %v2332_v58  ;;  %2342 = vadd.xlane.f32.xlu0 %v2341_v36 }
0x15ae   :  { %2386 = vrot.lane.b32.xlu1 %v2382_v45, %s3345_s22 }
0x15b2   :  { %2388 = vrot.lane.b32.xlu1 %v2383_v56, %s3345_s22 }
0x15b3   :  { %2369 = vrot.lane.b32.xlu0 %v2812_v54, %s3343_s21 }
0x15b6   :  { %2477 = vrot.lane.b32.xlu1 %v2464_v6, %s3345_s22 }
0x15b7   :  { %2479 = vrot.lane.b32.xlu0 %v2465_v1, %s3345_s22 }
0x15ba   :  { %2481 = vrot.lane.b32.xlu1 %v2466_v5, %s3345_s22 }
0x15bb   :  { %2392 = vrot.lane.b32.xlu0 %v2812_v54, %s3345_s22 }
0x15be   :  { %2483 = vrot.lane.b32.xlu1 %v2467_v19, %s3345_s22 }
0x1624   :  { %v2337_v20 = vpop.xlane.xlu0 %2336 }
0x1625   :  { %v2345_v22 = vmul.f32 0.03125, %v2337_v20 }
0x1626   :  { %v2340_v23 = vpop.xlane.xlu1 %2339 }
0x1627   :  { %v2349_v62 = vadd.f32 1e-05, %v2345_v22  ;;  %v2346_v24 = vmul.f32 0.03125, %v2340_v23 }
0x1629   :  { %3316 = vrsqrt.f32 %v2349_v62  ;;  %v2350_v46 = vadd.f32 1e-05, %v2346_v24 }
0x162a   :  { %v2334_v26 = vpop.xlane.xlu1 %2333  ;;  %v2343_v9 = vpop.xlane.xlu0 %2342 }
0x162b   :  { %3318 = vrsqrt.f32 %v2350_v46  ;;  %v2344_v0 = vmul.f32 0.03125, %v2334_v26  ;;  %v2347_v32 = vmul.f32 0.03125, %v2343_v9 }
0x162d   :  { %v2348_v33 = vadd.f32 1e-05, %v2344_v0  ;;  %v2351_v31 = vadd.f32 1e-05, %v2347_v32 }
0x162e   :  { %v2387_v59 = vpop.permute.xlu1 %2386  ;;  %v2370_v2 = vpop.permute.xlu0 %2369 }
0x162f   :  { %3320 = vrsqrt.f32 %v2348_v33  ;;  %3153 = vmatprep.subr.bf16.mxu1 %v2387_v59 }
0x1630   :  { %3322 = vrsqrt.f32 %v2351_v31  ;;  %3154 = vmatpush3.bf16.msra.mxu1 %v2387_v59 }
0x1632   :  { %v2389_v25 = vpop.permute.xlu1 %2388  ;;  %v2480_v41 = vpop.permute.xlu0 %2479 }
0x1633   :  { %v3317_v15 = vpop.eup %3316  ;;  %3155 = vmatprep.subr.bf16.mxu1 %v2389_v25 }
0x1634   :  { %3156 = vmatpush3.bf16.msra.mxu1 %v2389_v25  ;;  %v2357_v10 = vmul.f32 %v3317_v15, %v4143_v35 }
0x1635   :  { %v3319_v39 = vpop.eup %3318 }
0x1636   :  { %v2358_v28 = vmul.f32 %v3319_v39, %v4147_v4  ;;  %v2478_v40 = vpop.permute.xlu1 %2477  ;;  %v2365_v44 = vmul.f32 %v2812_v54, %v2357_v10 }
0x1637   :  { %3161 = vmatprep.subr.bf16.mxu0 %v2478_v40 }
0x1638   :  { %3162 = vmatpush3.bf16.msra.mxu0 %v2478_v40  ;;  %v2366_v38 = vmul.f32 %v2812_v54, %v2358_v28  ;;  %v2373_v49 = vadd.f32 %v2370_v2, %v2365_v44 }
0x1639   :  { %v3321_v52 = vpop.eup %3320  ;;  %3163 = vmatprep.subr.bf16.mxu0 %v2480_v41 }
0x163a   :  { %v3323_v14 = vpop.eup %3322  ;;  %v2356_v12 = vmul.f32 %v3321_v52, %v4145_v27  ;;  %v2374_v35 = vadd.f32 %v2370_v2, %v2366_v38  ;;  %v2482_v27 = vpop.permute.xlu1 %2481 }
0x163b   :  { %v2359_v60 = vmul.f32 %v3323_v14, %v4154_v42  ;;  %v2393_v42 = vpop.permute.xlu0 %2392 }
0x163c   :  { %v2364_v7 = vmul.f32 %v2812_v54, %v2356_v12  ;;  %3164 = vmatpush3.bf16.msra.mxu0 %v2480_v41 }
0x163d   :  { %v2367_v18 = vmul.f32 %v2812_v54, %v2359_v60  ;;  %3165 = vmatprep.subr.bf16.mxu0 %v2482_v27 }
0x163e   :  { %v2372_v48 = vadd.f32 %v2370_v2, %v2364_v7  ;;  %v2484_v57 = vpop.permute.xlu1 %2483 }
0x163f   :  { %v2375_v4 = vadd.f32 %v2370_v2, %v2367_v18 }
0x1640   :  { %v2380_v21 = vpack.c.bf16 %v2373_v49, %v2372_v48  ;;  %3166 = vmatpush3.bf16.msra.mxu0 %v2482_v27 }
0x1641   :  { %v2381_v55 = vpack.c.bf16 %v2375_v4, %v2374_v35  ;;  %3167 = vmatprep.subr.bf16.mxu0 %v2484_v57 }
0x1642   :  { %3157 = vmatprep.mubr.msk.bf16.mxu1 %vm38_vm1, %v2380_v21 }
0x1643   :  { %3158 = vmatmul.mubr.msk.bf16.vlgmr.msra.gmra.mrb[68].mxu1 %vm38_vm1, %v2381_v55 }
0x1644   :  { %3168 = vmatpush3.bf16.msra.mxu0 %v2484_v57 }
0x1716   :  { %v3159_v58 = vpop.f32.mrb[68].mxu1 }
0x1717   :  { %v2435_v36 = vpop.f32.mrb[69].mxu1  ;;  %v2444_v43 = vadd.f32 %v3159_v58, %v2393_v42 }
0x1718   :  { %v2436_v61 = vadd.f32 %v2435_v36, %v2393_v42  ;;  %v3160_v45 = vpop.f32.mrb[70].mxu1 }
0x1719   :  { %v2447_v63 = vadd.f32 %v3160_v45, %v2393_v42  ;;  %v2438_v47 = vpop.f32.mrb[71].mxu1  ;;  %v2452_v54 = vmax.f32 %v2444_v43, 0.0 }
0x171a   :  { %v2439_v56 = vadd.f32 %v2438_v47, %v2393_v42  ;;  %v2450_v3 = vmax.f32 %v2436_v61, 0.0 }
0x171b   :  { %v2453_v37 = vmax.f32 %v2447_v63, 0.0 }
0x171c   :  { %v2451_v53 = vmax.f32 %v2439_v56, 0.0 }
0x171d   :  { %v2463_v6 = vpack.c.bf16 %v2453_v37, %v2452_v54 }
0x171e   :  { %v2462_v51 = vpack.c.bf16 %v2451_v53, %v2450_v3 }
0x1720   :  { %3169 = vmatprep.mubr.msk.bf16.mxu0 %vm890_vm9, %v2462_v51 }
0x1721   :  { %3170 = vmatmul.mubr.msk.bf16.vlgmr.msra.gmra.mrb[76].mxu0 %vm890_vm9, %v2463_v6 }
0x17f4   :  { %v3171_v8 = vpop.f32.mrb[76].mxu0 }
0x17f5   :  { %v2529_v1 = vpop.f32.mrb[77].mxu0  ;;  %v2538_v5 = vadd.f32 %v3171_v8, %v2815_v50 }
0x17f6   :  { %v2530_v13 = vadd.f32 %v2815_v50, %v2529_v1  ;;  %v3172_v16 = vpop.f32.mrb[78].mxu0 }
0x17f7   :  { %v2532_v19 = vpop.f32.mrb[79].mxu0  ;;  %v2546_v23 = vadd.f32 %v2538_v5, %v2374_v35  ;;  %v2541_v62 = vadd.f32 %v3172_v16, %v2815_v50 }
0x17f8   :  { %v2544_v20 = vadd.f32 %v2530_v13, %v2372_v48  ;;  %v2533_v22 = vadd.f32 %v2815_v50, %v2532_v19 }
0x17f9   :  { %v2547_v9 = vadd.f32 %v2541_v62, %v2375_v4  ;;  %v2554_v0 = vsel %vm38_vm1, %v2546_v23, 0.0 }
0x17fa   :  { %v2545_v24 = vadd.f32 %v2533_v22, %v2373_v49  ;;  %v2548_v46 = vsel %vm38_vm1, %v2544_v20, 0.0  ;;  %v2615_v49 = vld [vmem:[%s4277_s3 + $0x7] sm:$0x1] }
0x17fb   :  { %2549 = vadd.xlane.f32.xlu0 %v2548_v46  ;;  %v2557_v32 = vsel %vm38_vm1, %v2547_v9, 0.0  ;;  %v2648_v62 = vrot.slane %v2615_v49, %v3869_v34 }
0x17fc   :  { %v2551_v26 = vsel %vm38_vm1, %v2545_v24, 0.0 }
0x17fd   :  { %2552 = vadd.xlane.f32.xlu1 %v2551_v26 }
0x17ff   :  { %2555 = vadd.xlane.f32.xlu0 %v2554_v0 }
0x1803   :  { %2558 = vadd.xlane.f32.xlu0 %v2557_v32 }
0x1888   :  { %v2550_v33 = vpop.xlane.xlu0 %2549 }
0x1889   :  { %v2560_v59 = vmul.f32 0.03125, %v2550_v33 }
0x188a   :  { %v2553_v31 = vpop.xlane.xlu1 %2552 }
0x188b   :  { %v2561_v25 = vmul.f32 0.03125, %v2553_v31  ;;  %v2564_v10 = vsub.f32 %v2544_v20, %v2560_v59 }
0x188c   :  { %v2556_v15 = vpop.xlane.xlu0 %2555 }
0x188d   :  { %v2565_v39 = vsub.f32 %v2545_v24, %v2561_v25  ;;  %v2562_v2 = vmul.f32 0.03125, %v2556_v15  ;;  %v2568_v38 = vmul.f32 %v2564_v10, %v2564_v10 }
0x188f   :  { %v2566_v28 = vsub.f32 %v2546_v23, %v2562_v2  ;;  %v2569_v40 = vmul.f32 %v2565_v39, %v2565_v39  ;;  %v2572_v18 = vsel %vm38_vm1, %v2568_v38, 0.0 }
0x1890   :  { %v2559_v52 = vpop.xlane.xlu0 %2558 }
0x1891   :  { %v2563_v41 = vmul.f32 0.03125, %v2559_v52  ;;  %v2575_v14 = vsel %vm38_vm1, %v2569_v40, 0.0  ;;  %v2570_v12 = vmul.f32 %v2566_v28, %v2566_v28 }
0x1892   :  { %2576 = vadd.xlane.f32.xlu0 %v2575_v14 }
0x1893   :  { %v2567_v44 = vsub.f32 %v2547_v9, %v2563_v41  ;;  %v2578_v60 = vsel %vm38_vm1, %v2570_v12, 0.0 }
0x1894   :  { %2579 = vadd.xlane.f32.xlu1 %v2578_v60 }
0x1895   :  { %v2571_v7 = vmul.f32 %v2567_v44, %v2567_v44 }
0x1897   :  { %v2581_v48 = vsel %vm38_vm1, %v2571_v7, 0.0 }
0x1898   :  { %2573 = vadd.xlane.f32.xlu1 %v2572_v18  ;;  %2582 = vadd.xlane.f32.xlu0 %v2581_v48 }
0x18a9   :  { %2601 = vrot.lane.b32.xlu1 %v2815_v50, %s3343_s21 }
0x18ad   :  { %2616 = vrot.lane.b32.xlu1 %v2815_v50, %s3342_s25 }
0x18ae   :  { %2608 = vrot.lane.b32.xlu0 %v2815_v50, %s3345_s22 }
0x18b1   :  { %2636 = vrot.lane.b32.xlu1 %v2615_v49, %s3343_s21 }
0x18b2   :  { %2665 = vrot.lane.b32.xlu0 %v2615_v49, %s3348_s30 }
0x191f   :  { %v2577_v35 = vpop.xlane.xlu0 %2576 }
0x1920   :  { %v2585_v4 = vmul.f32 0.03125, %v2577_v35 }
0x1921   :  { %v2580_v21 = vpop.xlane.xlu1 %2579 }
0x1922   :  { %v2589_v55 = vadd.f32 1e-05, %v2585_v4  ;;  %v2586_v27 = vmul.f32 0.03125, %v2580_v21 }
0x1924   :  { %3324 = vrsqrt.f32 %v2589_v55  ;;  %v2590_v57 = vadd.f32 1e-05, %v2586_v27 }
0x1925   :  { %v2574_v42 = vpop.xlane.xlu1 %2573  ;;  %v2583_v58 = vpop.xlane.xlu0 %2582 }
0x1926   :  { %3326 = vrsqrt.f32 %v2590_v57  ;;  %v2584_v36 = vmul.f32 0.03125, %v2574_v42  ;;  %v2587_v43 = vmul.f32 0.03125, %v2583_v58 }
0x1928   :  { %v2588_v61 = vadd.f32 1e-05, %v2584_v36  ;;  %v2591_v45 = vadd.f32 1e-05, %v2587_v43 }
0x1929   :  { %v2602_v63 = vpop.permute.xlu1 %2601  ;;  %v2609_v47 = vpop.permute.xlu0 %2608 }
0x192a   :  { %3328 = vrsqrt.f32 %v2588_v61 }
0x192b   :  { %3330 = vrsqrt.f32 %v2591_v45 }
0x192d   :  { %v2617_v56 = vpop.permute.xlu1 %2616  ;;  %v2666_v3 = vpop.permute.xlu0 %2665 }
0x192e   :  { %v3325_v54 = vpop.eup %3324 }
0x192f   :  { %v2597_v6 = vmul.f32 %v3325_v54, %v2565_v39 }
0x1930   :  { %v3327_v37 = vpop.eup %3326 }
0x1931   :  { %v2598_v53 = vmul.f32 %v3327_v37, %v2566_v28  ;;  %v2637_v51 = vpop.permute.xlu1 %2636  ;;  %v2605_v13 = vmul.f32 %v2602_v63, %v2597_v6 }
0x1932   :  { %3185 = vpush %v2637_v51 }
0x1933   :  { %v2606_v50 = vmul.f32 %v2602_v63, %v2598_v53  ;;  %3187 = vpush %v2666_v3  ;;  %v2612_v26 = vadd.f32 %v2609_v47, %v2605_v13 }
0x1934   :  { %v3329_v8 = vpop.eup %3328 }
0x1935   :  { %v3331_v1 = vpop.eup %3330  ;;  %v2596_v5 = vmul.f32 %v3329_v8, %v2564_v10  ;;  %v2613_v16 = vadd.f32 %v2609_v47, %v2606_v50  ;;  %v2620_v59 = vmul.f32 %v2617_v56, %v2612_v26  ;;  %v2650_v2 = vmul.f32 %v2648_v62, %v2612_v26 }
0x1936   :  { %v2599_v19 = vmul.f32 %v3331_v1, %v2567_v44 }
0x1937   :  { %v2604_v20 = vmul.f32 %v2602_v63, %v2596_v5  ;;  %v2621_v22 = vmul.f32 %v2617_v56, %v2613_v16  ;;  %v2626_v15 = vsel %vm38_vm1, %v2620_v59, 0.0  ;;  %v2651_v39 = vmul.f32 %v2648_v62, %v2613_v16 }
0x1938   :  { %v2607_v23 = vmul.f32 %v2602_v63, %v2599_v19  ;;  %v2656_v28 = vsel %vm38_vm1, %v2650_v2, 0.0 }
0x1939   :  { %v2629_v24 = vsel %vm38_vm1, %v2621_v22, 0.0  ;;  %v2611_v46 = vadd.f32 %v2609_v47, %v2604_v20  ;;  %v2659_v10 = vsel %vm38_vm1, %v2651_v39, 0.0 }
0x193a   :  { %2630 = vadd.xlane.f32.xlu0 %v2629_v24  ;;  %v2614_v9 = vadd.f32 %v2609_v47, %v2607_v23 }
0x193b   :  { %v2649_v0 = vmul.f32 %v2648_v62, %v2611_v46  ;;  %v2619_v32 = vmul.f32 %v2617_v56, %v2611_v46 }
0x193c   :  { %v2622_v25 = vmul.f32 %v2617_v56, %v2614_v9  ;;  %v2652_v40 = vmul.f32 %v2648_v62, %v2614_v9 }
0x193d   :  { %v2653_v33 = vsel %vm38_vm1, %v2649_v0, 0.0  ;;  %v2623_v31 = vsel %vm38_vm1, %v2619_v32, 0.0 }
0x193e   :  { %2654 = vadd.xlane.f32.xlu0 %v2653_v33  ;;  %2624 = vadd.xlane.f32.xlu1 %v2623_v31  ;;  %v2632_v34 = vsel %vm38_vm1, %v2622_v25, 0.0  ;;  %v2662_v52 = vsel %vm38_vm1, %v2652_v40, 0.0  ;;  %vm2729_vm1 = vcmask 1041408  }
0x1942   :  { %2627 = vadd.xlane.f32.xlu0 %v2626_v15  ;;  %2633 = vadd.xlane.f32.xlu1 %v2632_v34 }
0x1946   :  { %2660 = vadd.xlane.f32.xlu0 %v2659_v10  ;;  %2657 = vadd.xlane.f32.xlu1 %v2656_v28 }
0x194a   :  { %2663 = vadd.xlane.f32.xlu1 %v2662_v52 }
0x1963   :  { %s3186_s3 = spop %3185 }
0x1964   :  { %s3188_s25 = spop %3187  ;;  %v2639_v44 = vstv %s3186_s3 }
0x1965   :  { %v2668_v18 = vstv %s3188_s25 }
0x19c7   :  { %v2631_v41 = vpop.xlane.xlu0 %2630 }
0x19c8   :  { %v2643_v57 = vadd.f32 %v2639_v44, %v2631_v41 }
0x19ca   :  { %v2690_v37 = vrot.slane %v2643_v57, %v3524_v29 }
0x19cb   :  { %v2625_v14 = vpop.xlane.xlu1 %2624  ;;  %v2655_v12 = vpop.xlane.xlu0 %2654 }
0x19cc   :  { %v2641_v48 = vadd.f32 %v2639_v44, %v2625_v14  ;;  %v2670_v49 = vadd.f32 %v2668_v18, %v2655_v12 }
0x19ce   :  { %v2681_v42 = vrot.slane %v2641_v48, %v3524_v29  ;;  %v2705_v58 = vrot.slane %v2670_v49, %v3524_v29 }
0x19cf   :  { %v2634_v60 = vpop.xlane.xlu1 %2633  ;;  %v2628_v38 = vpop.xlane.xlu0 %2627 }
0x19d0   :  { %v2642_v7 = vadd.f32 %v2639_v44, %v2628_v38  ;;  %v2644_v21 = vadd.f32 %v2639_v44, %v2634_v60 }
0x19d2   :  { %v2685_v55 = vrot.slane %v2642_v7, %v3527_v30  ;;  %v2694_v45 = vrot.slane %v2644_v21, %v3527_v30 }
0x19d3   :  { %v2658_v35 = vpop.xlane.xlu1 %2657  ;;  %v2661_v4 = vpop.xlane.xlu0 %2660 }
0x19d4   :  { %v2671_v27 = vadd.f32 %v2668_v18, %v2658_v35  ;;  %v2672_v43 = vadd.f32 %v2668_v18, %v2661_v4  ;;  %v2686_v63 = vsel %vm1267_vm2, %v2685_v55, %v2681_v42  ;;  %v2695_v50 = vsel %vm1267_vm2, %v2694_v45, %v2690_v37 }
0x19d6   :  { %v2709_v36 = vrot.slane %v2671_v27, %v3527_v30  ;;  %v2714_v3 = vrot.slane %v2672_v43, %v3524_v29 }
0x19d7   :  { %v2664_v61 = vpop.xlane.xlu1 %2663 }
0x19d8   :  { %v2710_v47 = vsel %vm1267_vm2, %v2709_v36, %v2705_v58  ;;  %v2673_v56 = vadd.f32 %v2668_v18, %v2664_v61 }
0x19d9   :  { %v2723_v54 = vsel %vm2722_vm0, %v2686_v63, %v2710_v47 }
0x19da   :  { %v2718_v53 = vrot.slane %v2673_v56, %v3527_v30  ;;  %v2725_v6 = vsel %vm1457_vm6, %v2723_v54, 0.0 }
0x19db   :  { %v2727_v51 = vsel %vm3922_vm4, %v2725_v6, -1e+30 }
0x19dc   :  { %v2719_v8 = vsel %vm1267_vm2, %v2718_v53, %v2714_v3  ;;  %v2730_v1 = vsel %vm2729_vm1, %v2727_v51, -inf }
0x19dd   :  { %2731 = vmax.xlane.f32.xlu0 %v2730_v1  ;;  %v2724_v5 = vsel %vm2722_vm0, %v2695_v50, %v2719_v8 }
0x19de   :  { %v2726_v13 = vsel %vm1457_vm6, %v2724_v5, 0.0 }
0x19df   :  { %v2728_v29 = vsel %vm3926_vm5, %v2726_v13, -1e+30 }
0x19e0   :  { %v2733_v30 = vsel %vm2729_vm1, %v2728_v29, -inf }
0x19e1   :  { %2734 = vmax.xlane.f32.xlu1 %v2733_v30 }
0x1a6a   :  { %v2732_v16 = vpop.xlane.xlu0 %2731 }
0x1a6b   :  { %v2736_v11 = vsub.f32 %v2727_v51, %v2732_v16 }
0x1a6d   :  { %v2738_v19 = vmul.f32 1.442695, %v2736_v11 }
0x1a6e   :  { %v2735_v20 = vpop.xlane.xlu1 %2734 }
0x1a6f   :  { %3332 = vpow2.f32 %v2738_v19  ;;  %v2737_v22 = vsub.f32 %v2728_v29, %v2735_v20 }
0x1a71   :  { %v2740_v23 = vmul.f32 1.442695, %v2737_v22 }
0x1a73   :  { %3334 = vpow2.f32 %v2740_v23 }
0x1a79   :  { %v3333_v62 = vpop.eup %3332 }
0x1a7a   :  { %v2742_v24 = vsel %vm2729_vm1, %v3333_v62, 0.0 }
0x1a7b   :  { %2743 = vadd.xlane.f32.xlu0 %v2742_v24 }
0x1a7d   :  { %v3335_v46 = vpop.eup %3334 }
0x1a7e   :  { %v2745_v26 = vsel %vm2729_vm1, %v3335_v46, 0.0 }
0x1a7f   :  { %2746 = vadd.xlane.f32.xlu1 %v2745_v26 }
0x1b08   :  { %v2744_v17 = vpop.xlane.xlu0 %2743 }
0x1b09   :  { %3336 = vlog2.f32 %v2744_v17 }
0x1b0c   :  { %v2747_v9 = vpop.xlane.xlu1 %2746 }
0x1b0d   :  { %3338 = vlog2.f32 %v2747_v9 }
0x1b13   :  { %v3337_v0 = vpop.eup %3336 }
0x1b14   :  { %v2749_v32 = vmul.f32 0.6931472, %v3337_v0 }
0x1b16   :  { %v2752_v33 = vadd.f32 %v2749_v32, %v2732_v16 }
0x1b17   :  { %v3339_v31 = vpop.eup %3338 }
0x1b18   :  { %v2754_v59 = vsub.f32 %v2727_v51, %v2752_v33  ;;  %v2751_v25 = vmul.f32 0.6931472, %v3339_v31 }
0x1b1a   :  { %2756 = vst [vmem:[%s4279_s4] sm:$0x3] %v2754_v59  ;;  %v2753_v15 = vadd.f32 %v2751_v25, %v2735_v20 }
0x1b1c   :  { %v2755_v34 = vsub.f32 %v2728_v29, %v2753_v15 }
0x1b1e   :  { %2757 = vst [vmem:[%s4279_s4 + $0x2] sm:$0x3] %v2755_v34 }

</bundles_post_ra>
